<compile_context>
chip_gen: v7x
topology: tpu7x:2x2x1
jax: 0.10.0
libtpu: 0.0.40
codegen_flags: <defaults>
</compile_context>

<pallas_src>
import functools

import jax
import jax.numpy as jnp
from jax.experimental import pallas as pl
from jax.experimental.pallas import tpu as pltpu


# ----------------------------------------------------------------------------
# Tile preferences / padding helpers
# ----------------------------------------------------------------------------
_TM_PREF = 256            # M (rows of im2col) tile cap
_TN_PREF = 512            # N (output channels) tile cap
_TK_PREF = 2048           # K (taps * input channels) tile cap
_VMEM_LIMIT = 32 * 1024 * 1024   # safe on v5e / v6e / v7x; >> worst-case tiles


def _round_up(x, m):
    return (x + m - 1) // m * m


def _choose(dim, align, pref):
    """Return (padded_dim, tile) with padded_dim % tile == 0 and tile <= pref."""
    p = _round_up(dim, align)
    if p <= pref:
        return p, p
    p = _round_up(dim, pref)
    return p, pref


def _pad_weight(B):
    """Pad a (K, N) f32 weight matrix to lane/tile-aligned (Kp, Np), cast bf16."""
    K, N = B.shape
    Kp, _ = _choose(K, 128, _TK_PREF)
    Np, _ = _choose(N, 128, _TN_PREF)
    return jnp.pad(B, ((0, Kp - K), (0, Np - N))).astype(jnp.bfloat16)


def _pad_bias(b):
    N = b.shape[0]
    Np, _ = _choose(N, 128, _TN_PREF)
    return jnp.pad(b, (0, Np - N)).reshape(1, Np).astype(jnp.float32)


# ----------------------------------------------------------------------------
# Fused Pallas matmul kernel (grouped):
#   out[g] = post_act(pre_act(A[g]) @ B[g] + bias)
#   stats[g, i, 0, :] = per-channel sum of the pre-post_act result (for BN)
#   stats[g, i, 1, :] = per-channel sum of squares
# ----------------------------------------------------------------------------
def _mm_kernel(a_ref, b_ref, bias_ref, o_ref, stats_ref, acc_ref,
               *, pre_act, post_act):
    @pl.when(pl.program_id(3) == 0)
    def _():
        acc_ref[...] = jnp.zeros_like(acc_ref)

    a = a_ref[0]                                   # (TM, TK) bf16
    if pre_act == "lrelu":
        a = jnp.where(a >= 0, a, 0.2 * a)
    elif pre_act == "relu":
        a = jnp.maximum(a, 0)

    acc_ref[...] += jnp.dot(a, b_ref[0], preferred_element_type=jnp.float32)

    @pl.when(pl.program_id(3) == pl.num_programs(3) - 1)
    def _():
        r = acc_ref[...] + bias_ref[...]           # (TM, TN) f32
        # BatchNorm partial statistics (cheap XLU reduce, free under the MXU).
        s0 = jnp.sum(r, axis=0, keepdims=True)
        s1 = jnp.sum(r * r, axis=0, keepdims=True)
        st = jnp.concatenate(
            [s0, s1, jnp.zeros((6, r.shape[1]), jnp.float32)], axis=0)
        stats_ref[...] = st[None, None]            # (1, 1, 8, TN)
        if post_act == "tanh":
            r = jnp.tanh(r)
        o_ref[0] = r.astype(o_ref.dtype)


def matmul_fused(a, b_pad, bias_pad, n_out, *, pre_act=None, post_act=None,
                 out_dtype=jnp.bfloat16):
    """a: (G, M, K) float; b_pad: (G, Kp, Np) bf16 pre-padded; bias: (1, Np) f32.

    Returns:
      out      : (G, M, n_out) out_dtype = post_act(pre_act(A) @ B + bias)
      col_sum  : (n_out,) f32 per-channel sum over all G*M rows (pre post_act)
      col_sq   : (n_out,) f32 per-channel sum of squares
    """
    G, M, K = a.shape
    _, Kp, Np = b_pad.shape
    Mp, TM = _choose(M, 8, _TM_PREF)
    TK = Kp if Kp <= _TK_PREF else _TK_PREF
    TN = Np if Np <= _TN_PREF else _TN_PREF

    a = a.astype(jnp.bfloat16)
    if (Mp, Kp) != (M, K):
        a = jnp.pad(a, ((0, 0), (0, Mp - M), (0, Kp - K)))

    mi = Mp // TM
    out, stats = pl.pallas_call(
        functools.partial(_mm_kernel, pre_act=pre_act, post_act=post_act),
        out_shape=(jax.ShapeDtypeStruct((G, Mp, Np), out_dtype),
                   jax.ShapeDtypeStruct((G, mi, 8, Np), jnp.float32)),
        grid=(G, mi, Np // TN, Kp // TK),
        in_specs=[
            pl.BlockSpec((1, TM, TK), lambda g, i, j, k: (g, i, k)),
            pl.BlockSpec((1, TK, TN), lambda g, i, j, k: (g, k, j)),
            pl.BlockSpec((1, TN), lambda g, i, j, k: (0, j)),
        ],
        out_specs=(
            pl.BlockSpec((1, TM, TN), lambda g, i, j, k: (g, i, j)),
            pl.BlockSpec((1, 1, 8, TN), lambda g, i, j, k: (g, i, 0, j)),
        ),
        scratch_shapes=[pltpu.VMEM((TM, TN), jnp.float32)],
        compiler_params=pltpu.CompilerParams(
            dimension_semantics=("parallel", "parallel", "parallel", "arbitrary"),
            vmem_limit_bytes=_VMEM_LIMIT),
    )(a, b_pad, bias_pad)

    out = out[:, :M, :n_out]
    col_sum = jnp.sum(stats[:, :, 0, :n_out], axis=(0, 1))
    col_sq = jnp.sum(stats[:, :, 1, :n_out], axis=(0, 1))
    return out, col_sum, col_sq


# ----------------------------------------------------------------------------
# Conv wrappers (patch-build glue in JAX, all FLOPs + activations in the kernel)
# ----------------------------------------------------------------------------
def conv_down(x, B_pad, bias_pad, n_out, pre_act=None, out_dtype=jnp.bfloat16):
    """Conv2d(k=4, s=2, p=1), bias=0 for BN-fed convs.  x: NHWC.
    pre_act is the LeakyReLU preceding the conv in the PyTorch Sequential
    (applied inside the kernel to the patches; lrelu(0)=0, so the zero spatial
    padding commutes)."""
    N, H, W, Cin = x.shape
    Ho, Wo = H // 2, W // 2
    xb = x.astype(jnp.bfloat16)
    xp = jnp.pad(xb, ((0, 0), (1, 1), (1, 1), (0, 0)))
    cols = [xp[:, kh:kh + 2 * Ho:2, kw:kw + 2 * Wo:2, :]
            for kh in range(4) for kw in range(4)]
    A = jnp.concatenate(cols, axis=-1).reshape(1, N * Ho * Wo, 16 * Cin)
    out, s, q = matmul_fused(A, B_pad, bias_pad, n_out,
                             pre_act=pre_act, out_dtype=out_dtype)
    return out.reshape(N, Ho, Wo, n_out), s, q


# For output row parity a: list of (input-row offset, kernel row index) taps.
#   even rows (a=0): x[m]*w[ky=1] + x[m-1]*w[ky=3]
#   odd  rows (a=1): x[m]*w[ky=2] + x[m+1]*w[ky=0]
_PARITY_TAPS = {0: ((0, 1), (-1, 3)), 1: ((0, 2), (1, 0))}


def conv_up(x, B4_pad, bias_pad, n_out, post_act=None, out_dtype=jnp.bfloat16):
    """ConvTranspose2d(k=4, s=2, p=1) as 4 parity sub-convolutions (2x2-tap,
    stride-1, K = 4*Cin -> 4x fewer MXU FLOPs than zero-dilated 4x4 im2col),
    all 4 parities merged into ONE pallas_call via a leading parallel grid axis.
    ReLU (uprelu) is fused as the kernel's pre-activation.  x: NHWC."""
    N, H, W, Cin = x.shape
    xb = x.astype(jnp.bfloat16)
    xp = jnp.pad(xb, ((0, 0), (1, 1), (1, 1), (0, 0)))
    mats = []
    for a in (0, 1):
        for b in (0, 1):
            cols = []
            for (dy, _ky) in _PARITY_TAPS[a]:
                for (dx, _kx) in _PARITY_TAPS[b]:
                    cols.append(xp[:, 1 + dy:1 + dy + H, 1 + dx:1 + dx + W, :])
            mats.append(jnp.concatenate(cols, axis=-1).reshape(N * H * W, 4 * Cin))
    A = jnp.stack(mats, axis=0)                    # (4, N*H*W, 4*Cin)
    out, s, q = matmul_fused(A, B4_pad, bias_pad, n_out, pre_act="relu",
                             post_act=post_act, out_dtype=out_dtype)
    # (4, M, C) -> (2, 2, N, H, W, C) -> (N, H, 2, W, 2, C) -> (N, 2H, 2W, C)
    y = out.reshape(2, 2, N, H, W, n_out)
    y = jnp.transpose(y, (2, 3, 0, 4, 1, 5)).reshape(N, 2 * H, 2 * W, n_out)
    return y, s, q


def bn_apply(x, col_sum, col_sq, count, gamma, beta, eps=1e-5):
    """BatchNorm2d (training-mode batch stats) using the per-channel sum /
    sum-of-squares already produced by the conv kernel's epilogue.  The affine
    here is a tiny elementwise op that XLA fuses into the next patch build."""
    mean = col_sum / count
    var = jnp.maximum(col_sq / count - mean * mean, 0.0)
    scale = gamma * jax.lax.rsqrt(var + eps)
    shift = beta - mean * scale
    return (x.astype(jnp.float32) * scale + shift).astype(x.dtype)


# ----------------------------------------------------------------------------
# UnetGenerator parameters + forward (mirrors UnetSkipConnectionBlock recursion)
# ----------------------------------------------------------------------------
def build_unet_params(key, input_nc, output_nc, num_downs, ngf):
    keys = iter(jax.random.split(key, 256))

    def prep_down_weight(w):                 # w: (Cout, Cin, 4, 4) PyTorch layout
        cout, cin = w.shape[0], w.shape[1]
        B = jnp.transpose(w, (2, 3, 1, 0)).reshape(16 * cin, cout)
        return _pad_weight(B)[None]          # (1, Kp, Np)

    def prep_up_weights(w):                  # w: (Cin, Cout, 4, 4) PyTorch layout
        cin, cout = w.shape[0], w.shape[1]
        Bs = []
        for a in (0, 1):
            for b in (0, 1):
                taps = []
                for (_dy, ky) in _PARITY_TAPS[a]:
                    for (_dx, kx) in _PARITY_TAPS[b]:
                        taps.append(w[:, :, ky, kx])          # (Cin, Cout)
                Bs.append(_pad_weight(jnp.stack(taps, 0).reshape(4 * cin, cout)))
        return jnp.stack(Bs, axis=0)          # (4, Kp, Np)

    def make_block(outer_nc, inner_nc, in_nc=None, submodule=None,
                   outermost=False, innermost=False):
        if in_nc is None:
            in_nc = outer_nc
        p = {"outermost": outermost, "innermost": innermost, "submodule": submodule,
             "down_nc": inner_nc, "up_nc": outer_nc}
        # downconv: Conv2d(in_nc, inner_nc, 4, 2, 1, bias=False)  (BatchNorm case)
        w_down = 0.05 * jax.random.normal(next(keys), (inner_nc, in_nc, 4, 4),
                                          jnp.float32)
        p["down_B"] = prep_down_weight(w_down)
        p["down_bias"] = _pad_bias(jnp.zeros((inner_nc,), jnp.float32))
        if (not outermost) and (not innermost):
            p["down_gamma"] = jnp.ones((inner_nc,), jnp.float32)
            p["down_beta"] = jnp.zeros((inner_nc,), jnp.float32)
        # upconv: ConvTranspose2d(up_in, outer_nc, 4, 2, 1)
        up_in = inner_nc if innermost else inner_nc * 2
        w_up = 0.05 * jax.random.normal(next(keys), (up_in, outer_nc, 4, 4),
                                        jnp.float32)
        p["up_Bs"] = prep_up_weights(w_up)
        if outermost:
            up_b = 0.05 * jax.random.normal(next(keys), (outer_nc,), jnp.float32)
        else:
            up_b = jnp.zeros((outer_nc,), jnp.float32)
        p["up_bias"] = _pad_bias(up_b)
        if not outermost:
            p["up_gamma"] = jnp.ones((outer_nc,), jnp.float32)
            p["up_beta"] = jnp.zeros((outer_nc,), jnp.float32)
        return p

    block = make_block(ngf * 8, ngf * 8, innermost=True)
    for _ in range(num_downs - 5):
        # use_dropout=False (default) -> no Dropout layer
        block = make_block(ngf * 8, ngf * 8, submodule=block)
    block = make_block(ngf * 4, ngf * 8, submodule=block)
    block = make_block(ngf * 2, ngf * 4, submodule=block)
    block = make_block(ngf, ngf * 2, submodule=block)
    block = make_block(output_nc, ngf, in_nc=input_nc, submodule=block,
                       outermost=True)
    return block


def run_block(p, x):
    """UnetSkipConnectionBlock.forward, x in NHWC (skip-concat along channels).
    downrelu/uprelu are fused into the following conv's patch side; Tanh into
    the outermost up-conv epilogue; BatchNorm stats come from the conv kernel."""
    if p["outermost"]:
        h, _, _ = conv_down(x, p["down_B"], p["down_bias"], p["down_nc"])
        h = run_block(p["submodule"], h)
        y, _, _ = conv_up(h, p["up_Bs"], p["up_bias"], p["up_nc"],
                          post_act="tanh", out_dtype=jnp.float32)
        return y
    elif p["innermost"]:
        h, _, _ = conv_down(x, p["down_B"], p["down_bias"], p["down_nc"],
                            pre_act="lrelu")                       # downrelu+conv
        h, s, q = conv_up(h, p["up_Bs"], p["up_bias"], p["up_nc"])  # uprelu+deconv
        cnt = h.shape[0] * h.shape[1] * h.shape[2]
        h = bn_apply(h, s, q, cnt, p["up_gamma"], p["up_beta"])     # upnorm
        return jnp.concatenate([x, h], axis=-1)                     # skip
    else:
        h, s, q = conv_down(x, p["down_B"], p["down_bias"], p["down_nc"],
                            pre_act="lrelu")                        # downrelu+conv
        cnt = h.shape[0] * h.shape[1] * h.shape[2]
        h = bn_apply(h, s, q, cnt, p["down_gamma"], p["down_beta"]) # downnorm
        h = run_block(p["submodule"], h)                            # submodule
        h, s, q = conv_up(h, p["up_Bs"], p["up_bias"], p["up_nc"])  # uprelu+deconv
        cnt = h.shape[0] * h.shape[1] * h.shape[2]
        h = bn_apply(h, s, q, cnt, p["up_gamma"], p["up_beta"])     # upnorm
        return jnp.concatenate([x, h], axis=-1)                     # skip


def unet_generator_forward(params, x_nchw):
    x = jnp.transpose(x_nchw, (0, 2, 3, 1))  # NCHW -> NHWC
    y = run_block(params, x)
    return jnp.transpose(y, (0, 3, 1, 2))    # NHWC -> NCHW


if __name__ == "__main__":
    # Small, consistent configuration:
    #   input_nc=3, output_nc=3, num_downs=5, ngf=8  =>  needs >= 32x32 input.
    input_nc, output_nc, num_downs, ngf = 3, 3, 5, 8
    batch, H, W = 2, 32, 32

    key = jax.random.PRNGKey(0)
    k_param, k_x = jax.random.split(key)
    params = build_unet_params(k_param, input_nc, output_nc, num_downs, ngf)
    x = jax.random.normal(k_x, (batch, input_nc, H, W), jnp.float32)

    fwd = jax.jit(lambda inp: unet_generator_forward(params, inp))
    y = jax.block_until_ready(fwd(x))

    assert y.shape == (batch, output_nc, H, W), y.shape
    assert bool(jnp.all(jnp.isfinite(y)))
    print("KERNEL_OK")
</pallas_src>

<mosaic_0001>
module attributes {stable_mosaic.version = 11 : i64} {
  func.func @_mm_kernel(%arg0: i32, %arg1: i32, %arg2: i32, %arg3: i32, %arg4: memref<1x256x128xbf16, #tpu.memory_space<vmem>>, %arg5: memref<1x128x128xbf16, #tpu.memory_space<vmem>>, %arg6: memref<1x128xf32, #tpu.memory_space<vmem>>, %arg7: memref<1x256x128xbf16, #tpu.memory_space<vmem>>, %arg8: memref<1x1x8x128xf32, #tpu.memory_space<vmem>>, %arg9: memref<256x128xf32, #tpu.memory_space<vmem>>) attributes {dimension_semantics = [#tpu.dimension_semantics<parallel>, #tpu.dimension_semantics<parallel>, #tpu.dimension_semantics<parallel>, #tpu.dimension_semantics<arbitrary>], iteration_bounds = array<i64: 1, 2, 1, 1>, scalar_prefetch = 0 : i64, scratch_operands = 1 : i64, tpu.core_type = #tpu.core_type<tc>, window_params = [{transform_indices = @transform_0, window_bounds = array<i64: 1, 256, 128>}, {transform_indices = @transform_1, window_bounds = array<i64: 1, 128, 128>}, {transform_indices = @transform_2, window_bounds = array<i64: 1, 128>}, {transform_indices = @transform_3, window_bounds = array<i64: 1, 256, 128>}, {transform_indices = @transform_4, window_bounds = array<i64: 1, 1, 8, 128>}]} {
    %c0_i32 = arith.constant 0 : i32
    %0 = arith.cmpi eq, %arg3, %c0_i32 : i32
    %1 = arith.extui %0 : i1 to i32
    %c0_i32_0 = arith.constant 0 : i32
    %2 = arith.cmpi ne, %1, %c0_i32_0 : i32
    scf.if %2 {
      %cst_12 = arith.constant 0.000000e+00 : f32
      %14 = vector.broadcast %cst_12 : f32 to vector<256x128xf32>
      %c0_13 = arith.constant 0 : index
      %c0_14 = arith.constant 0 : index
      %15 = vector.load %arg9[%c0_13, %c0_14] : memref<256x128xf32, #tpu.memory_space<vmem>>, vector<256x128xf32>
      tpu.vector_store %arg9[%c0_13, %c0_14], %14 {strides = array<i32>} : memref<256x128xf32, #tpu.memory_space<vmem>>, vector<256x128xf32>,
    } else {
    }
    %c0 = arith.constant 0 : index
    %c0_1 = arith.constant 0 : index
    %c0_2 = arith.constant 0 : index
    %3 = vector.load %arg4[%c0, %c0_1, %c0_2] : memref<1x256x128xbf16, #tpu.memory_space<vmem>>, vector<1x256x128xbf16>
    %4 = vector.shape_cast %3 : vector<1x256x128xbf16> to vector<256x128xbf16>
    %c0_3 = arith.constant 0 : index
    %c0_4 = arith.constant 0 : index
    %5 = vector.load %arg9[%c0_3, %c0_4] : memref<256x128xf32, #tpu.memory_space<vmem>>, vector<256x128xf32>
    %c0_5 = arith.constant 0 : index
    %c0_6 = arith.constant 0 : index
    %c0_7 = arith.constant 0 : index
    %6 = vector.load %arg5[%c0_5, %c0_6, %c0_7] : memref<1x128x128xbf16, #tpu.memory_space<vmem>>, vector<1x128x128xbf16>
    %7 = vector.shape_cast %6 : vector<1x128x128xbf16> to vector<128x128xbf16>
    %cst = arith.constant dense<0.000000e+00> : vector<256x128xf32>
    %8 = tpu.matmul %4, %7, %cst {dimension_numbers = #tpu.dot_dimension_numbers<[1], [0], [0], [1], [0, 0, 1, 1], [], []>} : vector<256x128xbf16>, vector<128x128xbf16>, vector<256x128xf32> -> vector<256x128xf32>
    %9 = arith.addf %5, %8 : vector<256x128xf32>
    %c0_8 = arith.constant 0 : index
    %c0_9 = arith.constant 0 : index
    %10 = vector.load %arg9[%c0_8, %c0_9] : memref<256x128xf32, #tpu.memory_space<vmem>>, vector<256x128xf32>
    tpu.vector_store %arg9[%c0_8, %c0_9], %9 {strides = array<i32>} : memref<256x128xf32, #tpu.memory_space<vmem>>, vector<256x128xf32>,
    %c0_i32_10 = arith.constant 0 : i32
    %11 = arith.cmpi eq, %arg3, %c0_i32_10 : i32
    %12 = arith.extui %11 : i1 to i32
    %c0_i32_11 = arith.constant 0 : i32
    %13 = arith.cmpi ne, %12, %c0_i32_11 : i32
    scf.if %13 {
      %c0_12 = arith.constant 0 : index
      %c0_13 = arith.constant 0 : index
      %14 = vector.load %arg9[%c0_12, %c0_13] : memref<256x128xf32, #tpu.memory_space<vmem>>, vector<256x128xf32>
      %c0_14 = arith.constant 0 : index
      %c0_15 = arith.constant 0 : index
      %15 = vector.load %arg6[%c0_14, %c0_15] : memref<1x128xf32, #tpu.memory_space<vmem>>, vector<1x128xf32>
      %16 = vector.broadcast %15 : vector<1x128xf32> to vector<256x128xf32>
      %17 = arith.addf %14, %16 : vector<256x128xf32>
      %cst_16 = arith.constant dense<0.000000e+00> : vector<128xf32>
      %18 = vector.multi_reduction <add>, %17, %cst_16 [0] : vector<256x128xf32> to vector<128xf32>
      %19 = vector.shape_cast %18 : vector<128xf32> to vector<1x128xf32>
      %20 = arith.mulf %17, %17 : vector<256x128xf32>
      %cst_17 = arith.constant dense<0.000000e+00> : vector<128xf32>
      %21 = vector.multi_reduction <add>, %20, %cst_17 [0] : vector<256x128xf32> to vector<128xf32>
      %22 = vector.shape_cast %21 : vector<128xf32> to vector<1x128xf32>
      %cst_18 = arith.constant 0.000000e+00 : f32
      %23 = vector.broadcast %cst_18 : f32 to vector<6x128xf32>
      %24 = tpu.concatenate %19, %22, %23 in 0 : vector<1x128xf32>, vector<1x128xf32>, vector<6x128xf32> -> vector<8x128xf32>
      %25 = vector.shape_cast %24 : vector<8x128xf32> to vector<1x1x8x128xf32>
      %c0_19 = arith.constant 0 : index
      %c0_20 = arith.constant 0 : index
      %c0_21 = arith.constant 0 : index
      %c0_22 = arith.constant 0 : index
      %26 = vector.load %arg8[%c0_19, %c0_20, %c0_21, %c0_22] : memref<1x1x8x128xf32, #tpu.memory_space<vmem>>, vector<1x1x8x128xf32>
      tpu.vector_store %arg8[%c0_19, %c0_20, %c0_21, %c0_22], %25 {strides = array<i32>} : memref<1x1x8x128xf32, #tpu.memory_space<vmem>>, vector<1x1x8x128xf32>,
      %27 = arith.truncf %17 : vector<256x128xf32> to vector<256x128xbf16>
      %c0_23 = arith.constant 0 : index
      %c0_24 = arith.constant 0 : index
      %c0_25 = arith.constant 0 : index
      %28 = vector.load %arg7[%c0_23, %c0_24, %c0_25] : memref<1x256x128xbf16, #tpu.memory_space<vmem>>, vector<1x256x128xbf16>
      %29 = vector.shape_cast %28 : vector<1x256x128xbf16> to vector<256x128xbf16>
      %30 = vector.shape_cast %27 : vector<256x128xbf16> to vector<1x256x128xbf16>
      tpu.vector_store %arg7[%c0_23, %c0_24, %c0_25], %30 {strides = array<i32>} : memref<1x256x128xbf16, #tpu.memory_space<vmem>>, vector<1x256x128xbf16>,
    } else {
    }
    return
  }
  func.func @transform_0(%arg0: i32, %arg1: i32, %arg2: i32, %arg3: i32) -> (i32, i32, i32) {
    %c0_i32 = arith.constant 0 : i32
    return %arg0, %arg1, %arg3 : i32, i32, i32
  }
  func.func @transform_1(%arg0: i32, %arg1: i32, %arg2: i32, %arg3: i32) -> (i32, i32, i32) {
    %c0_i32 = arith.constant 0 : i32
    return %arg0, %arg3, %arg2 : i32, i32, i32
  }
  func.func @transform_2(%arg0: i32, %arg1: i32, %arg2: i32, %arg3: i32) -> (i32, i32) {
    %c0_i32 = arith.constant 0 : i32
    %c0_i32_0 = arith.constant 0 : i32
    return %c0_i32, %arg2 : i32, i32
  }
  func.func @transform_3(%arg0: i32, %arg1: i32, %arg2: i32, %arg3: i32) -> (i32, i32, i32) {
    %c0_i32 = arith.constant 0 : i32
    return %arg0, %arg1, %arg2 : i32, i32, i32
  }
  func.func @transform_4(%arg0: i32, %arg1: i32, %arg2: i32, %arg3: i32) -> (i32, i32, i32, i32) {
    %c0_i32 = arith.constant 0 : i32
    %c0_i32_0 = arith.constant 0 : i32
    return %arg0, %arg1, %c0_i32, %arg2 : i32, i32, i32, i32
  }
}

module attributes {stable_mosaic.version = 11 : i64} {
  func.func @_mm_kernel(%arg0: i32, %arg1: i32, %arg2: i32, %arg3: i32, %arg4: memref<1x128x128xbf16, #tpu.memory_space<vmem>>, %arg5: memref<1x128x128xbf16, #tpu.memory_space<vmem>>, %arg6: memref<1x128xf32, #tpu.memory_space<vmem>>, %arg7: memref<1x128x128xbf16, #tpu.memory_space<vmem>>, %arg8: memref<1x1x8x128xf32, #tpu.memory_space<vmem>>, %arg9: memref<128x128xf32, #tpu.memory_space<vmem>>) attributes {dimension_semantics = [#tpu.dimension_semantics<parallel>, #tpu.dimension_semantics<parallel>, #tpu.dimension_semantics<parallel>, #tpu.dimension_semantics<arbitrary>], iteration_bounds = array<i64: 1, 1, 1, 1>, scalar_prefetch = 0 : i64, scratch_operands = 1 : i64, tpu.core_type = #tpu.core_type<tc>, window_params = [{transform_indices = @transform_0, window_bounds = array<i64: 1, 128, 128>}, {transform_indices = @transform_1, window_bounds = array<i64: 1, 128, 128>}, {transform_indices = @transform_2, window_bounds = array<i64: 1, 128>}, {transform_indices = @transform_3, window_bounds = array<i64: 1, 128, 128>}, {transform_indices = @transform_4, window_bounds = array<i64: 1, 1, 8, 128>}]} {
    %c0_i32 = arith.constant 0 : i32
    %0 = arith.cmpi eq, %arg3, %c0_i32 : i32
    %1 = arith.extui %0 : i1 to i32
    %c0_i32_0 = arith.constant 0 : i32
    %2 = arith.cmpi ne, %1, %c0_i32_0 : i32
    scf.if %2 {
      %cst_14 = arith.constant 0.000000e+00 : f32
      %19 = vector.broadcast %cst_14 : f32 to vector<128x128xf32>
      %c0_15 = arith.constant 0 : index
      %c0_16 = arith.constant 0 : index
      %20 = vector.load %arg9[%c0_15, %c0_16] : memref<128x128xf32, #tpu.memory_space<vmem>>, vector<128x128xf32>
      tpu.vector_store %arg9[%c0_15, %c0_16], %19 {strides = array<i32>} : memref<128x128xf32, #tpu.memory_space<vmem>>, vector<128x128xf32>,
    } else {
    }
    %c0 = arith.constant 0 : index
    %c0_1 = arith.constant 0 : index
    %c0_2 = arith.constant 0 : index
    %3 = vector.load %arg4[%c0, %c0_1, %c0_2] : memref<1x128x128xbf16, #tpu.memory_space<vmem>>, vector<1x128x128xbf16>
    %4 = vector.shape_cast %3 : vector<1x128x128xbf16> to vector<128x128xbf16>
    %cst = arith.constant 0.000000e+00 : bf16
    %5 = vector.broadcast %cst : bf16 to vector<128x128xbf16>
    %6 = arith.cmpf oge, %4, %5 : vector<128x128xbf16>
    %cst_3 = arith.constant 2.001950e-01 : bf16
    %7 = vector.broadcast %cst_3 : bf16 to vector<128x128xbf16>
    %8 = arith.mulf %7, %4 : vector<128x128xbf16>
    %9 = arith.select %6, %4, %8 : vector<128x128xi1>, vector<128x128xbf16>
    %c0_4 = arith.constant 0 : index
    %c0_5 = arith.constant 0 : index
    %10 = vector.load %arg9[%c0_4, %c0_5] : memref<128x128xf32, #tpu.memory_space<vmem>>, vector<128x128xf32>
    %c0_6 = arith.constant 0 : index
    %c0_7 = arith.constant 0 : index
    %c0_8 = arith.constant 0 : index
    %11 = vector.load %arg5[%c0_6, %c0_7, %c0_8] : memref<1x128x128xbf16, #tpu.memory_space<vmem>>, vector<1x128x128xbf16>
    %12 = vector.shape_cast %11 : vector<1x128x128xbf16> to vector<128x128xbf16>
    %cst_9 = arith.constant dense<0.000000e+00> : vector<128x128xf32>
    %13 = tpu.matmul %9, %12, %cst_9 {dimension_numbers = #tpu.dot_dimension_numbers<[1], [0], [0], [1], [0, 0, 1, 1], [], []>} : vector<128x128xbf16>, vector<128x128xbf16>, vector<128x128xf32> -> vector<128x128xf32>
    %14 = arith.addf %10, %13 : vector<128x128xf32>
    %c0_10 = arith.constant 0 : index
    %c0_11 = arith.constant 0 : index
    %15 = vector.load %arg9[%c0_10, %c0_11] : memref<128x128xf32, #tpu.memory_space<vmem>>, vector<128x128xf32>
    tpu.vector_store %arg9[%c0_10, %c0_11], %14 {strides = array<i32>} : memref<128x128xf32, #tpu.memory_space<vmem>>, vector<128x128xf32>,
    %c0_i32_12 = arith.constant 0 : i32
    %16 = arith.cmpi eq, %arg3, %c0_i32_12 : i32
    %17 = arith.extui %16 : i1 to i32
    %c0_i32_13 = arith.constant 0 : i32
    %18 = arith.cmpi ne, %17, %c0_i32_13 : i32
    scf.if %18 {
      %c0_14 = arith.constant 0 : index
      %c0_15 = arith.constant 0 : index
      %19 = vector.load %arg9[%c0_14, %c0_15] : memref<128x128xf32, #tpu.memory_space<vmem>>, vector<128x128xf32>
      %c0_16 = arith.constant 0 : index
      %c0_17 = arith.constant 0 : index
      %20 = vector.load %arg6[%c0_16, %c0_17] : memref<1x128xf32, #tpu.memory_space<vmem>>, vector<1x128xf32>
      %21 = vector.broadcast %20 : vector<1x128xf32> to vector<128x128xf32>
      %22 = arith.addf %19, %21 : vector<128x128xf32>
      %cst_18 = arith.constant dense<0.000000e+00> : vector<128xf32>
      %23 = vector.multi_reduction <add>, %22, %cst_18 [0] : vector<128x128xf32> to vector<128xf32>
      %24 = vector.shape_cast %23 : vector<128xf32> to vector<1x128xf32>
      %25 = arith.mulf %22, %22 : vector<128x128xf32>
      %cst_19 = arith.constant dense<0.000000e+00> : vector<128xf32>
      %26 = vector.multi_reduction <add>, %25, %cst_19 [0] : vector<128x128xf32> to vector<128xf32>
      %27 = vector.shape_cast %26 : vector<128xf32> to vector<1x128xf32>
      %cst_20 = arith.constant 0.000000e+00 : f32
      %28 = vector.broadcast %cst_20 : f32 to vector<6x128xf32>
      %29 = tpu.concatenate %24, %27, %28 in 0 : vector<1x128xf32>, vector<1x128xf32>, vector<6x128xf32> -> vector<8x128xf32>
      %30 = vector.shape_cast %29 : vector<8x128xf32> to vector<1x1x8x128xf32>
      %c0_21 = arith.constant 0 : index
      %c0_22 = arith.constant 0 : index
      %c0_23 = arith.constant 0 : index
      %c0_24 = arith.constant 0 : index
      %31 = vector.load %arg8[%c0_21, %c0_22, %c0_23, %c0_24] : memref<1x1x8x128xf32, #tpu.memory_space<vmem>>, vector<1x1x8x128xf32>
      tpu.vector_store %arg8[%c0_21, %c0_22, %c0_23, %c0_24], %30 {strides = array<i32>} : memref<1x1x8x128xf32, #tpu.memory_space<vmem>>, vector<1x1x8x128xf32>,
      %32 = arith.truncf %22 : vector<128x128xf32> to vector<128x128xbf16>
      %c0_25 = arith.constant 0 : index
      %c0_26 = arith.constant 0 : index
      %c0_27 = arith.constant 0 : index
      %33 = vector.load %arg7[%c0_25, %c0_26, %c0_27] : memref<1x128x128xbf16, #tpu.memory_space<vmem>>, vector<1x128x128xbf16>
      %34 = vector.shape_cast %33 : vector<1x128x128xbf16> to vector<128x128xbf16>
      %35 = vector.shape_cast %32 : vector<128x128xbf16> to vector<1x128x128xbf16>
      tpu.vector_store %arg7[%c0_25, %c0_26, %c0_27], %35 {strides = array<i32>} : memref<1x128x128xbf16, #tpu.memory_space<vmem>>, vector<1x128x128xbf16>,
    } else {
    }
    return
  }
  func.func @transform_0(%arg0: i32, %arg1: i32, %arg2: i32, %arg3: i32) -> (i32, i32, i32) {
    %c0_i32 = arith.constant 0 : i32
    return %arg0, %arg1, %arg3 : i32, i32, i32
  }
  func.func @transform_1(%arg0: i32, %arg1: i32, %arg2: i32, %arg3: i32) -> (i32, i32, i32) {
    %c0_i32 = arith.constant 0 : i32
    return %arg0, %arg3, %arg2 : i32, i32, i32
  }
  func.func @transform_2(%arg0: i32, %arg1: i32, %arg2: i32, %arg3: i32) -> (i32, i32) {
    %c0_i32 = arith.constant 0 : i32
    %c0_i32_0 = arith.constant 0 : i32
    return %c0_i32, %arg2 : i32, i32
  }
  func.func @transform_3(%arg0: i32, %arg1: i32, %arg2: i32, %arg3: i32) -> (i32, i32, i32) {
    %c0_i32 = arith.constant 0 : i32
    return %arg0, %arg1, %arg2 : i32, i32, i32
  }
  func.func @transform_4(%arg0: i32, %arg1: i32, %arg2: i32, %arg3: i32) -> (i32, i32, i32, i32) {
    %c0_i32 = arith.constant 0 : i32
    %c0_i32_0 = arith.constant 0 : i32
    return %arg0, %arg1, %c0_i32, %arg2 : i32, i32, i32, i32
  }
}

module attributes {stable_mosaic.version = 11 : i64} {
  func.func @_mm_kernel(%arg0: i32, %arg1: i32, %arg2: i32, %arg3: i32, %arg4: memref<1x32x256xbf16, #tpu.memory_space<vmem>>, %arg5: memref<1x256x128xbf16, #tpu.memory_space<vmem>>, %arg6: memref<1x128xf32, #tpu.memory_space<vmem>>, %arg7: memref<1x32x128xbf16, #tpu.memory_space<vmem>>, %arg8: memref<1x1x8x128xf32, #tpu.memory_space<vmem>>, %arg9: memref<32x128xf32, #tpu.memory_space<vmem>>) attributes {dimension_semantics = [#tpu.dimension_semantics<parallel>, #tpu.dimension_semantics<parallel>, #tpu.dimension_semantics<parallel>, #tpu.dimension_semantics<arbitrary>], iteration_bounds = array<i64: 1, 1, 1, 1>, scalar_prefetch = 0 : i64, scratch_operands = 1 : i64, tpu.core_type = #tpu.core_type<tc>, window_params = [{transform_indices = @transform_0, window_bounds = array<i64: 1, 32, 256>}, {transform_indices = @transform_1, window_bounds = array<i64: 1, 256, 128>}, {transform_indices = @transform_2, window_bounds = array<i64: 1, 128>}, {transform_indices = @transform_3, window_bounds = array<i64: 1, 32, 128>}, {transform_indices = @transform_4, window_bounds = array<i64: 1, 1, 8, 128>}]} {
    %c0_i32 = arith.constant 0 : i32
    %0 = arith.cmpi eq, %arg3, %c0_i32 : i32
    %1 = arith.extui %0 : i1 to i32
    %c0_i32_0 = arith.constant 0 : i32
    %2 = arith.cmpi ne, %1, %c0_i32_0 : i32
    scf.if %2 {
      %cst_14 = arith.constant 0.000000e+00 : f32
      %19 = vector.broadcast %cst_14 : f32 to vector<32x128xf32>
      %c0_15 = arith.constant 0 : index
      %c0_16 = arith.constant 0 : index
      %20 = vector.load %arg9[%c0_15, %c0_16] : memref<32x128xf32, #tpu.memory_space<vmem>>, vector<32x128xf32>
      tpu.vector_store %arg9[%c0_15, %c0_16], %19 {strides = array<i32>} : memref<32x128xf32, #tpu.memory_space<vmem>>, vector<32x128xf32>,
    } else {
    }
    %c0 = arith.constant 0 : index
    %c0_1 = arith.constant 0 : index
    %c0_2 = arith.constant 0 : index
    %3 = vector.load %arg4[%c0, %c0_1, %c0_2] : memref<1x32x256xbf16, #tpu.memory_space<vmem>>, vector<1x32x256xbf16>
    %4 = vector.shape_cast %3 : vector<1x32x256xbf16> to vector<32x256xbf16>
    %cst = arith.constant 0.000000e+00 : bf16
    %5 = vector.broadcast %cst : bf16 to vector<32x256xbf16>
    %6 = arith.cmpf oge, %4, %5 : vector<32x256xbf16>
    %cst_3 = arith.constant 2.001950e-01 : bf16
    %7 = vector.broadcast %cst_3 : bf16 to vector<32x256xbf16>
    %8 = arith.mulf %7, %4 : vector<32x256xbf16>
    %9 = arith.select %6, %4, %8 : vector<32x256xi1>, vector<32x256xbf16>
    %c0_4 = arith.constant 0 : index
    %c0_5 = arith.constant 0 : index
    %10 = vector.load %arg9[%c0_4, %c0_5] : memref<32x128xf32, #tpu.memory_space<vmem>>, vector<32x128xf32>
    %c0_6 = arith.constant 0 : index
    %c0_7 = arith.constant 0 : index
    %c0_8 = arith.constant 0 : index
    %11 = vector.load %arg5[%c0_6, %c0_7, %c0_8] : memref<1x256x128xbf16, #tpu.memory_space<vmem>>, vector<1x256x128xbf16>
    %12 = vector.shape_cast %11 : vector<1x256x128xbf16> to vector<256x128xbf16>
    %cst_9 = arith.constant dense<0.000000e+00> : vector<32x128xf32>
    %13 = tpu.matmul %9, %12, %cst_9 {dimension_numbers = #tpu.dot_dimension_numbers<[1], [0], [0], [1], [0, 0, 1, 1], [], []>} : vector<32x256xbf16>, vector<256x128xbf16>, vector<32x128xf32> -> vector<32x128xf32>
    %14 = arith.addf %10, %13 : vector<32x128xf32>
    %c0_10 = arith.constant 0 : index
    %c0_11 = arith.constant 0 : index
    %15 = vector.load %arg9[%c0_10, %c0_11] : memref<32x128xf32, #tpu.memory_space<vmem>>, vector<32x128xf32>
    tpu.vector_store %arg9[%c0_10, %c0_11], %14 {strides = array<i32>} : memref<32x128xf32, #tpu.memory_space<vmem>>, vector<32x128xf32>,
    %c0_i32_12 = arith.constant 0 : i32
    %16 = arith.cmpi eq, %arg3, %c0_i32_12 : i32
    %17 = arith.extui %16 : i1 to i32
    %c0_i32_13 = arith.constant 0 : i32
    %18 = arith.cmpi ne, %17, %c0_i32_13 : i32
    scf.if %18 {
      %c0_14 = arith.constant 0 : index
      %c0_15 = arith.constant 0 : index
      %19 = vector.load %arg9[%c0_14, %c0_15] : memref<32x128xf32, #tpu.memory_space<vmem>>, vector<32x128xf32>
      %c0_16 = arith.constant 0 : index
      %c0_17 = arith.constant 0 : index
      %20 = vector.load %arg6[%c0_16, %c0_17] : memref<1x128xf32, #tpu.memory_space<vmem>>, vector<1x128xf32>
      %21 = vector.broadcast %20 : vector<1x128xf32> to vector<32x128xf32>
      %22 = arith.addf %19, %21 : vector<32x128xf32>
      %cst_18 = arith.constant dense<0.000000e+00> : vector<128xf32>
      %23 = vector.multi_reduction <add>, %22, %cst_18 [0] : vector<32x128xf32> to vector<128xf32>
      %24 = vector.shape_cast %23 : vector<128xf32> to vector<1x128xf32>
      %25 = arith.mulf %22, %22 : vector<32x128xf32>
      %cst_19 = arith.constant dense<0.000000e+00> : vector<128xf32>
      %26 = vector.multi_reduction <add>, %25, %cst_19 [0] : vector<32x128xf32> to vector<128xf32>
      %27 = vector.shape_cast %26 : vector<128xf32> to vector<1x128xf32>
      %cst_20 = arith.constant 0.000000e+00 : f32
      %28 = vector.broadcast %cst_20 : f32 to vector<6x128xf32>
      %29 = tpu.concatenate %24, %27, %28 in 0 : vector<1x128xf32>, vector<1x128xf32>, vector<6x128xf32> -> vector<8x128xf32>
      %30 = vector.shape_cast %29 : vector<8x128xf32> to vector<1x1x8x128xf32>
      %c0_21 = arith.constant 0 : index
      %c0_22 = arith.constant 0 : index
      %c0_23 = arith.constant 0 : index
      %c0_24 = arith.constant 0 : index
      %31 = vector.load %arg8[%c0_21, %c0_22, %c0_23, %c0_24] : memref<1x1x8x128xf32, #tpu.memory_space<vmem>>, vector<1x1x8x128xf32>
      tpu.vector_store %arg8[%c0_21, %c0_22, %c0_23, %c0_24], %30 {strides = array<i32>} : memref<1x1x8x128xf32, #tpu.memory_space<vmem>>, vector<1x1x8x128xf32>,
      %32 = arith.truncf %22 : vector<32x128xf32> to vector<32x128xbf16>
      %c0_25 = arith.constant 0 : index
      %c0_26 = arith.constant 0 : index
      %c0_27 = arith.constant 0 : index
      %33 = vector.load %arg7[%c0_25, %c0_26, %c0_27] : memref<1x32x128xbf16, #tpu.memory_space<vmem>>, vector<1x32x128xbf16>
      %34 = vector.shape_cast %33 : vector<1x32x128xbf16> to vector<32x128xbf16>
      %35 = vector.shape_cast %32 : vector<32x128xbf16> to vector<1x32x128xbf16>
      tpu.vector_store %arg7[%c0_25, %c0_26, %c0_27], %35 {strides = array<i32>} : memref<1x32x128xbf16, #tpu.memory_space<vmem>>, vector<1x32x128xbf16>,
    } else {
    }
    return
  }
  func.func @transform_0(%arg0: i32, %arg1: i32, %arg2: i32, %arg3: i32) -> (i32, i32, i32) {
    %c0_i32 = arith.constant 0 : i32
    return %arg0, %arg1, %arg3 : i32, i32, i32
  }
  func.func @transform_1(%arg0: i32, %arg1: i32, %arg2: i32, %arg3: i32) -> (i32, i32, i32) {
    %c0_i32 = arith.constant 0 : i32
    return %arg0, %arg3, %arg2 : i32, i32, i32
  }
  func.func @transform_2(%arg0: i32, %arg1: i32, %arg2: i32, %arg3: i32) -> (i32, i32) {
    %c0_i32 = arith.constant 0 : i32
    %c0_i32_0 = arith.constant 0 : i32
    return %c0_i32, %arg2 : i32, i32
  }
  func.func @transform_3(%arg0: i32, %arg1: i32, %arg2: i32, %arg3: i32) -> (i32, i32, i32) {
    %c0_i32 = arith.constant 0 : i32
    return %arg0, %arg1, %arg2 : i32, i32, i32
  }
  func.func @transform_4(%arg0: i32, %arg1: i32, %arg2: i32, %arg3: i32) -> (i32, i32, i32, i32) {
    %c0_i32 = arith.constant 0 : i32
    %c0_i32_0 = arith.constant 0 : i32
    return %arg0, %arg1, %c0_i32, %arg2 : i32, i32, i32, i32
  }
}

module attributes {stable_mosaic.version = 11 : i64} {
  func.func @_mm_kernel(%arg0: i32, %arg1: i32, %arg2: i32, %arg3: i32, %arg4: memref<1x8x512xbf16, #tpu.memory_space<vmem>>, %arg5: memref<1x512x128xbf16, #tpu.memory_space<vmem>>, %arg6: memref<1x128xf32, #tpu.memory_space<vmem>>, %arg7: memref<1x8x128xbf16, #tpu.memory_space<vmem>>, %arg8: memref<1x1x8x128xf32, #tpu.memory_space<vmem>>, %arg9: memref<8x128xf32, #tpu.memory_space<vmem>>) attributes {dimension_semantics = [#tpu.dimension_semantics<parallel>, #tpu.dimension_semantics<parallel>, #tpu.dimension_semantics<parallel>, #tpu.dimension_semantics<arbitrary>], iteration_bounds = array<i64: 1, 1, 1, 1>, scalar_prefetch = 0 : i64, scratch_operands = 1 : i64, tpu.core_type = #tpu.core_type<tc>, window_params = [{transform_indices = @transform_0, window_bounds = array<i64: 1, 8, 512>}, {transform_indices = @transform_1, window_bounds = array<i64: 1, 512, 128>}, {transform_indices = @transform_2, window_bounds = array<i64: 1, 128>}, {transform_indices = @transform_3, window_bounds = array<i64: 1, 8, 128>}, {transform_indices = @transform_4, window_bounds = array<i64: 1, 1, 8, 128>}]} {
    %c0_i32 = arith.constant 0 : i32
    %0 = arith.cmpi eq, %arg3, %c0_i32 : i32
    %1 = arith.extui %0 : i1 to i32
    %c0_i32_0 = arith.constant 0 : i32
    %2 = arith.cmpi ne, %1, %c0_i32_0 : i32
    scf.if %2 {
      %cst_14 = arith.constant 0.000000e+00 : f32
      %19 = vector.broadcast %cst_14 : f32 to vector<8x128xf32>
      %c0_15 = arith.constant 0 : index
      %c0_16 = arith.constant 0 : index
      %20 = vector.load %arg9[%c0_15, %c0_16] : memref<8x128xf32, #tpu.memory_space<vmem>>, vector<8x128xf32>
      tpu.vector_store %arg9[%c0_15, %c0_16], %19 {strides = array<i32>} : memref<8x128xf32, #tpu.memory_space<vmem>>, vector<8x128xf32>,
    } else {
    }
    %c0 = arith.constant 0 : index
    %c0_1 = arith.constant 0 : index
    %c0_2 = arith.constant 0 : index
    %3 = vector.load %arg4[%c0, %c0_1, %c0_2] : memref<1x8x512xbf16, #tpu.memory_space<vmem>>, vector<1x8x512xbf16>
    %4 = vector.shape_cast %3 : vector<1x8x512xbf16> to vector<8x512xbf16>
    %cst = arith.constant 0.000000e+00 : bf16
    %5 = vector.broadcast %cst : bf16 to vector<8x512xbf16>
    %6 = arith.cmpf oge, %4, %5 : vector<8x512xbf16>
    %cst_3 = arith.constant 2.001950e-01 : bf16
    %7 = vector.broadcast %cst_3 : bf16 to vector<8x512xbf16>
    %8 = arith.mulf %7, %4 : vector<8x512xbf16>
    %9 = arith.select %6, %4, %8 : vector<8x512xi1>, vector<8x512xbf16>
    %c0_4 = arith.constant 0 : index
    %c0_5 = arith.constant 0 : index
    %10 = vector.load %arg9[%c0_4, %c0_5] : memref<8x128xf32, #tpu.memory_space<vmem>>, vector<8x128xf32>
    %c0_6 = arith.constant 0 : index
    %c0_7 = arith.constant 0 : index
    %c0_8 = arith.constant 0 : index
    %11 = vector.load %arg5[%c0_6, %c0_7, %c0_8] : memref<1x512x128xbf16, #tpu.memory_space<vmem>>, vector<1x512x128xbf16>
    %12 = vector.shape_cast %11 : vector<1x512x128xbf16> to vector<512x128xbf16>
    %cst_9 = arith.constant dense<0.000000e+00> : vector<8x128xf32>
    %13 = tpu.matmul %9, %12, %cst_9 {dimension_numbers = #tpu.dot_dimension_numbers<[1], [0], [0], [1], [0, 0, 1, 1], [], []>} : vector<8x512xbf16>, vector<512x128xbf16>, vector<8x128xf32> -> vector<8x128xf32>
    %14 = arith.addf %10, %13 : vector<8x128xf32>
    %c0_10 = arith.constant 0 : index
    %c0_11 = arith.constant 0 : index
    %15 = vector.load %arg9[%c0_10, %c0_11] : memref<8x128xf32, #tpu.memory_space<vmem>>, vector<8x128xf32>
    tpu.vector_store %arg9[%c0_10, %c0_11], %14 {strides = array<i32>} : memref<8x128xf32, #tpu.memory_space<vmem>>, vector<8x128xf32>,
    %c0_i32_12 = arith.constant 0 : i32
    %16 = arith.cmpi eq, %arg3, %c0_i32_12 : i32
    %17 = arith.extui %16 : i1 to i32
    %c0_i32_13 = arith.constant 0 : i32
    %18 = arith.cmpi ne, %17, %c0_i32_13 : i32
    scf.if %18 {
      %c0_14 = arith.constant 0 : index
      %c0_15 = arith.constant 0 : index
      %19 = vector.load %arg9[%c0_14, %c0_15] : memref<8x128xf32, #tpu.memory_space<vmem>>, vector<8x128xf32>
      %c0_16 = arith.constant 0 : index
      %c0_17 = arith.constant 0 : index
      %20 = vector.load %arg6[%c0_16, %c0_17] : memref<1x128xf32, #tpu.memory_space<vmem>>, vector<1x128xf32>
      %21 = vector.broadcast %20 : vector<1x128xf32> to vector<8x128xf32>
      %22 = arith.addf %19, %21 : vector<8x128xf32>
      %cst_18 = arith.constant dense<0.000000e+00> : vector<128xf32>
      %23 = vector.multi_reduction <add>, %22, %cst_18 [0] : vector<8x128xf32> to vector<128xf32>
      %24 = vector.shape_cast %23 : vector<128xf32> to vector<1x128xf32>
      %25 = arith.mulf %22, %22 : vector<8x128xf32>
      %cst_19 = arith.constant dense<0.000000e+00> : vector<128xf32>
      %26 = vector.multi_reduction <add>, %25, %cst_19 [0] : vector<8x128xf32> to vector<128xf32>
      %27 = vector.shape_cast %26 : vector<128xf32> to vector<1x128xf32>
      %cst_20 = arith.constant 0.000000e+00 : f32
      %28 = vector.broadcast %cst_20 : f32 to vector<6x128xf32>
      %29 = tpu.concatenate %24, %27, %28 in 0 : vector<1x128xf32>, vector<1x128xf32>, vector<6x128xf32> -> vector<8x128xf32>
      %30 = vector.shape_cast %29 : vector<8x128xf32> to vector<1x1x8x128xf32>
      %c0_21 = arith.constant 0 : index
      %c0_22 = arith.constant 0 : index
      %c0_23 = arith.constant 0 : index
      %c0_24 = arith.constant 0 : index
      %31 = vector.load %arg8[%c0_21, %c0_22, %c0_23, %c0_24] : memref<1x1x8x128xf32, #tpu.memory_space<vmem>>, vector<1x1x8x128xf32>
      tpu.vector_store %arg8[%c0_21, %c0_22, %c0_23, %c0_24], %30 {strides = array<i32>} : memref<1x1x8x128xf32, #tpu.memory_space<vmem>>, vector<1x1x8x128xf32>,
      %32 = arith.truncf %22 : vector<8x128xf32> to vector<8x128xbf16>
      %c0_25 = arith.constant 0 : index
      %c0_26 = arith.constant 0 : index
      %c0_27 = arith.constant 0 : index
      %33 = vector.load %arg7[%c0_25, %c0_26, %c0_27] : memref<1x8x128xbf16, #tpu.memory_space<vmem>>, vector<1x8x128xbf16>
      %34 = vector.shape_cast %33 : vector<1x8x128xbf16> to vector<8x128xbf16>
      %35 = vector.shape_cast %32 : vector<8x128xbf16> to vector<1x8x128xbf16>
      tpu.vector_store %arg7[%c0_25, %c0_26, %c0_27], %35 {strides = array<i32>} : memref<1x8x128xbf16, #tpu.memory_space<vmem>>, vector<1x8x128xbf16>,
    } else {
    }
    return
  }
  func.func @transform_0(%arg0: i32, %arg1: i32, %arg2: i32, %arg3: i32) -> (i32, i32, i32) {
    %c0_i32 = arith.constant 0 : i32
    return %arg0, %arg1, %arg3 : i32, i32, i32
  }
  func.func @transform_1(%arg0: i32, %arg1: i32, %arg2: i32, %arg3: i32) -> (i32, i32, i32) {
    %c0_i32 = arith.constant 0 : i32
    return %arg0, %arg3, %arg2 : i32, i32, i32
  }
  func.func @transform_2(%arg0: i32, %arg1: i32, %arg2: i32, %arg3: i32) -> (i32, i32) {
    %c0_i32 = arith.constant 0 : i32
    %c0_i32_0 = arith.constant 0 : i32
    return %c0_i32, %arg2 : i32, i32
  }
  func.func @transform_3(%arg0: i32, %arg1: i32, %arg2: i32, %arg3: i32) -> (i32, i32, i32) {
    %c0_i32 = arith.constant 0 : i32
    return %arg0, %arg1, %arg2 : i32, i32, i32
  }
  func.func @transform_4(%arg0: i32, %arg1: i32, %arg2: i32, %arg3: i32) -> (i32, i32, i32, i32) {
    %c0_i32 = arith.constant 0 : i32
    %c0_i32_0 = arith.constant 0 : i32
    return %arg0, %arg1, %c0_i32, %arg2 : i32, i32, i32, i32
  }
}

module attributes {stable_mosaic.version = 11 : i64} {
  func.func @_mm_kernel(%arg0: i32, %arg1: i32, %arg2: i32, %arg3: i32, %arg4: memref<1x8x1024xbf16, #tpu.memory_space<vmem>>, %arg5: memref<1x1024x128xbf16, #tpu.memory_space<vmem>>, %arg6: memref<1x128xf32, #tpu.memory_space<vmem>>, %arg7: memref<1x8x128xbf16, #tpu.memory_space<vmem>>, %arg8: memref<1x1x8x128xf32, #tpu.memory_space<vmem>>, %arg9: memref<8x128xf32, #tpu.memory_space<vmem>>) attributes {dimension_semantics = [#tpu.dimension_semantics<parallel>, #tpu.dimension_semantics<parallel>, #tpu.dimension_semantics<parallel>, #tpu.dimension_semantics<arbitrary>], iteration_bounds = array<i64: 1, 1, 1, 1>, scalar_prefetch = 0 : i64, scratch_operands = 1 : i64, tpu.core_type = #tpu.core_type<tc>, window_params = [{transform_indices = @transform_0, window_bounds = array<i64: 1, 8, 1024>}, {transform_indices = @transform_1, window_bounds = array<i64: 1, 1024, 128>}, {transform_indices = @transform_2, window_bounds = array<i64: 1, 128>}, {transform_indices = @transform_3, window_bounds = array<i64: 1, 8, 128>}, {transform_indices = @transform_4, window_bounds = array<i64: 1, 1, 8, 128>}]} {
    %c0_i32 = arith.constant 0 : i32
    %0 = arith.cmpi eq, %arg3, %c0_i32 : i32
    %1 = arith.extui %0 : i1 to i32
    %c0_i32_0 = arith.constant 0 : i32
    %2 = arith.cmpi ne, %1, %c0_i32_0 : i32
    scf.if %2 {
      %cst_14 = arith.constant 0.000000e+00 : f32
      %19 = vector.broadcast %cst_14 : f32 to vector<8x128xf32>
      %c0_15 = arith.constant 0 : index
      %c0_16 = arith.constant 0 : index
      %20 = vector.load %arg9[%c0_15, %c0_16] : memref<8x128xf32, #tpu.memory_space<vmem>>, vector<8x128xf32>
      tpu.vector_store %arg9[%c0_15, %c0_16], %19 {strides = array<i32>} : memref<8x128xf32, #tpu.memory_space<vmem>>, vector<8x128xf32>,
    } else {
    }
    %c0 = arith.constant 0 : index
    %c0_1 = arith.constant 0 : index
    %c0_2 = arith.constant 0 : index
    %3 = vector.load %arg4[%c0, %c0_1, %c0_2] : memref<1x8x1024xbf16, #tpu.memory_space<vmem>>, vector<1x8x1024xbf16>
    %4 = vector.shape_cast %3 : vector<1x8x1024xbf16> to vector<8x1024xbf16>
    %cst = arith.constant 0.000000e+00 : bf16
    %5 = vector.broadcast %cst : bf16 to vector<8x1024xbf16>
    %6 = arith.cmpf oge, %4, %5 : vector<8x1024xbf16>
    %cst_3 = arith.constant 2.001950e-01 : bf16
    %7 = vector.broadcast %cst_3 : bf16 to vector<8x1024xbf16>
    %8 = arith.mulf %7, %4 : vector<8x1024xbf16>
    %9 = arith.select %6, %4, %8 : vector<8x1024xi1>, vector<8x1024xbf16>
    %c0_4 = arith.constant 0 : index
    %c0_5 = arith.constant 0 : index
    %10 = vector.load %arg9[%c0_4, %c0_5] : memref<8x128xf32, #tpu.memory_space<vmem>>, vector<8x128xf32>
    %c0_6 = arith.constant 0 : index
    %c0_7 = arith.constant 0 : index
    %c0_8 = arith.constant 0 : index
    %11 = vector.load %arg5[%c0_6, %c0_7, %c0_8] : memref<1x1024x128xbf16, #tpu.memory_space<vmem>>, vector<1x1024x128xbf16>
    %12 = vector.shape_cast %11 : vector<1x1024x128xbf16> to vector<1024x128xbf16>
    %cst_9 = arith.constant dense<0.000000e+00> : vector<8x128xf32>
    %13 = tpu.matmul %9, %12, %cst_9 {dimension_numbers = #tpu.dot_dimension_numbers<[1], [0], [0], [1], [0, 0, 1, 1], [], []>} : vector<8x1024xbf16>, vector<1024x128xbf16>, vector<8x128xf32> -> vector<8x128xf32>
    %14 = arith.addf %10, %13 : vector<8x128xf32>
    %c0_10 = arith.constant 0 : index
    %c0_11 = arith.constant 0 : index
    %15 = vector.load %arg9[%c0_10, %c0_11] : memref<8x128xf32, #tpu.memory_space<vmem>>, vector<8x128xf32>
    tpu.vector_store %arg9[%c0_10, %c0_11], %14 {strides = array<i32>} : memref<8x128xf32, #tpu.memory_space<vmem>>, vector<8x128xf32>,
    %c0_i32_12 = arith.constant 0 : i32
    %16 = arith.cmpi eq, %arg3, %c0_i32_12 : i32
    %17 = arith.extui %16 : i1 to i32
    %c0_i32_13 = arith.constant 0 : i32
    %18 = arith.cmpi ne, %17, %c0_i32_13 : i32
    scf.if %18 {
      %c0_14 = arith.constant 0 : index
      %c0_15 = arith.constant 0 : index
      %19 = vector.load %arg9[%c0_14, %c0_15] : memref<8x128xf32, #tpu.memory_space<vmem>>, vector<8x128xf32>
      %c0_16 = arith.constant 0 : index
      %c0_17 = arith.constant 0 : index
      %20 = vector.load %arg6[%c0_16, %c0_17] : memref<1x128xf32, #tpu.memory_space<vmem>>, vector<1x128xf32>
      %21 = vector.broadcast %20 : vector<1x128xf32> to vector<8x128xf32>
      %22 = arith.addf %19, %21 : vector<8x128xf32>
      %cst_18 = arith.constant dense<0.000000e+00> : vector<128xf32>
      %23 = vector.multi_reduction <add>, %22, %cst_18 [0] : vector<8x128xf32> to vector<128xf32>
      %24 = vector.shape_cast %23 : vector<128xf32> to vector<1x128xf32>
      %25 = arith.mulf %22, %22 : vector<8x128xf32>
      %cst_19 = arith.constant dense<0.000000e+00> : vector<128xf32>
      %26 = vector.multi_reduction <add>, %25, %cst_19 [0] : vector<8x128xf32> to vector<128xf32>
      %27 = vector.shape_cast %26 : vector<128xf32> to vector<1x128xf32>
      %cst_20 = arith.constant 0.000000e+00 : f32
      %28 = vector.broadcast %cst_20 : f32 to vector<6x128xf32>
      %29 = tpu.concatenate %24, %27, %28 in 0 : vector<1x128xf32>, vector<1x128xf32>, vector<6x128xf32> -> vector<8x128xf32>
      %30 = vector.shape_cast %29 : vector<8x128xf32> to vector<1x1x8x128xf32>
      %c0_21 = arith.constant 0 : index
      %c0_22 = arith.constant 0 : index
      %c0_23 = arith.constant 0 : index
      %c0_24 = arith.constant 0 : index
      %31 = vector.load %arg8[%c0_21, %c0_22, %c0_23, %c0_24] : memref<1x1x8x128xf32, #tpu.memory_space<vmem>>, vector<1x1x8x128xf32>
      tpu.vector_store %arg8[%c0_21, %c0_22, %c0_23, %c0_24], %30 {strides = array<i32>} : memref<1x1x8x128xf32, #tpu.memory_space<vmem>>, vector<1x1x8x128xf32>,
      %32 = arith.truncf %22 : vector<8x128xf32> to vector<8x128xbf16>
      %c0_25 = arith.constant 0 : index
      %c0_26 = arith.constant 0 : index
      %c0_27 = arith.constant 0 : index
      %33 = vector.load %arg7[%c0_25, %c0_26, %c0_27] : memref<1x8x128xbf16, #tpu.memory_space<vmem>>, vector<1x8x128xbf16>
      %34 = vector.shape_cast %33 : vector<1x8x128xbf16> to vector<8x128xbf16>
      %35 = vector.shape_cast %32 : vector<8x128xbf16> to vector<1x8x128xbf16>
      tpu.vector_store %arg7[%c0_25, %c0_26, %c0_27], %35 {strides = array<i32>} : memref<1x8x128xbf16, #tpu.memory_space<vmem>>, vector<1x8x128xbf16>,
    } else {
    }
    return
  }
  func.func @transform_0(%arg0: i32, %arg1: i32, %arg2: i32, %arg3: i32) -> (i32, i32, i32) {
    %c0_i32 = arith.constant 0 : i32
    return %arg0, %arg1, %arg3 : i32, i32, i32
  }
  func.func @transform_1(%arg0: i32, %arg1: i32, %arg2: i32, %arg3: i32) -> (i32, i32, i32) {
    %c0_i32 = arith.constant 0 : i32
    return %arg0, %arg3, %arg2 : i32, i32, i32
  }
  func.func @transform_2(%arg0: i32, %arg1: i32, %arg2: i32, %arg3: i32) -> (i32, i32) {
    %c0_i32 = arith.constant 0 : i32
    %c0_i32_0 = arith.constant 0 : i32
    return %c0_i32, %arg2 : i32, i32
  }
  func.func @transform_3(%arg0: i32, %arg1: i32, %arg2: i32, %arg3: i32) -> (i32, i32, i32) {
    %c0_i32 = arith.constant 0 : i32
    return %arg0, %arg1, %arg2 : i32, i32, i32
  }
  func.func @transform_4(%arg0: i32, %arg1: i32, %arg2: i32, %arg3: i32) -> (i32, i32, i32, i32) {
    %c0_i32 = arith.constant 0 : i32
    %c0_i32_0 = arith.constant 0 : i32
    return %arg0, %arg1, %c0_i32, %arg2 : i32, i32, i32, i32
  }
}

module attributes {stable_mosaic.version = 11 : i64} {
  func.func @_mm_kernel(%arg0: i32, %arg1: i32, %arg2: i32, %arg3: i32, %arg4: memref<1x8x256xbf16, #tpu.memory_space<vmem>>, %arg5: memref<1x256x128xbf16, #tpu.memory_space<vmem>>, %arg6: memref<1x128xf32, #tpu.memory_space<vmem>>, %arg7: memref<1x8x128xbf16, #tpu.memory_space<vmem>>, %arg8: memref<1x1x8x128xf32, #tpu.memory_space<vmem>>, %arg9: memref<8x128xf32, #tpu.memory_space<vmem>>) attributes {dimension_semantics = [#tpu.dimension_semantics<parallel>, #tpu.dimension_semantics<parallel>, #tpu.dimension_semantics<parallel>, #tpu.dimension_semantics<arbitrary>], iteration_bounds = array<i64: 4, 1, 1, 1>, scalar_prefetch = 0 : i64, scratch_operands = 1 : i64, tpu.core_type = #tpu.core_type<tc>, window_params = [{transform_indices = @transform_0, window_bounds = array<i64: 1, 8, 256>}, {transform_indices = @transform_1, window_bounds = array<i64: 1, 256, 128>}, {transform_indices = @transform_2, window_bounds = array<i64: 1, 128>}, {transform_indices = @transform_3, window_bounds = array<i64: 1, 8, 128>}, {transform_indices = @transform_4, window_bounds = array<i64: 1, 1, 8, 128>}]} {
    %c0_i32 = arith.constant 0 : i32
    %0 = arith.cmpi eq, %arg3, %c0_i32 : i32
    %1 = arith.extui %0 : i1 to i32
    %c0_i32_0 = arith.constant 0 : i32
    %2 = arith.cmpi ne, %1, %c0_i32_0 : i32
    scf.if %2 {
      %cst_13 = arith.constant 0.000000e+00 : f32
      %16 = vector.broadcast %cst_13 : f32 to vector<8x128xf32>
      %c0_14 = arith.constant 0 : index
      %c0_15 = arith.constant 0 : index
      %17 = vector.load %arg9[%c0_14, %c0_15] : memref<8x128xf32, #tpu.memory_space<vmem>>, vector<8x128xf32>
      tpu.vector_store %arg9[%c0_14, %c0_15], %16 {strides = array<i32>} : memref<8x128xf32, #tpu.memory_space<vmem>>, vector<8x128xf32>,
    } else {
    }
    %c0 = arith.constant 0 : index
    %c0_1 = arith.constant 0 : index
    %c0_2 = arith.constant 0 : index
    %3 = vector.load %arg4[%c0, %c0_1, %c0_2] : memref<1x8x256xbf16, #tpu.memory_space<vmem>>, vector<1x8x256xbf16>
    %4 = vector.shape_cast %3 : vector<1x8x256xbf16> to vector<8x256xbf16>
    %cst = arith.constant 0.000000e+00 : bf16
    %5 = vector.broadcast %cst : bf16 to vector<8x256xbf16>
    %6 = arith.maximumf %4, %5 : vector<8x256xbf16>
    %c0_3 = arith.constant 0 : index
    %c0_4 = arith.constant 0 : index
    %7 = vector.load %arg9[%c0_3, %c0_4] : memref<8x128xf32, #tpu.memory_space<vmem>>, vector<8x128xf32>
    %c0_5 = arith.constant 0 : index
    %c0_6 = arith.constant 0 : index
    %c0_7 = arith.constant 0 : index
    %8 = vector.load %arg5[%c0_5, %c0_6, %c0_7] : memref<1x256x128xbf16, #tpu.memory_space<vmem>>, vector<1x256x128xbf16>
    %9 = vector.shape_cast %8 : vector<1x256x128xbf16> to vector<256x128xbf16>
    %cst_8 = arith.constant dense<0.000000e+00> : vector<8x128xf32>
    %10 = tpu.matmul %6, %9, %cst_8 {dimension_numbers = #tpu.dot_dimension_numbers<[1], [0], [0], [1], [0, 0, 1, 1], [], []>} : vector<8x256xbf16>, vector<256x128xbf16>, vector<8x128xf32> -> vector<8x128xf32>
    %11 = arith.addf %7, %10 : vector<8x128xf32>
    %c0_9 = arith.constant 0 : index
    %c0_10 = arith.constant 0 : index
    %12 = vector.load %arg9[%c0_9, %c0_10] : memref<8x128xf32, #tpu.memory_space<vmem>>, vector<8x128xf32>
    tpu.vector_store %arg9[%c0_9, %c0_10], %11 {strides = array<i32>} : memref<8x128xf32, #tpu.memory_space<vmem>>, vector<8x128xf32>,
    %c0_i32_11 = arith.constant 0 : i32
    %13 = arith.cmpi eq, %arg3, %c0_i32_11 : i32
    %14 = arith.extui %13 : i1 to i32
    %c0_i32_12 = arith.constant 0 : i32
    %15 = arith.cmpi ne, %14, %c0_i32_12 : i32
    scf.if %15 {
      %c0_13 = arith.constant 0 : index
      %c0_14 = arith.constant 0 : index
      %16 = vector.load %arg9[%c0_13, %c0_14] : memref<8x128xf32, #tpu.memory_space<vmem>>, vector<8x128xf32>
      %c0_15 = arith.constant 0 : index
      %c0_16 = arith.constant 0 : index
      %17 = vector.load %arg6[%c0_15, %c0_16] : memref<1x128xf32, #tpu.memory_space<vmem>>, vector<1x128xf32>
      %18 = vector.broadcast %17 : vector<1x128xf32> to vector<8x128xf32>
      %19 = arith.addf %16, %18 : vector<8x128xf32>
      %cst_17 = arith.constant dense<0.000000e+00> : vector<128xf32>
      %20 = vector.multi_reduction <add>, %19, %cst_17 [0] : vector<8x128xf32> to vector<128xf32>
      %21 = vector.shape_cast %20 : vector<128xf32> to vector<1x128xf32>
      %22 = arith.mulf %19, %19 : vector<8x128xf32>
      %cst_18 = arith.constant dense<0.000000e+00> : vector<128xf32>
      %23 = vector.multi_reduction <add>, %22, %cst_18 [0] : vector<8x128xf32> to vector<128xf32>
      %24 = vector.shape_cast %23 : vector<128xf32> to vector<1x128xf32>
      %cst_19 = arith.constant 0.000000e+00 : f32
      %25 = vector.broadcast %cst_19 : f32 to vector<6x128xf32>
      %26 = tpu.concatenate %21, %24, %25 in 0 : vector<1x128xf32>, vector<1x128xf32>, vector<6x128xf32> -> vector<8x128xf32>
      %27 = vector.shape_cast %26 : vector<8x128xf32> to vector<1x1x8x128xf32>
      %c0_20 = arith.constant 0 : index
      %c0_21 = arith.constant 0 : index
      %c0_22 = arith.constant 0 : index
      %c0_23 = arith.constant 0 : index
      %28 = vector.load %arg8[%c0_20, %c0_21, %c0_22, %c0_23] : memref<1x1x8x128xf32, #tpu.memory_space<vmem>>, vector<1x1x8x128xf32>
      tpu.vector_store %arg8[%c0_20, %c0_21, %c0_22, %c0_23], %27 {strides = array<i32>} : memref<1x1x8x128xf32, #tpu.memory_space<vmem>>, vector<1x1x8x128xf32>,
      %29 = arith.truncf %19 : vector<8x128xf32> to vector<8x128xbf16>
      %c0_24 = arith.constant 0 : index
      %c0_25 = arith.constant 0 : index
      %c0_26 = arith.constant 0 : index
      %30 = vector.load %arg7[%c0_24, %c0_25, %c0_26] : memref<1x8x128xbf16, #tpu.memory_space<vmem>>, vector<1x8x128xbf16>
      %31 = vector.shape_cast %30 : vector<1x8x128xbf16> to vector<8x128xbf16>
      %32 = vector.shape_cast %29 : vector<8x128xbf16> to vector<1x8x128xbf16>
      tpu.vector_store %arg7[%c0_24, %c0_25, %c0_26], %32 {strides = array<i32>} : memref<1x8x128xbf16, #tpu.memory_space<vmem>>, vector<1x8x128xbf16>,
    } else {
    }
    return
  }
  func.func @transform_0(%arg0: i32, %arg1: i32, %arg2: i32, %arg3: i32) -> (i32, i32, i32) {
    %c0_i32 = arith.constant 0 : i32
    return %arg0, %arg1, %arg3 : i32, i32, i32
  }
  func.func @transform_1(%arg0: i32, %arg1: i32, %arg2: i32, %arg3: i32) -> (i32, i32, i32) {
    %c0_i32 = arith.constant 0 : i32
    return %arg0, %arg3, %arg2 : i32, i32, i32
  }
  func.func @transform_2(%arg0: i32, %arg1: i32, %arg2: i32, %arg3: i32) -> (i32, i32) {
    %c0_i32 = arith.constant 0 : i32
    %c0_i32_0 = arith.constant 0 : i32
    return %c0_i32, %arg2 : i32, i32
  }
  func.func @transform_3(%arg0: i32, %arg1: i32, %arg2: i32, %arg3: i32) -> (i32, i32, i32) {
    %c0_i32 = arith.constant 0 : i32
    return %arg0, %arg1, %arg2 : i32, i32, i32
  }
  func.func @transform_4(%arg0: i32, %arg1: i32, %arg2: i32, %arg3: i32) -> (i32, i32, i32, i32) {
    %c0_i32 = arith.constant 0 : i32
    %c0_i32_0 = arith.constant 0 : i32
    return %arg0, %arg1, %c0_i32, %arg2 : i32, i32, i32, i32
  }
}

module attributes {stable_mosaic.version = 11 : i64} {
  func.func @_mm_kernel(%arg0: i32, %arg1: i32, %arg2: i32, %arg3: i32, %arg4: memref<1x8x512xbf16, #tpu.memory_space<vmem>>, %arg5: memref<1x512x128xbf16, #tpu.memory_space<vmem>>, %arg6: memref<1x128xf32, #tpu.memory_space<vmem>>, %arg7: memref<1x8x128xbf16, #tpu.memory_space<vmem>>, %arg8: memref<1x1x8x128xf32, #tpu.memory_space<vmem>>, %arg9: memref<8x128xf32, #tpu.memory_space<vmem>>) attributes {dimension_semantics = [#tpu.dimension_semantics<parallel>, #tpu.dimension_semantics<parallel>, #tpu.dimension_semantics<parallel>, #tpu.dimension_semantics<arbitrary>], iteration_bounds = array<i64: 4, 1, 1, 1>, scalar_prefetch = 0 : i64, scratch_operands = 1 : i64, tpu.core_type = #tpu.core_type<tc>, window_params = [{transform_indices = @transform_0, window_bounds = array<i64: 1, 8, 512>}, {transform_indices = @transform_1, window_bounds = array<i64: 1, 512, 128>}, {transform_indices = @transform_2, window_bounds = array<i64: 1, 128>}, {transform_indices = @transform_3, window_bounds = array<i64: 1, 8, 128>}, {transform_indices = @transform_4, window_bounds = array<i64: 1, 1, 8, 128>}]} {
    %c0_i32 = arith.constant 0 : i32
    %0 = arith.cmpi eq, %arg3, %c0_i32 : i32
    %1 = arith.extui %0 : i1 to i32
    %c0_i32_0 = arith.constant 0 : i32
    %2 = arith.cmpi ne, %1, %c0_i32_0 : i32
    scf.if %2 {
      %cst_13 = arith.constant 0.000000e+00 : f32
      %16 = vector.broadcast %cst_13 : f32 to vector<8x128xf32>
      %c0_14 = arith.constant 0 : index
      %c0_15 = arith.constant 0 : index
      %17 = vector.load %arg9[%c0_14, %c0_15] : memref<8x128xf32, #tpu.memory_space<vmem>>, vector<8x128xf32>
      tpu.vector_store %arg9[%c0_14, %c0_15], %16 {strides = array<i32>} : memref<8x128xf32, #tpu.memory_space<vmem>>, vector<8x128xf32>,
    } else {
    }
    %c0 = arith.constant 0 : index
    %c0_1 = arith.constant 0 : index
    %c0_2 = arith.constant 0 : index
    %3 = vector.load %arg4[%c0, %c0_1, %c0_2] : memref<1x8x512xbf16, #tpu.memory_space<vmem>>, vector<1x8x512xbf16>
    %4 = vector.shape_cast %3 : vector<1x8x512xbf16> to vector<8x512xbf16>
    %cst = arith.constant 0.000000e+00 : bf16
    %5 = vector.broadcast %cst : bf16 to vector<8x512xbf16>
    %6 = arith.maximumf %4, %5 : vector<8x512xbf16>
    %c0_3 = arith.constant 0 : index
    %c0_4 = arith.constant 0 : index
    %7 = vector.load %arg9[%c0_3, %c0_4] : memref<8x128xf32, #tpu.memory_space<vmem>>, vector<8x128xf32>
    %c0_5 = arith.constant 0 : index
    %c0_6 = arith.constant 0 : index
    %c0_7 = arith.constant 0 : index
    %8 = vector.load %arg5[%c0_5, %c0_6, %c0_7] : memref<1x512x128xbf16, #tpu.memory_space<vmem>>, vector<1x512x128xbf16>
    %9 = vector.shape_cast %8 : vector<1x512x128xbf16> to vector<512x128xbf16>
    %cst_8 = arith.constant dense<0.000000e+00> : vector<8x128xf32>
    %10 = tpu.matmul %6, %9, %cst_8 {dimension_numbers = #tpu.dot_dimension_numbers<[1], [0], [0], [1], [0, 0, 1, 1], [], []>} : vector<8x512xbf16>, vector<512x128xbf16>, vector<8x128xf32> -> vector<8x128xf32>
    %11 = arith.addf %7, %10 : vector<8x128xf32>
    %c0_9 = arith.constant 0 : index
    %c0_10 = arith.constant 0 : index
    %12 = vector.load %arg9[%c0_9, %c0_10] : memref<8x128xf32, #tpu.memory_space<vmem>>, vector<8x128xf32>
    tpu.vector_store %arg9[%c0_9, %c0_10], %11 {strides = array<i32>} : memref<8x128xf32, #tpu.memory_space<vmem>>, vector<8x128xf32>,
    %c0_i32_11 = arith.constant 0 : i32
    %13 = arith.cmpi eq, %arg3, %c0_i32_11 : i32
    %14 = arith.extui %13 : i1 to i32
    %c0_i32_12 = arith.constant 0 : i32
    %15 = arith.cmpi ne, %14, %c0_i32_12 : i32
    scf.if %15 {
      %c0_13 = arith.constant 0 : index
      %c0_14 = arith.constant 0 : index
      %16 = vector.load %arg9[%c0_13, %c0_14] : memref<8x128xf32, #tpu.memory_space<vmem>>, vector<8x128xf32>
      %c0_15 = arith.constant 0 : index
      %c0_16 = arith.constant 0 : index
      %17 = vector.load %arg6[%c0_15, %c0_16] : memref<1x128xf32, #tpu.memory_space<vmem>>, vector<1x128xf32>
      %18 = vector.broadcast %17 : vector<1x128xf32> to vector<8x128xf32>
      %19 = arith.addf %16, %18 : vector<8x128xf32>
      %cst_17 = arith.constant dense<0.000000e+00> : vector<128xf32>
      %20 = vector.multi_reduction <add>, %19, %cst_17 [0] : vector<8x128xf32> to vector<128xf32>
      %21 = vector.shape_cast %20 : vector<128xf32> to vector<1x128xf32>
      %22 = arith.mulf %19, %19 : vector<8x128xf32>
      %cst_18 = arith.constant dense<0.000000e+00> : vector<128xf32>
      %23 = vector.multi_reduction <add>, %22, %cst_18 [0] : vector<8x128xf32> to vector<128xf32>
      %24 = vector.shape_cast %23 : vector<128xf32> to vector<1x128xf32>
      %cst_19 = arith.constant 0.000000e+00 : f32
      %25 = vector.broadcast %cst_19 : f32 to vector<6x128xf32>
      %26 = tpu.concatenate %21, %24, %25 in 0 : vector<1x128xf32>, vector<1x128xf32>, vector<6x128xf32> -> vector<8x128xf32>
      %27 = vector.shape_cast %26 : vector<8x128xf32> to vector<1x1x8x128xf32>
      %c0_20 = arith.constant 0 : index
      %c0_21 = arith.constant 0 : index
      %c0_22 = arith.constant 0 : index
      %c0_23 = arith.constant 0 : index
      %28 = vector.load %arg8[%c0_20, %c0_21, %c0_22, %c0_23] : memref<1x1x8x128xf32, #tpu.memory_space<vmem>>, vector<1x1x8x128xf32>
      tpu.vector_store %arg8[%c0_20, %c0_21, %c0_22, %c0_23], %27 {strides = array<i32>} : memref<1x1x8x128xf32, #tpu.memory_space<vmem>>, vector<1x1x8x128xf32>,
      %29 = arith.truncf %19 : vector<8x128xf32> to vector<8x128xbf16>
      %c0_24 = arith.constant 0 : index
      %c0_25 = arith.constant 0 : index
      %c0_26 = arith.constant 0 : index
      %30 = vector.load %arg7[%c0_24, %c0_25, %c0_26] : memref<1x8x128xbf16, #tpu.memory_space<vmem>>, vector<1x8x128xbf16>
      %31 = vector.shape_cast %30 : vector<1x8x128xbf16> to vector<8x128xbf16>
      %32 = vector.shape_cast %29 : vector<8x128xbf16> to vector<1x8x128xbf16>
      tpu.vector_store %arg7[%c0_24, %c0_25, %c0_26], %32 {strides = array<i32>} : memref<1x8x128xbf16, #tpu.memory_space<vmem>>, vector<1x8x128xbf16>,
    } else {
    }
    return
  }
  func.func @transform_0(%arg0: i32, %arg1: i32, %arg2: i32, %arg3: i32) -> (i32, i32, i32) {
    %c0_i32 = arith.constant 0 : i32
    return %arg0, %arg1, %arg3 : i32, i32, i32
  }
  func.func @transform_1(%arg0: i32, %arg1: i32, %arg2: i32, %arg3: i32) -> (i32, i32, i32) {
    %c0_i32 = arith.constant 0 : i32
    return %arg0, %arg3, %arg2 : i32, i32, i32
  }
  func.func @transform_2(%arg0: i32, %arg1: i32, %arg2: i32, %arg3: i32) -> (i32, i32) {
    %c0_i32 = arith.constant 0 : i32
    %c0_i32_0 = arith.constant 0 : i32
    return %c0_i32, %arg2 : i32, i32
  }
  func.func @transform_3(%arg0: i32, %arg1: i32, %arg2: i32, %arg3: i32) -> (i32, i32, i32) {
    %c0_i32 = arith.constant 0 : i32
    return %arg0, %arg1, %arg2 : i32, i32, i32
  }
  func.func @transform_4(%arg0: i32, %arg1: i32, %arg2: i32, %arg3: i32) -> (i32, i32, i32, i32) {
    %c0_i32 = arith.constant 0 : i32
    %c0_i32_0 = arith.constant 0 : i32
    return %arg0, %arg1, %c0_i32, %arg2 : i32, i32, i32, i32
  }
}

module attributes {stable_mosaic.version = 11 : i64} {
  func.func @_mm_kernel(%arg0: i32, %arg1: i32, %arg2: i32, %arg3: i32, %arg4: memref<1x32x256xbf16, #tpu.memory_space<vmem>>, %arg5: memref<1x256x128xbf16, #tpu.memory_space<vmem>>, %arg6: memref<1x128xf32, #tpu.memory_space<vmem>>, %arg7: memref<1x32x128xbf16, #tpu.memory_space<vmem>>, %arg8: memref<1x1x8x128xf32, #tpu.memory_space<vmem>>, %arg9: memref<32x128xf32, #tpu.memory_space<vmem>>) attributes {dimension_semantics = [#tpu.dimension_semantics<parallel>, #tpu.dimension_semantics<parallel>, #tpu.dimension_semantics<parallel>, #tpu.dimension_semantics<arbitrary>], iteration_bounds = array<i64: 4, 1, 1, 1>, scalar_prefetch = 0 : i64, scratch_operands = 1 : i64, tpu.core_type = #tpu.core_type<tc>, window_params = [{transform_indices = @transform_0, window_bounds = array<i64: 1, 32, 256>}, {transform_indices = @transform_1, window_bounds = array<i64: 1, 256, 128>}, {transform_indices = @transform_2, window_bounds = array<i64: 1, 128>}, {transform_indices = @transform_3, window_bounds = array<i64: 1, 32, 128>}, {transform_indices = @transform_4, window_bounds = array<i64: 1, 1, 8, 128>}]} {
    %c0_i32 = arith.constant 0 : i32
    %0 = arith.cmpi eq, %arg3, %c0_i32 : i32
    %1 = arith.extui %0 : i1 to i32
    %c0_i32_0 = arith.constant 0 : i32
    %2 = arith.cmpi ne, %1, %c0_i32_0 : i32
    scf.if %2 {
      %cst_13 = arith.constant 0.000000e+00 : f32
      %16 = vector.broadcast %cst_13 : f32 to vector<32x128xf32>
      %c0_14 = arith.constant 0 : index
      %c0_15 = arith.constant 0 : index
      %17 = vector.load %arg9[%c0_14, %c0_15] : memref<32x128xf32, #tpu.memory_space<vmem>>, vector<32x128xf32>
      tpu.vector_store %arg9[%c0_14, %c0_15], %16 {strides = array<i32>} : memref<32x128xf32, #tpu.memory_space<vmem>>, vector<32x128xf32>,
    } else {
    }
    %c0 = arith.constant 0 : index
    %c0_1 = arith.constant 0 : index
    %c0_2 = arith.constant 0 : index
    %3 = vector.load %arg4[%c0, %c0_1, %c0_2] : memref<1x32x256xbf16, #tpu.memory_space<vmem>>, vector<1x32x256xbf16>
    %4 = vector.shape_cast %3 : vector<1x32x256xbf16> to vector<32x256xbf16>
    %cst = arith.constant 0.000000e+00 : bf16
    %5 = vector.broadcast %cst : bf16 to vector<32x256xbf16>
    %6 = arith.maximumf %4, %5 : vector<32x256xbf16>
    %c0_3 = arith.constant 0 : index
    %c0_4 = arith.constant 0 : index
    %7 = vector.load %arg9[%c0_3, %c0_4] : memref<32x128xf32, #tpu.memory_space<vmem>>, vector<32x128xf32>
    %c0_5 = arith.constant 0 : index
    %c0_6 = arith.constant 0 : index
    %c0_7 = arith.constant 0 : index
    %8 = vector.load %arg5[%c0_5, %c0_6, %c0_7] : memref<1x256x128xbf16, #tpu.memory_space<vmem>>, vector<1x256x128xbf16>
    %9 = vector.shape_cast %8 : vector<1x256x128xbf16> to vector<256x128xbf16>
    %cst_8 = arith.constant dense<0.000000e+00> : vector<32x128xf32>
    %10 = tpu.matmul %6, %9, %cst_8 {dimension_numbers = #tpu.dot_dimension_numbers<[1], [0], [0], [1], [0, 0, 1, 1], [], []>} : vector<32x256xbf16>, vector<256x128xbf16>, vector<32x128xf32> -> vector<32x128xf32>
    %11 = arith.addf %7, %10 : vector<32x128xf32>
    %c0_9 = arith.constant 0 : index
    %c0_10 = arith.constant 0 : index
    %12 = vector.load %arg9[%c0_9, %c0_10] : memref<32x128xf32, #tpu.memory_space<vmem>>, vector<32x128xf32>
    tpu.vector_store %arg9[%c0_9, %c0_10], %11 {strides = array<i32>} : memref<32x128xf32, #tpu.memory_space<vmem>>, vector<32x128xf32>,
    %c0_i32_11 = arith.constant 0 : i32
    %13 = arith.cmpi eq, %arg3, %c0_i32_11 : i32
    %14 = arith.extui %13 : i1 to i32
    %c0_i32_12 = arith.constant 0 : i32
    %15 = arith.cmpi ne, %14, %c0_i32_12 : i32
    scf.if %15 {
      %c0_13 = arith.constant 0 : index
      %c0_14 = arith.constant 0 : index
      %16 = vector.load %arg9[%c0_13, %c0_14] : memref<32x128xf32, #tpu.memory_space<vmem>>, vector<32x128xf32>
      %c0_15 = arith.constant 0 : index
      %c0_16 = arith.constant 0 : index
      %17 = vector.load %arg6[%c0_15, %c0_16] : memref<1x128xf32, #tpu.memory_space<vmem>>, vector<1x128xf32>
      %18 = vector.broadcast %17 : vector<1x128xf32> to vector<32x128xf32>
      %19 = arith.addf %16, %18 : vector<32x128xf32>
      %cst_17 = arith.constant dense<0.000000e+00> : vector<128xf32>
      %20 = vector.multi_reduction <add>, %19, %cst_17 [0] : vector<32x128xf32> to vector<128xf32>
      %21 = vector.shape_cast %20 : vector<128xf32> to vector<1x128xf32>
      %22 = arith.mulf %19, %19 : vector<32x128xf32>
      %cst_18 = arith.constant dense<0.000000e+00> : vector<128xf32>
      %23 = vector.multi_reduction <add>, %22, %cst_18 [0] : vector<32x128xf32> to vector<128xf32>
      %24 = vector.shape_cast %23 : vector<128xf32> to vector<1x128xf32>
      %cst_19 = arith.constant 0.000000e+00 : f32
      %25 = vector.broadcast %cst_19 : f32 to vector<6x128xf32>
      %26 = tpu.concatenate %21, %24, %25 in 0 : vector<1x128xf32>, vector<1x128xf32>, vector<6x128xf32> -> vector<8x128xf32>
      %27 = vector.shape_cast %26 : vector<8x128xf32> to vector<1x1x8x128xf32>
      %c0_20 = arith.constant 0 : index
      %c0_21 = arith.constant 0 : index
      %c0_22 = arith.constant 0 : index
      %c0_23 = arith.constant 0 : index
      %28 = vector.load %arg8[%c0_20, %c0_21, %c0_22, %c0_23] : memref<1x1x8x128xf32, #tpu.memory_space<vmem>>, vector<1x1x8x128xf32>
      tpu.vector_store %arg8[%c0_20, %c0_21, %c0_22, %c0_23], %27 {strides = array<i32>} : memref<1x1x8x128xf32, #tpu.memory_space<vmem>>, vector<1x1x8x128xf32>,
      %29 = arith.truncf %19 : vector<32x128xf32> to vector<32x128xbf16>
      %c0_24 = arith.constant 0 : index
      %c0_25 = arith.constant 0 : index
      %c0_26 = arith.constant 0 : index
      %30 = vector.load %arg7[%c0_24, %c0_25, %c0_26] : memref<1x32x128xbf16, #tpu.memory_space<vmem>>, vector<1x32x128xbf16>
      %31 = vector.shape_cast %30 : vector<1x32x128xbf16> to vector<32x128xbf16>
      %32 = vector.shape_cast %29 : vector<32x128xbf16> to vector<1x32x128xbf16>
      tpu.vector_store %arg7[%c0_24, %c0_25, %c0_26], %32 {strides = array<i32>} : memref<1x32x128xbf16, #tpu.memory_space<vmem>>, vector<1x32x128xbf16>,
    } else {
    }
    return
  }
  func.func @transform_0(%arg0: i32, %arg1: i32, %arg2: i32, %arg3: i32) -> (i32, i32, i32) {
    %c0_i32 = arith.constant 0 : i32
    return %arg0, %arg1, %arg3 : i32, i32, i32
  }
  func.func @transform_1(%arg0: i32, %arg1: i32, %arg2: i32, %arg3: i32) -> (i32, i32, i32) {
    %c0_i32 = arith.constant 0 : i32
    return %arg0, %arg3, %arg2 : i32, i32, i32
  }
  func.func @transform_2(%arg0: i32, %arg1: i32, %arg2: i32, %arg3: i32) -> (i32, i32) {
    %c0_i32 = arith.constant 0 : i32
    %c0_i32_0 = arith.constant 0 : i32
    return %c0_i32, %arg2 : i32, i32
  }
  func.func @transform_3(%arg0: i32, %arg1: i32, %arg2: i32, %arg3: i32) -> (i32, i32, i32) {
    %c0_i32 = arith.constant 0 : i32
    return %arg0, %arg1, %arg2 : i32, i32, i32
  }
  func.func @transform_4(%arg0: i32, %arg1: i32, %arg2: i32, %arg3: i32) -> (i32, i32, i32, i32) {
    %c0_i32 = arith.constant 0 : i32
    %c0_i32_0 = arith.constant 0 : i32
    return %arg0, %arg1, %c0_i32, %arg2 : i32, i32, i32, i32
  }
}

module attributes {stable_mosaic.version = 11 : i64} {
  func.func @_mm_kernel(%arg0: i32, %arg1: i32, %arg2: i32, %arg3: i32, %arg4: memref<1x128x128xbf16, #tpu.memory_space<vmem>>, %arg5: memref<1x128x128xbf16, #tpu.memory_space<vmem>>, %arg6: memref<1x128xf32, #tpu.memory_space<vmem>>, %arg7: memref<1x128x128xbf16, #tpu.memory_space<vmem>>, %arg8: memref<1x1x8x128xf32, #tpu.memory_space<vmem>>, %arg9: memref<128x128xf32, #tpu.memory_space<vmem>>) attributes {dimension_semantics = [#tpu.dimension_semantics<parallel>, #tpu.dimension_semantics<parallel>, #tpu.dimension_semantics<parallel>, #tpu.dimension_semantics<arbitrary>], iteration_bounds = array<i64: 4, 1, 1, 1>, scalar_prefetch = 0 : i64, scratch_operands = 1 : i64, tpu.core_type = #tpu.core_type<tc>, window_params = [{transform_indices = @transform_0, window_bounds = array<i64: 1, 128, 128>}, {transform_indices = @transform_1, window_bounds = array<i64: 1, 128, 128>}, {transform_indices = @transform_2, window_bounds = array<i64: 1, 128>}, {transform_indices = @transform_3, window_bounds = array<i64: 1, 128, 128>}, {transform_indices = @transform_4, window_bounds = array<i64: 1, 1, 8, 128>}]} {
    %c0_i32 = arith.constant 0 : i32
    %0 = arith.cmpi eq, %arg3, %c0_i32 : i32
    %1 = arith.extui %0 : i1 to i32
    %c0_i32_0 = arith.constant 0 : i32
    %2 = arith.cmpi ne, %1, %c0_i32_0 : i32
    scf.if %2 {
      %cst_13 = arith.constant 0.000000e+00 : f32
      %16 = vector.broadcast %cst_13 : f32 to vector<128x128xf32>
      %c0_14 = arith.constant 0 : index
      %c0_15 = arith.constant 0 : index
      %17 = vector.load %arg9[%c0_14, %c0_15] : memref<128x128xf32, #tpu.memory_space<vmem>>, vector<128x128xf32>
      tpu.vector_store %arg9[%c0_14, %c0_15], %16 {strides = array<i32>} : memref<128x128xf32, #tpu.memory_space<vmem>>, vector<128x128xf32>,
    } else {
    }
    %c0 = arith.constant 0 : index
    %c0_1 = arith.constant 0 : index
    %c0_2 = arith.constant 0 : index
    %3 = vector.load %arg4[%c0, %c0_1, %c0_2] : memref<1x128x128xbf16, #tpu.memory_space<vmem>>, vector<1x128x128xbf16>
    %4 = vector.shape_cast %3 : vector<1x128x128xbf16> to vector<128x128xbf16>
    %cst = arith.constant 0.000000e+00 : bf16
    %5 = vector.broadcast %cst : bf16 to vector<128x128xbf16>
    %6 = arith.maximumf %4, %5 : vector<128x128xbf16>
    %c0_3 = arith.constant 0 : index
    %c0_4 = arith.constant 0 : index
    %7 = vector.load %arg9[%c0_3, %c0_4] : memref<128x128xf32, #tpu.memory_space<vmem>>, vector<128x128xf32>
    %c0_5 = arith.constant 0 : index
    %c0_6 = arith.constant 0 : index
    %c0_7 = arith.constant 0 : index
    %8 = vector.load %arg5[%c0_5, %c0_6, %c0_7] : memref<1x128x128xbf16, #tpu.memory_space<vmem>>, vector<1x128x128xbf16>
    %9 = vector.shape_cast %8 : vector<1x128x128xbf16> to vector<128x128xbf16>
    %cst_8 = arith.constant dense<0.000000e+00> : vector<128x128xf32>
    %10 = tpu.matmul %6, %9, %cst_8 {dimension_numbers = #tpu.dot_dimension_numbers<[1], [0], [0], [1], [0, 0, 1, 1], [], []>} : vector<128x128xbf16>, vector<128x128xbf16>, vector<128x128xf32> -> vector<128x128xf32>
    %11 = arith.addf %7, %10 : vector<128x128xf32>
    %c0_9 = arith.constant 0 : index
    %c0_10 = arith.constant 0 : index
    %12 = vector.load %arg9[%c0_9, %c0_10] : memref<128x128xf32, #tpu.memory_space<vmem>>, vector<128x128xf32>
    tpu.vector_store %arg9[%c0_9, %c0_10], %11 {strides = array<i32>} : memref<128x128xf32, #tpu.memory_space<vmem>>, vector<128x128xf32>,
    %c0_i32_11 = arith.constant 0 : i32
    %13 = arith.cmpi eq, %arg3, %c0_i32_11 : i32
    %14 = arith.extui %13 : i1 to i32
    %c0_i32_12 = arith.constant 0 : i32
    %15 = arith.cmpi ne, %14, %c0_i32_12 : i32
    scf.if %15 {
      %c0_13 = arith.constant 0 : index
      %c0_14 = arith.constant 0 : index
      %16 = vector.load %arg9[%c0_13, %c0_14] : memref<128x128xf32, #tpu.memory_space<vmem>>, vector<128x128xf32>
      %c0_15 = arith.constant 0 : index
      %c0_16 = arith.constant 0 : index
      %17 = vector.load %arg6[%c0_15, %c0_16] : memref<1x128xf32, #tpu.memory_space<vmem>>, vector<1x128xf32>
      %18 = vector.broadcast %17 : vector<1x128xf32> to vector<128x128xf32>
      %19 = arith.addf %16, %18 : vector<128x128xf32>
      %cst_17 = arith.constant dense<0.000000e+00> : vector<128xf32>
      %20 = vector.multi_reduction <add>, %19, %cst_17 [0] : vector<128x128xf32> to vector<128xf32>
      %21 = vector.shape_cast %20 : vector<128xf32> to vector<1x128xf32>
      %22 = arith.mulf %19, %19 : vector<128x128xf32>
      %cst_18 = arith.constant dense<0.000000e+00> : vector<128xf32>
      %23 = vector.multi_reduction <add>, %22, %cst_18 [0] : vector<128x128xf32> to vector<128xf32>
      %24 = vector.shape_cast %23 : vector<128xf32> to vector<1x128xf32>
      %cst_19 = arith.constant 0.000000e+00 : f32
      %25 = vector.broadcast %cst_19 : f32 to vector<6x128xf32>
      %26 = tpu.concatenate %21, %24, %25 in 0 : vector<1x128xf32>, vector<1x128xf32>, vector<6x128xf32> -> vector<8x128xf32>
      %27 = vector.shape_cast %26 : vector<8x128xf32> to vector<1x1x8x128xf32>
      %c0_20 = arith.constant 0 : index
      %c0_21 = arith.constant 0 : index
      %c0_22 = arith.constant 0 : index
      %c0_23 = arith.constant 0 : index
      %28 = vector.load %arg8[%c0_20, %c0_21, %c0_22, %c0_23] : memref<1x1x8x128xf32, #tpu.memory_space<vmem>>, vector<1x1x8x128xf32>
      tpu.vector_store %arg8[%c0_20, %c0_21, %c0_22, %c0_23], %27 {strides = array<i32>} : memref<1x1x8x128xf32, #tpu.memory_space<vmem>>, vector<1x1x8x128xf32>,
      %29 = arith.truncf %19 : vector<128x128xf32> to vector<128x128xbf16>
      %c0_24 = arith.constant 0 : index
      %c0_25 = arith.constant 0 : index
      %c0_26 = arith.constant 0 : index
      %30 = vector.load %arg7[%c0_24, %c0_25, %c0_26] : memref<1x128x128xbf16, #tpu.memory_space<vmem>>, vector<1x128x128xbf16>
      %31 = vector.shape_cast %30 : vector<1x128x128xbf16> to vector<128x128xbf16>
      %32 = vector.shape_cast %29 : vector<128x128xbf16> to vector<1x128x128xbf16>
      tpu.vector_store %arg7[%c0_24, %c0_25, %c0_26], %32 {strides = array<i32>} : memref<1x128x128xbf16, #tpu.memory_space<vmem>>, vector<1x128x128xbf16>,
    } else {
    }
    return
  }
  func.func @transform_0(%arg0: i32, %arg1: i32, %arg2: i32, %arg3: i32) -> (i32, i32, i32) {
    %c0_i32 = arith.constant 0 : i32
    return %arg0, %arg1, %arg3 : i32, i32, i32
  }
  func.func @transform_1(%arg0: i32, %arg1: i32, %arg2: i32, %arg3: i32) -> (i32, i32, i32) {
    %c0_i32 = arith.constant 0 : i32
    return %arg0, %arg3, %arg2 : i32, i32, i32
  }
  func.func @transform_2(%arg0: i32, %arg1: i32, %arg2: i32, %arg3: i32) -> (i32, i32) {
    %c0_i32 = arith.constant 0 : i32
    %c0_i32_0 = arith.constant 0 : i32
    return %c0_i32, %arg2 : i32, i32
  }
  func.func @transform_3(%arg0: i32, %arg1: i32, %arg2: i32, %arg3: i32) -> (i32, i32, i32) {
    %c0_i32 = arith.constant 0 : i32
    return %arg0, %arg1, %arg2 : i32, i32, i32
  }
  func.func @transform_4(%arg0: i32, %arg1: i32, %arg2: i32, %arg3: i32) -> (i32, i32, i32, i32) {
    %c0_i32 = arith.constant 0 : i32
    %c0_i32_0 = arith.constant 0 : i32
    return %arg0, %arg1, %c0_i32, %arg2 : i32, i32, i32, i32
  }
}

module attributes {stable_mosaic.version = 11 : i64} {
  func.func @_mm_kernel(%arg0: i32, %arg1: i32, %arg2: i32, %arg3: i32, %arg4: memref<1x256x128xbf16, #tpu.memory_space<vmem>>, %arg5: memref<1x128x128xbf16, #tpu.memory_space<vmem>>, %arg6: memref<1x128xf32, #tpu.memory_space<vmem>>, %arg7: memref<1x256x128xf32, #tpu.memory_space<vmem>>, %arg8: memref<1x1x8x128xf32, #tpu.memory_space<vmem>>, %arg9: memref<256x128xf32, #tpu.memory_space<vmem>>) attributes {dimension_semantics = [#tpu.dimension_semantics<parallel>, #tpu.dimension_semantics<parallel>, #tpu.dimension_semantics<parallel>, #tpu.dimension_semantics<arbitrary>], iteration_bounds = array<i64: 4, 2, 1, 1>, scalar_prefetch = 0 : i64, scratch_operands = 1 : i64, tpu.core_type = #tpu.core_type<tc>, window_params = [{transform_indices = @transform_0, window_bounds = array<i64: 1, 256, 128>}, {transform_indices = @transform_1, window_bounds = array<i64: 1, 128, 128>}, {transform_indices = @transform_2, window_bounds = array<i64: 1, 128>}, {transform_indices = @transform_3, window_bounds = array<i64: 1, 256, 128>}, {transform_indices = @transform_4, window_bounds = array<i64: 1, 1, 8, 128>}]} {
    %c0_i32 = arith.constant 0 : i32
    %0 = arith.cmpi eq, %arg3, %c0_i32 : i32
    %1 = arith.extui %0 : i1 to i32
    %c0_i32_0 = arith.constant 0 : i32
    %2 = arith.cmpi ne, %1, %c0_i32_0 : i32
    scf.if %2 {
      %cst_13 = arith.constant 0.000000e+00 : f32
      %16 = vector.broadcast %cst_13 : f32 to vector<256x128xf32>
      %c0_14 = arith.constant 0 : index
      %c0_15 = arith.constant 0 : index
      %17 = vector.load %arg9[%c0_14, %c0_15] : memref<256x128xf32, #tpu.memory_space<vmem>>, vector<256x128xf32>
      tpu.vector_store %arg9[%c0_14, %c0_15], %16 {strides = array<i32>} : memref<256x128xf32, #tpu.memory_space<vmem>>, vector<256x128xf32>,
    } else {
    }
    %c0 = arith.constant 0 : index
    %c0_1 = arith.constant 0 : index
    %c0_2 = arith.constant 0 : index
    %3 = vector.load %arg4[%c0, %c0_1, %c0_2] : memref<1x256x128xbf16, #tpu.memory_space<vmem>>, vector<1x256x128xbf16>
    %4 = vector.shape_cast %3 : vector<1x256x128xbf16> to vector<256x128xbf16>
    %cst = arith.constant 0.000000e+00 : bf16
    %5 = vector.broadcast %cst : bf16 to vector<256x128xbf16>
    %6 = arith.maximumf %4, %5 : vector<256x128xbf16>
    %c0_3 = arith.constant 0 : index
    %c0_4 = arith.constant 0 : index
    %7 = vector.load %arg9[%c0_3, %c0_4] : memref<256x128xf32, #tpu.memory_space<vmem>>, vector<256x128xf32>
    %c0_5 = arith.constant 0 : index
    %c0_6 = arith.constant 0 : index
    %c0_7 = arith.constant 0 : index
    %8 = vector.load %arg5[%c0_5, %c0_6, %c0_7] : memref<1x128x128xbf16, #tpu.memory_space<vmem>>, vector<1x128x128xbf16>
    %9 = vector.shape_cast %8 : vector<1x128x128xbf16> to vector<128x128xbf16>
    %cst_8 = arith.constant dense<0.000000e+00> : vector<256x128xf32>
    %10 = tpu.matmul %6, %9, %cst_8 {dimension_numbers = #tpu.dot_dimension_numbers<[1], [0], [0], [1], [0, 0, 1, 1], [], []>} : vector<256x128xbf16>, vector<128x128xbf16>, vector<256x128xf32> -> vector<256x128xf32>
    %11 = arith.addf %7, %10 : vector<256x128xf32>
    %c0_9 = arith.constant 0 : index
    %c0_10 = arith.constant 0 : index
    %12 = vector.load %arg9[%c0_9, %c0_10] : memref<256x128xf32, #tpu.memory_space<vmem>>, vector<256x128xf32>
    tpu.vector_store %arg9[%c0_9, %c0_10], %11 {strides = array<i32>} : memref<256x128xf32, #tpu.memory_space<vmem>>, vector<256x128xf32>,
    %c0_i32_11 = arith.constant 0 : i32
    %13 = arith.cmpi eq, %arg3, %c0_i32_11 : i32
    %14 = arith.extui %13 : i1 to i32
    %c0_i32_12 = arith.constant 0 : i32
    %15 = arith.cmpi ne, %14, %c0_i32_12 : i32
    scf.if %15 {
      %c0_13 = arith.constant 0 : index
      %c0_14 = arith.constant 0 : index
      %16 = vector.load %arg9[%c0_13, %c0_14] : memref<256x128xf32, #tpu.memory_space<vmem>>, vector<256x128xf32>
      %c0_15 = arith.constant 0 : index
      %c0_16 = arith.constant 0 : index
      %17 = vector.load %arg6[%c0_15, %c0_16] : memref<1x128xf32, #tpu.memory_space<vmem>>, vector<1x128xf32>
      %18 = vector.broadcast %17 : vector<1x128xf32> to vector<256x128xf32>
      %19 = arith.addf %16, %18 : vector<256x128xf32>
      %cst_17 = arith.constant dense<0.000000e+00> : vector<128xf32>
      %20 = vector.multi_reduction <add>, %19, %cst_17 [0] : vector<256x128xf32> to vector<128xf32>
      %21 = vector.shape_cast %20 : vector<128xf32> to vector<1x128xf32>
      %22 = arith.mulf %19, %19 : vector<256x128xf32>
      %cst_18 = arith.constant dense<0.000000e+00> : vector<128xf32>
      %23 = vector.multi_reduction <add>, %22, %cst_18 [0] : vector<256x128xf32> to vector<128xf32>
      %24 = vector.shape_cast %23 : vector<128xf32> to vector<1x128xf32>
      %cst_19 = arith.constant 0.000000e+00 : f32
      %25 = vector.broadcast %cst_19 : f32 to vector<6x128xf32>
      %26 = tpu.concatenate %21, %24, %25 in 0 : vector<1x128xf32>, vector<1x128xf32>, vector<6x128xf32> -> vector<8x128xf32>
      %27 = vector.shape_cast %26 : vector<8x128xf32> to vector<1x1x8x128xf32>
      %c0_20 = arith.constant 0 : index
      %c0_21 = arith.constant 0 : index
      %c0_22 = arith.constant 0 : index
      %c0_23 = arith.constant 0 : index
      %28 = vector.load %arg8[%c0_20, %c0_21, %c0_22, %c0_23] : memref<1x1x8x128xf32, #tpu.memory_space<vmem>>, vector<1x1x8x128xf32>
      tpu.vector_store %arg8[%c0_20, %c0_21, %c0_22, %c0_23], %27 {strides = array<i32>} : memref<1x1x8x128xf32, #tpu.memory_space<vmem>>, vector<1x1x8x128xf32>,
      %29 = math.tanh %19 : vector<256x128xf32>
      %c0_24 = arith.constant 0 : index
      %c0_25 = arith.constant 0 : index
      %c0_26 = arith.constant 0 : index
      %30 = vector.load %arg7[%c0_24, %c0_25, %c0_26] : memref<1x256x128xf32, #tpu.memory_space<vmem>>, vector<1x256x128xf32>
      %31 = vector.shape_cast %30 : vector<1x256x128xf32> to vector<256x128xf32>
      %32 = vector.shape_cast %29 : vector<256x128xf32> to vector<1x256x128xf32>
      tpu.vector_store %arg7[%c0_24, %c0_25, %c0_26], %32 {strides = array<i32>} : memref<1x256x128xf32, #tpu.memory_space<vmem>>, vector<1x256x128xf32>,
    } else {
    }
    return
  }
  func.func @transform_0(%arg0: i32, %arg1: i32, %arg2: i32, %arg3: i32) -> (i32, i32, i32) {
    %c0_i32 = arith.constant 0 : i32
    return %arg0, %arg1, %arg3 : i32, i32, i32
  }
  func.func @transform_1(%arg0: i32, %arg1: i32, %arg2: i32, %arg3: i32) -> (i32, i32, i32) {
    %c0_i32 = arith.constant 0 : i32
    return %arg0, %arg3, %arg2 : i32, i32, i32
  }
  func.func @transform_2(%arg0: i32, %arg1: i32, %arg2: i32, %arg3: i32) -> (i32, i32) {
    %c0_i32 = arith.constant 0 : i32
    %c0_i32_0 = arith.constant 0 : i32
    return %c0_i32, %arg2 : i32, i32
  }
  func.func @transform_3(%arg0: i32, %arg1: i32, %arg2: i32, %arg3: i32) -> (i32, i32, i32) {
    %c0_i32 = arith.constant 0 : i32
    return %arg0, %arg1, %arg2 : i32, i32, i32
  }
  func.func @transform_4(%arg0: i32, %arg1: i32, %arg2: i32, %arg3: i32) -> (i32, i32, i32, i32) {
    %c0_i32 = arith.constant 0 : i32
    %c0_i32_0 = arith.constant 0 : i32
    return %arg0, %arg1, %c0_i32, %arg2 : i32, i32, i32, i32
  }
}

</mosaic_0001>

<bundles_post_ra>
// kernel: _lambda_.10
= control target key start
LH: loop header
LB: loop body
LE: loop exit
PB: predicated region body
PF: predicated region fallthrough
CT: control target
= control target key end

     0   :  { %10 = vsyncpa [#allocation4], 0  ;;  %s2150_s0 = inlined_call_operand.vmem [shape: bf16[1,512,128], index: 0, kind: input, shape index: {}]   ;;  %s2151_s1 = inlined_call_operand.vmem [shape: bf16[1,128,128], index: 1, kind: input, shape index: {}]   ;;  %s2152_s2 = inlined_call_operand.vmem [shape: f32[1,128], index: 2, kind: input, shape index: {}]   ;;  %s2153_s3 = inlined_call_operand.vmem [shape: bf16[1,512,128], index: 3, kind: output, shape index: {0}]   ;;  %s2154_s4 = inlined_call_operand.hbm [shape: f32[1,2,8,128], index: 4, kind: output, shape index: {1}]  }
   0x1   :  { %12 = vsyncpa [#allocation4 + $0x1], 0  ;;  %s1848_s15 = smov 0   ;;  %s1850_s16 = smov 0  }
   0x2   :  { %s1852_s17 = smov 0   ;;  %s1854_s18 = smov 0  }
   0x3   :  { %s1856_s19 = smov 0   ;;  %s1858_s20 = smov 0  }
   0x4 LB: > { %s1375_s21 = sadd.s32 4294967295, %s1820_s20   ;;  %s1376_s22 = sadd.s32 4294967294, %s1820_s20   ;;  %s1820_s20 = sphi %s1858_s20, %s18_s20   ;;  %s1816_s19 = sphi %s1856_s19, %s2161_s19   ;;  %s1812_s18 = sphi %s1854_s18, %s2160_s18   ;;  %s1808_s17 = sphi %s1852_s17, %s2159_s17   ;;  %s1804_s16 = sphi %s1850_s16, %s2158_s16   ;;  %s1800_s15 = sphi %s1848_s15, %s2157_s15  }
   0x5   : > { %s40_s23 = sadd.s32 1, %s1816_s19  ;;  %s171_s24 = sadd.s32 1, %s1808_s17 }
   0x6   : > { %p42_p0 = scmp.ge.s32.totalorder %s40_s23, 2  ;;  %p181_p1 = scmp.ne.s32.totalorder %s1808_s17, %s1804_s16 }
   0x7   : > { %p182_p2 = scmp.eq.s32.totalorder %s1375_s21, 1  ;;  %p187_p3 = scmp.ne.s32.totalorder %s1804_s16, %s1800_s15 }
   0x8   : > { %s2163_s23 = smov (%p42_p0, %s40_s23), 0  ;;  %p188_p5 = scmp.eq.s32.totalorder %s1376_s22, 1 }
   0x9   : > { %p1888_p4 = por %p182_p2, %p181_p1  ;;  %s165_s26 = ssub.s32 %s1816_s19, %s2163_s23 }
   0xa   : > { %p1381_p6 = scmp.ge.s32.totalorder %s1820_s20, 1  ;;  %p169_p7 = scmp.eq.s32.totalorder %s165_s26, 0 }
   0xb   : > { %p1895_p8 = por %p188_p5, %p187_p3  ;;  %p244_p9 = scmp.lt.s32.totalorder %s1820_s20, 3 }
   0xc   : > { %s1901_s28 = scalar_select %p169_p7, %s1808_s17, %s171_s24  }
   0xd   : > { %p245_p10 = pnand %p1381_p6, %p244_p9 }
   0xe   : > { %v1718_v0 = vld [vmem:[%s2151_s1] sm:$0xff] (!%p245_p10)   ;;  %s1383_s5 = sshll.u32 (!%p245_p10), %s1812_s18, 5  ;;  %v1719_v1 = vld [vmem:[%s2151_s1 + $0x8] sm:$0xff] (!%p245_p10)   ;;  %v1720_v2 = vld [vmem:[%s2151_s1 + $0x10] sm:$0xff] (!%p245_p10)   ;;  %vm1012_vm0 = vcmask (!%p245_p10), 1040384   ;;  %s1445_s21 = sshll.u32 (!%p245_p10), %s1812_s18, 7 }
   0xf   : > { %248 = sbr.rel (%p245_p10) target bundleno = 356 (0x164), region = 32  ;;  %p307_p11 = scmp.lt.s32.totalorder (!%p245_p10), %s1383_s5, 63  ;;  %1599 = vmatprep.subr.bf16.mxu0 (!%p245_p10), %v1718_v0  ;;  %1647 = vmatprep.subr.bf16.mxu1 (!%p245_p10), %v1718_v0  ;;  %v1721_v3 = vld [vmem:[%s2151_s1 + $0x18] sm:$0xff] (!%p245_p10)   ;;  %v1722_v5 = vld [vmem:[%s2151_s1 + $0x20] sm:$0xff] (!%p245_p10)   ;;  %v1723_v6 = vld [vmem:[%s2151_s1 + $0x28] sm:$0xff] (!%p245_p10)   ;;  %vm1014_vm1 = vcmask (!%p245_p10), 1041408  }
  0x10   : > { %1600 = vmatpush3.bf16.msra.mxu0 (!%p245_p10), %v1718_v0  ;;  %1655 = vmatpush3.bf16.msra.mxu1 (!%p245_p10), %v1718_v0  ;;  %v1724_v8 = vld [vmem:[%s2151_s1 + $0x30] sm:$0xff] (!%p245_p10)   ;;  %v1725_v9 = vld [vmem:[%s2151_s1 + $0x38] sm:$0xff] (!%p245_p10)   ;;  %v1957_v24 = vld [vmem:[%s2152_s2] ss:$0 sm:$0xff] (!%p245_p10)  ;;  %s2103_s30 = scalar_lea.hbm (!%p245_p10), %s2154_s4, %s1445_s21  ;;  %s1822_s7 = smov (!%p245_p10), [#allocation3]  }
  0x11   : > { %1601 = vmatprep.subr.bf16.mxu0 (!%p245_p10), %v1719_v1  ;;  %1648 = vmatprep.subr.bf16.mxu1 (!%p245_p10), %v1719_v1  ;;  %s1746_s8 = sshll.u32 (!%p245_p10), %s1822_s7, 4  ;;  %s1747_s8 = int_to_ptr.vmem [resolvable:$false] %s1746_s8 }
  0x12   : > { %s1748_s9 = scalar_lea.vmem (!%p245_p10), %s1747_s8, 256 }
  0x14   : > { %1602 = vmatpush3.bf16.msra.mxu0 (!%p245_p10), %v1719_v1  ;;  %1656 = vmatpush3.bf16.msra.mxu1 (!%p245_p10), %v1719_v1 }
  0x15   : > { %1603 = vmatprep.subr.bf16.mxu0 (!%p245_p10), %v1720_v2  ;;  %1649 = vmatprep.subr.bf16.mxu1 (!%p245_p10), %v1720_v2 }
  0x16   : > { %s2165_s5 = smov (!%p307_p11, %s1383_s5), 63 }
  0x17   : > { %s1384_s10 = sshll.u32 %s2165_s5, 2  ;;  %s301_s5 = sand.u32 1, %s1804_s16  }
  0x18   : > { %s1921_s13 = scalar_lea.vmem %s2150_s0, %s1384_s10  ;;  %1604 = vmatpush3.bf16.msra.mxu0 %v1720_v2  ;;  %1657 = vmatpush3.bf16.msra.mxu1 %v1720_v2  ;;  %s1976_s14 = scalar_lea.vmem %s2153_s3, %s1384_s10 }
  0x19   : > { %v1726_v4 = vld [vmem:[%s1921_s13] sm:$0xff]   ;;  %1605 = vmatprep.subr.bf16.mxu0 %v1721_v3  ;;  %1650 = vmatprep.subr.bf16.mxu1 %v1721_v3  ;;  %v1727_v10 = vld [vmem:[%s1921_s13 + $0x8] sm:$0xff]   ;;  %v1728_v12 = vld [vmem:[%s1921_s13 + $0x10] sm:$0xff]   ;;  %s1382_s10 = sshll.u32 %s301_s5, 3  ;;  %s1190_s6 = scalar_lea.sflag [#allocation4], %s301_s5 }
  0x1a   : > { %1615 = vmatprep.mubr.bf16.mxu0 %v1726_v4  ;;  %v1734_v7 = vld [vmem:[%s1921_s13 + $0x40] sm:$0xff]   ;;  %v1735_v11 = vld [vmem:[%s1921_s13 + $0x48] sm:$0xff]   ;;  %v1736_v13 = vld [vmem:[%s1921_s13 + $0x50] sm:$0xff]   ;;  %s303_s22 = scalar_lea.vmem [#allocation3], %s1382_s10 }
  0x1b   : > { %1631 = vmatprep.mubr.bf16.mxu1 %v1734_v7  ;;  %v1729_v14 = vld [vmem:[%s1921_s13 + $0x18] sm:$0xff]   ;;  %v1730_v16 = vld [vmem:[%s1921_s13 + $0x20] sm:$0xff]   ;;  %v1731_v18 = vld [vmem:[%s1921_s13 + $0x28] sm:$0xff]   ;;  %s1210_s24 = sshll.u32 %s303_s22, 4  ;;  %s2105_s24 = int_to_ptr.vmem [resolvable:$true] %s1210_s24 }
  0x1c   : > { %1606 = vmatpush3.bf16.msra.mxu0 %v1721_v3  ;;  %1658 = vmatpush3.bf16.msra.mxu1 %v1721_v3  ;;  %v1737_v15 = vld [vmem:[%s1921_s13 + $0x58] sm:$0xff]   ;;  %v1738_v17 = vld [vmem:[%s1921_s13 + $0x60] sm:$0xff]   ;;  %v1739_v19 = vld [vmem:[%s1921_s13 + $0x68] sm:$0xff]   ;;  %s1742_s18 = scalar_lea.vmem %s2105_s24, 128  ;;  %p1749_p1 = scmp.lt.s32.totalorder %s2105_s24, %s1747_s8 }
  0x1d   : > { %1607 = vmatprep.subr.bf16.mxu0 %v1722_v5  ;;  %1651 = vmatprep.subr.bf16.mxu1 %v1722_v5  ;;  %v1732_v20 = vld [vmem:[%s1921_s13 + $0x30] sm:$0xff]   ;;  %v1733_v22 = vld [vmem:[%s1921_s13 + $0x38] sm:$0xff]   ;;  %p1743_p12 = scmp.ne.s32.totalorder %s2105_s24, %s1742_s18  ;;  %p1750_p2 = scmp.lt.s32.totalorder %s1748_s9, %s1742_s18 }
  0x1e   : > { %v1740_v21 = vld [vmem:[%s1921_s13 + $0x70] sm:$0xff]   ;;  %v1741_v23 = vld [vmem:[%s1921_s13 + $0x78] sm:$0xff]  }
  0x1f   : > { %p1744_p13 = pnand %p1743_p12, %p1888_p4  ;;  %p1751_p3 = por %p1750_p2, %p1749_p1 }
  0x20   : > { %1608 = vmatpush3.bf16.msra.mxu0 %v1722_v5  ;;  %1659 = vmatpush3.bf16.msra.mxu1 %v1722_v5 }
  0x21   : > { %1609 = vmatprep.subr.bf16.mxu0 %v1723_v6  ;;  %1652 = vmatprep.subr.bf16.mxu1 %v1723_v6  ;;  %p1745_p0 = pneg %p1744_p13 }
  0x23   : > { %p1752_p5 = pnand %p1751_p3, %p1745_p0 }
  0x24   : > { %1610 = vmatpush3.bf16.msra.mxu0 %v1723_v6  ;;  %1660 = vmatpush3.bf16.msra.mxu1 %v1723_v6 }
  0x25   : > { %1611 = vmatprep.subr.bf16.mxu0 %v1724_v8  ;;  %1653 = vmatprep.subr.bf16.mxu1 %v1724_v8 }
  0x28   : > { %1612 = vmatpush3.bf16.msra.mxu0 %v1724_v8  ;;  %1661 = vmatpush3.bf16.msra.mxu1 %v1724_v8 }
  0x29   : > { %1613 = vmatprep.subr.bf16.mxu0 %v1725_v9  ;;  %1654 = vmatprep.subr.bf16.mxu1 %v1725_v9 }
  0x2c   : > { %1614 = vmatpush3.bf16.msra.mxu0 %v1725_v9  ;;  %1662 = vmatpush3.bf16.msra.mxu1 %v1725_v9 }
  0x2f   : > { %1616 = vmatmul.mubr.bf16.vlgmr.msra.gmra.mrb[0].mxu0 %v1727_v10  ;;  %1632 = vmatmul.mubr.bf16.vlgmr.msra.gmra.mrb[0].mxu1 %v1735_v11 }
  0x30   : > { %1619 = vmatprep.mubr.bf16.mxu0 %v1728_v12  ;;  %1635 = vmatprep.mubr.bf16.mxu1 %v1736_v13 }
  0x37   : > { %1620 = vmatmul.mubr.bf16.gmra.mrb[4].mxu0 %v1729_v14  ;;  %1636 = vmatmul.mubr.bf16.gmra.mrb[4].mxu1 %v1737_v15 }
  0x38   : > { %1623 = vmatprep.mubr.bf16.mxu0 %v1730_v16  ;;  %1639 = vmatprep.mubr.bf16.mxu1 %v1738_v17 }
  0x3f   : > { %1624 = vmatmul.mubr.bf16.gmra.mrb[8].mxu0 %v1731_v18  ;;  %1640 = vmatmul.mubr.bf16.gmra.mrb[8].mxu1 %v1739_v19 }
  0x40   : > { %1627 = vmatprep.mubr.bf16.mxu0 %v1732_v20  ;;  %1643 = vmatprep.mubr.bf16.mxu1 %v1740_v21 }
  0x47   : > { %1628 = vmatmul.mubr.bf16.gmra.mrb[12].mxu0 %v1733_v22  ;;  %1644 = vmatmul.mubr.bf16.gmra.mrb[12].mxu1 %v1741_v23 }
 0x102   : > { %v1617_v25 = vpop.f32.mrb[0].mxu0  ;;  %v1633_v26 = vpop.f32.mrb[0].mxu1 }
 0x103   : > { %v641_v27 = vpop.f32.mrb[1].mxu0  ;;  %v1960_v28 = vadd.f32 %v1633_v26, %v1957_v24  ;;  %v705_v29 = vpop.f32.mrb[1].mxu1  ;;  %v876_v33 = vadd.f32 %v1617_v25, %v1957_v24 }
 0x104   : > { %v874_v30 = vadd.f32 %v1957_v24, %v641_v27  ;;  %v1618_v31 = vpop.f32.mrb[2].mxu0  ;;  %v1634_v32 = vpop.f32.mrb[2].mxu1  ;;  %v1966_v36 = vadd.f32 %v1957_v24, %v705_v29 }
 0x105   : > { %v877_v34 = vadd.f32 %v1618_v31, %v1957_v24  ;;  %v644_v35 = vpop.f32.mrb[3].mxu0  ;;  %v1969_v37 = vadd.f32 %v1634_v32, %v1957_v24  ;;  %v708_v38 = vpop.f32.mrb[3].mxu1  ;;  %v945_v48 = vmul.f32 %v876_v33, %v876_v33 }
 0x106   : > { %v875_v39 = vadd.f32 %v1957_v24, %v644_v35  ;;  %v1980_v40 = vadd.f32 %v1957_v24, %v708_v38  ;;  %v943_v43 = vmul.f32 %v874_v30, %v874_v30 }
 0x107   : > { %v1488_v41 = vpack.c.bf16 %v877_v34, %v876_v33  ;;  %v1528_v42 = vpack.c.bf16 %v1969_v37, %v1960_v28  ;;  %v946_v55 = vmul.f32 %v877_v34, %v877_v34 }
 0x108   : > { %v906_v44 = vadd.f32 %v875_v39, %v874_v30  ;;  %v944_v45 = vmul.f32 %v875_v39, %v875_v39  ;;  %v1483_v46 = vpack.c.bf16 %v875_v39, %v874_v30  ;;  %v1523_v47 = vpack.c.bf16 %v1980_v40, %v1966_v36 }
 0x109   : > { %1560 = vst [vmem:[%s1976_s14 + $0x8] sm:$0xff] %v1488_v41   ;;  %1568 = vst [vmem:[%s1976_s14 + $0x48] sm:$0xff] %v1528_v42  }
 0x10a   : > { %v907_v49 = vadd.f32 %v906_v44, %v876_v33  ;;  %v975_v50 = vadd.f32 %v944_v45, %v943_v43  ;;  %1484 = vst [vmem:[%s1976_s14] sm:$0xff] %v1483_v46   ;;  %v1621_v51 = vpop.f32.mrb[4].mxu0  ;;  %v1637_v52 = vpop.f32.mrb[4].mxu1  ;;  %1567 = vst [vmem:[%s1976_s14 + $0x40] sm:$0xff] %v1523_v47  }
 0x10b   : > { %v657_v53 = vpop.f32.mrb[5].mxu0  ;;  %v721_v54 = vpop.f32.mrb[5].mxu1  ;;  %v880_v61 = vadd.f32 %v1621_v51, %v1957_v24  ;;  %v1994_v0 = vadd.f32 %v1637_v52, %v1957_v24 }
 0x10c   : > { %v976_v56 = vadd.f32 %v975_v50, %v945_v48  ;;  %v878_v57 = vadd.f32 %v1957_v24, %v657_v53  ;;  %v908_v58 = vadd.f32 %v907_v49, %v877_v34  ;;  %v1622_v59 = vpop.f32.mrb[6].mxu0  ;;  %v1638_v60 = vpop.f32.mrb[6].mxu1  ;;  %v2001_v8 = vadd.f32 %v1957_v24, %v721_v54 }
 0x10d   : > { %v881_v62 = vadd.f32 %v1622_v59, %v1957_v24  ;;  %v660_v63 = vpop.f32.mrb[7].mxu0  ;;  %v1997_v1 = vadd.f32 %v1638_v60, %v1957_v24  ;;  %v724_v2 = vpop.f32.mrb[7].mxu1  ;;  %v949_v15 = vmul.f32 %v880_v61, %v880_v61 }
 0x10e   : > { %v909_v3 = vadd.f32 %v908_v58, %v878_v57  ;;  %v947_v4 = vmul.f32 %v878_v57, %v878_v57  ;;  %v977_v5 = vadd.f32 %v976_v56, %v946_v55  ;;  %v879_v6 = vadd.f32 %v1957_v24, %v660_v63 }
 0x10f   : > { %v1498_v7 = vpack.c.bf16 %v881_v62, %v880_v61  ;;  %v1538_v13 = vpack.c.bf16 %v1997_v1, %v1994_v0  ;;  %v2007_v14 = vadd.f32 %v1957_v24, %v724_v2  ;;  %v950_v23 = vmul.f32 %v881_v62, %v881_v62 }
 0x110   : > { %v978_v9 = vadd.f32 %v977_v5, %v947_v4  ;;  %v910_v10 = vadd.f32 %v909_v3, %v879_v6  ;;  %v948_v11 = vmul.f32 %v879_v6, %v879_v6  ;;  %v1493_v12 = vpack.c.bf16 %v879_v6, %v878_v57 }
 0x111   : > { %1562 = vst [vmem:[%s1976_s14 + $0x18] sm:$0xff] %v1498_v7   ;;  %1570 = vst [vmem:[%s1976_s14 + $0x58] sm:$0xff] %v1538_v13   ;;  %v1533_v21 = vpack.c.bf16 %v2007_v14, %v2001_v8 }
 0x112   : > { %v911_v16 = vadd.f32 %v910_v10, %v880_v61  ;;  %v979_v17 = vadd.f32 %v978_v9, %v948_v11  ;;  %1561 = vst [vmem:[%s1976_s14 + $0x10] sm:$0xff] %v1493_v12   ;;  %v1625_v18 = vpop.f32.mrb[8].mxu0  ;;  %v1641_v19 = vpop.f32.mrb[8].mxu1 }
 0x113   : > { %v673_v20 = vpop.f32.mrb[9].mxu0  ;;  %v737_v22 = vpop.f32.mrb[9].mxu1  ;;  %v884_v31 = vadd.f32 %v1625_v18, %v1957_v24  ;;  %1569 = vst [vmem:[%s1976_s14 + $0x50] sm:$0xff] %v1533_v21   ;;  %v2018_v34 = vadd.f32 %v1641_v19, %v1957_v24 }
 0x114   : > { %v980_v25 = vadd.f32 %v979_v17, %v949_v15  ;;  %v882_v26 = vadd.f32 %v1957_v24, %v673_v20  ;;  %v912_v27 = vadd.f32 %v911_v16, %v881_v62  ;;  %v1626_v29 = vpop.f32.mrb[10].mxu0  ;;  %v1642_v30 = vpop.f32.mrb[10].mxu1  ;;  %v2025_v45 = vadd.f32 %v1957_v24, %v737_v22 }
 0x115   : > { %v885_v32 = vadd.f32 %v1626_v29, %v1957_v24  ;;  %v676_v33 = vpop.f32.mrb[11].mxu0  ;;  %v2021_v35 = vadd.f32 %v1642_v30, %v1957_v24  ;;  %v740_v38 = vpop.f32.mrb[11].mxu1  ;;  %v953_v52 = vmul.f32 %v884_v31, %v884_v31 }
 0x116   : > { %v913_v39 = vadd.f32 %v912_v27, %v882_v26  ;;  %v951_v41 = vmul.f32 %v882_v26, %v882_v26  ;;  %v981_v42 = vadd.f32 %v980_v25, %v950_v23  ;;  %v883_v43 = vadd.f32 %v1957_v24, %v676_v33 }
 0x117   : > { %v1508_v44 = vpack.c.bf16 %v885_v32, %v884_v31  ;;  %v1548_v50 = vpack.c.bf16 %v2021_v35, %v2018_v34  ;;  %v2031_v51 = vadd.f32 %v1957_v24, %v740_v38  ;;  %v954_v60 = vmul.f32 %v885_v32, %v885_v32 }
 0x118   : > { %v982_v46 = vadd.f32 %v981_v42, %v951_v41  ;;  %v914_v47 = vadd.f32 %v913_v39, %v883_v43  ;;  %v952_v48 = vmul.f32 %v883_v43, %v883_v43  ;;  %v1503_v49 = vpack.c.bf16 %v883_v43, %v882_v26 }
 0x119   : > { %1564 = vst [vmem:[%s1976_s14 + $0x28] sm:$0xff] %v1508_v44   ;;  %1572 = vst [vmem:[%s1976_s14 + $0x68] sm:$0xff] %v1548_v50   ;;  %v1543_v58 = vpack.c.bf16 %v2031_v51, %v2025_v45  ;;  %v959_v33 = vmul.f32 %v1966_v36, %v1966_v36  ;;  %v961_v43 = vmul.f32 %v1960_v28, %v1960_v28 }
 0x11a   : > { %v915_v53 = vadd.f32 %v914_v47, %v884_v31  ;;  %v983_v54 = vadd.f32 %v982_v46, %v952_v48  ;;  %1563 = vst [vmem:[%s1976_s14 + $0x20] sm:$0xff] %v1503_v49   ;;  %v1629_v55 = vpop.f32.mrb[12].mxu0  ;;  %v1645_v56 = vpop.f32.mrb[12].mxu1  ;;  %v962_v47 = vmul.f32 %v1969_v37, %v1969_v37 }
 0x11b   : > { %v689_v57 = vpop.f32.mrb[13].mxu0  ;;  %v753_v59 = vpop.f32.mrb[13].mxu1  ;;  %v888_v4 = vadd.f32 %v1629_v55, %v1957_v24  ;;  %1571 = vst [vmem:[%s1976_s14 + $0x60] sm:$0xff] %v1543_v58   ;;  %v2042_v7 = vadd.f32 %v1645_v56, %v1957_v24 }
 0x11c   : > { %v984_v61 = vadd.f32 %v983_v54, %v953_v52  ;;  %v886_v62 = vadd.f32 %v1957_v24, %v689_v57  ;;  %v916_v63 = vadd.f32 %v915_v53, %v885_v32  ;;  %v1630_v2 = vpop.f32.mrb[14].mxu0  ;;  %v1646_v3 = vpop.f32.mrb[14].mxu1  ;;  %v902_v17 = vadd.f32 %v1957_v24, %v753_v59 }
 0x11d   : > { %v889_v5 = vadd.f32 %v1630_v2, %v1957_v24  ;;  %v692_v6 = vpop.f32.mrb[15].mxu0  ;;  %v2045_v9 = vadd.f32 %v1646_v3, %v1957_v24  ;;  %v756_v10 = vpop.f32.mrb[15].mxu1  ;;  %v957_v25 = vmul.f32 %v888_v4, %v888_v4  ;;  %v964_v54 = vmul.f32 %v2007_v14, %v2007_v14 }
 0x11e   : > { %v917_v11 = vadd.f32 %v916_v63, %v886_v62  ;;  %v955_v12 = vmul.f32 %v886_v62, %v886_v62  ;;  %v985_v13 = vadd.f32 %v984_v61, %v954_v60  ;;  %v887_v15 = vadd.f32 %v1957_v24, %v692_v6 }
 0x11f   : > { %v1518_v16 = vpack.c.bf16 %v889_v5, %v888_v4  ;;  %v1558_v22 = vpack.c.bf16 %v2045_v9, %v2042_v7  ;;  %v903_v23 = vadd.f32 %v1957_v24, %v756_v10  ;;  %v958_v30 = vmul.f32 %v889_v5, %v889_v5 }
 0x120   : > { %v986_v18 = vadd.f32 %v985_v13, %v955_v12  ;;  %v918_v19 = vadd.f32 %v917_v11, %v887_v15  ;;  %v956_v20 = vmul.f32 %v887_v15, %v887_v15  ;;  %v1513_v21 = vpack.c.bf16 %v887_v15, %v886_v62 }
 0x121   : > { %1566 = vst [vmem:[%s1976_s14 + $0x38] sm:$0xff] %v1518_v16   ;;  %1574 = vst [vmem:[%s1976_s14 + $0x78] sm:$0xff] %v1558_v22   ;;  %v1553_v29 = vpack.c.bf16 %v903_v23, %v902_v17  ;;  %v960_v24 = vmul.f32 %v1980_v40, %v1980_v40  ;;  %v968_v62 = vmul.f32 %v2031_v51, %v2031_v51 }
 0x122   : > { %v919_v26 = vadd.f32 %v918_v19, %v888_v4  ;;  %v987_v27 = vadd.f32 %v986_v18, %v956_v20  ;;  %1565 = vst [vmem:[%s1976_s14 + $0x30] sm:$0xff] %v1513_v21   ;;  %v972_v12 = vmul.f32 %v903_v23, %v903_v23  ;;  %v974_v15 = vmul.f32 %v2045_v9, %v2045_v9 }
 0x123   : > { %1573 = vst [vmem:[%s1976_s14 + $0x70] sm:$0xff] %v1553_v29  }
 0x124   : > { %v988_v31 = vadd.f32 %v987_v27, %v957_v25  ;;  %v920_v32 = vadd.f32 %v919_v26, %v889_v5 }
 0x126   : > { %v921_v38 = vadd.f32 %v920_v32, %v1966_v36  ;;  %v989_v39 = vadd.f32 %v988_v31, %v958_v30  ;;  %v963_v36 = vmul.f32 %v2001_v8, %v2001_v8 }
 0x128   : > { %v990_v41 = vadd.f32 %v989_v39, %v959_v33  ;;  %v922_v42 = vadd.f32 %v921_v38, %v1980_v40 }
 0x12a   : > { %v923_v44 = vadd.f32 %v922_v42, %v1960_v28  ;;  %v991_v46 = vadd.f32 %v990_v41, %v960_v24  ;;  %v965_v28 = vmul.f32 %v1994_v0, %v1994_v0 }
 0x12c   : > { %v992_v48 = vadd.f32 %v991_v46, %v961_v43  ;;  %v924_v49 = vadd.f32 %v923_v44, %v1969_v37  ;;  %v966_v37 = vmul.f32 %v1997_v1, %v1997_v1 }
 0x12e   : > { %v925_v50 = vadd.f32 %v924_v49, %v2001_v8  ;;  %v993_v52 = vadd.f32 %v992_v48, %v962_v47  ;;  %v967_v8 = vmul.f32 %v2025_v45, %v2025_v45 }
 0x130   : > { %v994_v53 = vadd.f32 %v993_v52, %v963_v36  ;;  %v926_v40 = vadd.f32 %v925_v50, %v2007_v14 }
 0x132   : > { %v927_v55 = vadd.f32 %v926_v40, %v1994_v0  ;;  %v995_v56 = vadd.f32 %v994_v53, %v964_v54  ;;  %v969_v0 = vmul.f32 %v2018_v34, %v2018_v34 }
 0x134   : > { %v996_v57 = vadd.f32 %v995_v56, %v965_v28  ;;  %v928_v58 = vadd.f32 %v927_v55, %v1997_v1  ;;  %v970_v1 = vmul.f32 %v2021_v35, %v2021_v35 }
 0x136   : > { %v929_v59 = vadd.f32 %v928_v58, %v2025_v45  ;;  %v997_v60 = vadd.f32 %v996_v57, %v966_v37  ;;  %v971_v45 = vmul.f32 %v902_v17, %v902_v17 }
 0x138   : > { %v998_v61 = vadd.f32 %v997_v60, %v967_v8  ;;  %v930_v14 = vadd.f32 %v929_v59, %v2031_v51  ;;  %v973_v51 = vmul.f32 %v2042_v7, %v2042_v7 }
 0x13a   : > { %v931_v63 = vadd.f32 %v930_v14, %v2018_v34  ;;  %v999_v2 = vadd.f32 %v998_v61, %v968_v62 }
 0x13c   : > { %v1000_v3 = vadd.f32 %v999_v2, %v969_v0  ;;  %v932_v4 = vadd.f32 %v931_v63, %v2021_v35 }
 0x13e   : > { %v933_v5 = vadd.f32 %v932_v4, %v902_v17  ;;  %v1001_v6 = vadd.f32 %v1000_v3, %v970_v1 }
 0x140   : > { %v1002_v10 = vadd.f32 %v1001_v6, %v971_v45  ;;  %v934_v11 = vadd.f32 %v933_v5, %v903_v23 }
 0x142   : > { %v935_v13 = vadd.f32 %v934_v11, %v2042_v7  ;;  %v1003_v34 = vadd.f32 %v1002_v10, %v972_v12 }
 0x144   : > { %v936_v16 = vadd.f32 %v935_v13, %v2045_v9  ;;  %v1004_v35 = vadd.f32 %v1003_v34, %v973_v51 }
 0x146   : > { %v937_v18 = vrot.slane %v936_v16, 4  ;;  %v1005_v19 = vadd.f32 %v1004_v35, %v974_v15 }
 0x148   : > { %v938_v17 = vadd.f32 %v937_v18, %v936_v16  ;;  %v1006_v20 = vrot.slane %v1005_v19, 4 }
 0x14a   : > { %v939_v21 = vrot.slane %v938_v17, 2  ;;  %v1007_v22 = vadd.f32 %v1006_v20, %v1005_v19 }
 0x14c   : > { %v940_v23 = vadd.f32 %v939_v21, %v938_v17  ;;  %v1008_v25 = vrot.slane %v1007_v22, 2 }
 0x14e   : > { %v941_v26 = vrot.slane %v940_v23, 1  ;;  %v1009_v7 = vadd.f32 %v1008_v25, %v1007_v22 }
 0x150   : > { %v1010_v27 = vrot.slane %v1009_v7, 1  ;;  %v942_v9 = vadd.f32 %v941_v26, %v940_v23 }
 0x152   : > { %v1011_v29 = vadd.f32 %v1010_v27, %v1009_v7 }
 0x154   : > { %v1013_v30 = vsel %vm1012_vm0, %v942_v9, %v1011_v29 }
 0x155   : > { %v1015_v31 = vsel %vm1014_vm1, %v1013_v30, 0.0 }
 0x156   : > { %1016 = vst [vmem:[%s303_s22] sm:$0xff] %v1015_v31 }
 0x157   : > { %1755 = shalt.err (!%p1752_p5)
}
 0x158   : > { %s1756_s11 = scalar_lea.hbm %s2103_s30, 128  ;;  %s1760_s14 = scalar_lea.hbm %s2154_s4, 256 }
 0x159   : > { %p1757_p6 = scmp.ne.s32.totalorder %s2103_s30, %s1756_s11  ;;  %p1761_p10 = scmp.lt.u32.totalorder %s2103_s30, %s2154_s4 }
 0x15a   : > { %p1762_p11 = scmp.lt.u32.totalorder %s1760_s14, %s1756_s11  ;;  %p1764_p13 = scmp.lt.u32.totalorder %s1756_s11, %s2103_s30 }
 0x15b   : > { %p1758_p7 = pnand %p1757_p6, %p1888_p4 }
 0x15c   : > { %p1763_p12 = por %p1762_p11, %p1761_p10 }
 0x15d   : > { %p1759_p9 = pneg %p1758_p7 }
 0x15e   : > { %p1765_p0 = por %p1764_p13, %p1763_p12 }
 0x160   : > { %p1766_p1 = pnand %p1765_p0, %p1759_p9 }
 0x162   : > { %1769 = shalt.err (!%p1766_p1)
}
 0x163   : > { %1663 = dma.vmem_to_hbm [thread:$0]  (%p1888_p4), %s2105_s24, 128, %s2103_s30, %s1190_s6  }
 0x164 PF: > { %p1669_p2 = scmp.ge.s32.totalorder %s1820_s20, 2  ;;  %s1237_s21 = sand.u32 1, %s1800_s15  }
 0x165   : > { %s1238_s22 = scalar_lea.sflag [#allocation4], %s1237_s21 }
 0x166   : > { %p1666_p3 = pnand %p1669_p2, %p1895_p8 }
 0x168   : > { %1795 = dma.done.wait (!%p1666_p3), %s1238_s22, 128  }
 0x169   : > { %1797 = vsyncadd (!%p1666_p3), %s1238_s22, 4294967168  ;;  %s18_s20 = sadd.s32 1, %s1820_s20   ;;  %s2157_s15 = smov %s1804_s16 }
 0x16a   : > { %p15_p5 = scmp.ge.s32.totalorder %s18_s20, 4   ;;  %s2158_s16 = smov %s1808_s17 }
 0x16b   : > { %s2159_s17 = smov %s1901_s28  ;;  %s2160_s18 = smov %s1816_s19 }
 0x16c   : > { %s2161_s19 = smov %s2163_s23  ;;  %17 = sbr.rel (!%p15_p5) target bundleno = 4 (0x4), region = 93 }
 0x173   :  { %1243 = vsyncpa [#allocation4], 1 }
 0x174   :  { %1245 = vsyncpa [#allocation4 + $0x1], 1 }

// kernel: _lambda_.11
= control target key start
LH: loop header
LB: loop body
LE: loop exit
PB: predicated region body
PF: predicated region fallthrough
CT: control target
= control target key end

     0   :  { %s862_s1 = inlined_call_operand.vmem [shape: bf16[1,128,128], index: 1, kind: input, shape index: {}]   ;;  %s863_s0 = inlined_call_operand.vmem [shape: bf16[1,128,128], index: 0, kind: input, shape index: {}]   ;;  %s864_s2 = inlined_call_operand.vmem [shape: f32[1,128], index: 2, kind: input, shape index: {}]   ;;  %s865_s3 = inlined_call_operand.vmem [shape: bf16[1,128,128], index: 3, kind: output, shape index: {0}]   ;;  %s866_s4 = inlined_call_operand.vmem [shape: f32[1,1,8,128], index: 4, kind: output, shape index: {1}]  }
   0x1   :  { %v712_v0 = vld [vmem:[%s862_s1] sm:$0xff]   ;;  %v713_v1 = vld [vmem:[%s862_s1 + $0x8] sm:$0xff]   ;;  %v714_v2 = vld [vmem:[%s862_s1 + $0x10] sm:$0xff]  }
   0x2   :  { %664 = vmatprep.subr.bf16.mxu0 %v712_v0  ;;  %696 = vmatprep.subr.bf16.mxu1 %v712_v0  ;;  %v715_v3 = vld [vmem:[%s862_s1 + $0x18] sm:$0xff]   ;;  %v38_v4 = vld [vmem:[%s863_s0] sm:$0xf]  ;;  %v39_v5 = vld [vmem:[%s863_s0 + $0x4] sm:$0xf] }
   0x3   :  { %665 = vmatpush3.bf16.msra.mxu0 %v712_v0  ;;  %704 = vmatpush3.bf16.msra.mxu1 %v712_v0  ;;  %vm54_vm0 = vcmp.ge.bf16.partialorder %v38_v4, 0  ;;  %vm55_vm1 = vcmp.ge.bf16.partialorder %v39_v5, 0  ;;  %v70_v6 = vmul.bf16 1045249613, %v38_v4  ;;  %v71_v7 = vmul.bf16 1045249613, %v39_v5 }
   0x4   :  { %666 = vmatprep.subr.bf16.mxu0 %v713_v1  ;;  %697 = vmatprep.subr.bf16.mxu1 %v713_v1  ;;  %v716_v10 = vld [vmem:[%s862_s1 + $0x20] sm:$0xff]   ;;  %v40_v12 = vld [vmem:[%s863_s0 + $0x8] sm:$0xf]  ;;  %v718_v19 = vld [vmem:[%s862_s1 + $0x30] sm:$0xff]  }
   0x5   :  { %v86_v8 = vsel %vm54_vm0, %v38_v4, %v70_v6  ;;  %v87_v9 = vsel %vm55_vm1, %v39_v5, %v71_v7  ;;  %v46_v13 = vld [vmem:[%s863_s0 + $0x20] sm:$0xf]  ;;  %v717_v14 = vld [vmem:[%s862_s1 + $0x28] sm:$0xff]   ;;  %v47_v15 = vld [vmem:[%s863_s0 + $0x24] sm:$0xf]  ;;  %vm56_vm4 = vcmp.ge.bf16.partialorder %v40_v12, 0 }
   0x6   :  { %v552_v11 = vcombine.low %v86_v8, %v87_v9  ;;  %vm62_vm2 = vcmp.ge.bf16.partialorder %v46_v13, 0  ;;  %v78_v16 = vmul.bf16 1045249613, %v46_v13  ;;  %vm63_vm3 = vcmp.ge.bf16.partialorder %v47_v15, 0  ;;  %v41_v20 = vld [vmem:[%s863_s0 + $0xc] sm:$0xf] }
   0x7   :  { %667 = vmatpush3.bf16.msra.mxu0 %v713_v1  ;;  %705 = vmatpush3.bf16.msra.mxu1 %v713_v1  ;;  %v79_v17 = vmul.bf16 1045249613, %v47_v15  ;;  %v42_v21 = vld [vmem:[%s863_s0 + $0x10] sm:$0xf]  ;;  %v43_v23 = vld [vmem:[%s863_s0 + $0x14] sm:$0xf] }
   0x8   :  { %668 = vmatprep.subr.bf16.mxu0 %v714_v2  ;;  %698 = vmatprep.subr.bf16.mxu1 %v714_v2  ;;  %v94_v18 = vsel %vm62_vm2, %v46_v13, %v78_v16  ;;  %v48_v25 = vld [vmem:[%s863_s0 + $0x28] sm:$0xf]  ;;  %v49_v26 = vld [vmem:[%s863_s0 + $0x2c] sm:$0xf]  ;;  %v72_v27 = vmul.bf16 1045249613, %v40_v12 }
   0x9   :  { %680 = vmatprep.mubr.bf16.mxu0 %v552_v11  ;;  %v95_v22 = vsel %vm63_vm3, %v47_v15, %v79_v17  ;;  %v50_v28 = vld [vmem:[%s863_s0 + $0x30] sm:$0xf]  ;;  %v51_v29 = vld [vmem:[%s863_s0 + $0x34] sm:$0xf]  ;;  %v719_v30 = vld [vmem:[%s862_s1 + $0x38] sm:$0xff]   ;;  %vm57_vm5 = vcmp.ge.bf16.partialorder %v41_v20, 0 }
   0xa   :  { %v556_v24 = vcombine.low %v94_v18, %v95_v22  ;;  %v73_v31 = vmul.bf16 1045249613, %v41_v20  ;;  %vm58_vm6 = vcmp.ge.bf16.partialorder %v42_v21, 0  ;;  %v74_v32 = vmul.bf16 1045249613, %v42_v21 }
   0xb   :  { %669 = vmatpush3.bf16.msra.mxu0 %v714_v2  ;;  %706 = vmatpush3.bf16.msra.mxu1 %v714_v2  ;;  %v75_v33 = vmul.bf16 1045249613, %v43_v23  ;;  %v80_v34 = vmul.bf16 1045249613, %v48_v25  ;;  %v81_v35 = vmul.bf16 1045249613, %v49_v26  ;;  %v88_v38 = vsel %vm56_vm4, %v40_v12, %v72_v27 }
   0xc   :  { %670 = vmatprep.subr.bf16.mxu0 %v715_v3  ;;  %699 = vmatprep.subr.bf16.mxu1 %v715_v3  ;;  %vm64_vm7 = vcmp.ge.bf16.partialorder %v48_v25, 0  ;;  %vm65_vm8 = vcmp.ge.bf16.partialorder %v49_v26, 0  ;;  %v82_v36 = vmul.bf16 1045249613, %v50_v28  ;;  %v83_v37 = vmul.bf16 1045249613, %v51_v29 }
   0xd   :  { %688 = vmatprep.mubr.bf16.mxu1 %v556_v24  ;;  %vm59_vm9 = vcmp.ge.bf16.partialorder %v43_v23, 0  ;;  %vm66_vm10 = vcmp.ge.bf16.partialorder %v50_v28, 0  ;;  %vm67_vm11 = vcmp.ge.bf16.partialorder %v51_v29, 0  ;;  %v89_v39 = vsel %vm57_vm5, %v41_v20, %v73_v31  ;;  %v44_v41 = vld [vmem:[%s863_s0 + $0x18] sm:$0xf] }
   0xe   :  { %v90_v40 = vsel %vm58_vm6, %v42_v21, %v74_v32  ;;  %v45_v42 = vld [vmem:[%s863_s0 + $0x1c] sm:$0xf]  ;;  %v96_v43 = vsel %vm64_vm7, %v48_v25, %v80_v34  ;;  %v97_v44 = vsel %vm65_vm8, %v49_v26, %v81_v35  ;;  %v91_v45 = vsel %vm59_vm9, %v43_v23, %v75_v33  ;;  %v52_v48 = vld [vmem:[%s863_s0 + $0x38] sm:$0xf]  ;;  %v568_v0 = vld [vmem:[%s864_s2] ss:$0 sm:$0xff] }
   0xf   :  { %671 = vmatpush3.bf16.msra.mxu0 %v715_v3  ;;  %707 = vmatpush3.bf16.msra.mxu1 %v715_v3  ;;  %v98_v46 = vsel %vm66_vm10, %v50_v28, %v82_v36  ;;  %v99_v47 = vsel %vm67_vm11, %v51_v29, %v83_v37  ;;  %v53_v49 = vld [vmem:[%s863_s0 + $0x3c] sm:$0xf]  ;;  %v553_v50 = vcombine.low %v88_v38, %v89_v39  ;;  %vm60_vm12 = vcmp.ge.bf16.partialorder %v44_v41, 0 }
  0x10   :  { %672 = vmatprep.subr.bf16.mxu0 %v716_v10  ;;  %700 = vmatprep.subr.bf16.mxu1 %v716_v10  ;;  %v76_v51 = vmul.bf16 1045249613, %v44_v41  ;;  %v77_v52 = vmul.bf16 1045249613, %v45_v42  ;;  %v557_v53 = vcombine.low %v96_v43, %v97_v44  ;;  %v554_v54 = vcombine.low %v90_v40, %v91_v45 }
  0x11   :  { %v558_v55 = vcombine.low %v98_v46, %v99_v47  ;;  %v84_v56 = vmul.bf16 1045249613, %v52_v48  ;;  %v85_v57 = vmul.bf16 1045249613, %v53_v49  ;;  %vm61_vm13 = vcmp.ge.bf16.partialorder %v45_v42, 0 }
  0x12   :  { %vm68_vm14 = vcmp.ge.bf16.partialorder %v52_v48, 0  ;;  %vm69_vm15 = vcmp.ge.bf16.partialorder %v53_v49, 0  ;;  %v92_v58 = vsel %vm60_vm12, %v44_v41, %v76_v51  ;;  %v93_v59 = vsel %vm61_vm13, %v45_v42, %v77_v52 }
  0x13   :  { %673 = vmatpush3.bf16.msra.mxu0 %v716_v10  ;;  %708 = vmatpush3.bf16.msra.mxu1 %v716_v10  ;;  %v100_v60 = vsel %vm68_vm14, %v52_v48, %v84_v56  ;;  %v101_v61 = vsel %vm69_vm15, %v53_v49, %v85_v57  ;;  %v555_v62 = vcombine.low %v92_v58, %v93_v59  ;;  %vm459_vm0 = vcmask 1040384  }
  0x14   :  { %674 = vmatprep.subr.bf16.mxu0 %v717_v14  ;;  %701 = vmatprep.subr.bf16.mxu1 %v717_v14  ;;  %v559_v63 = vcombine.low %v100_v60, %v101_v61  ;;  %vm461_vm1 = vcmask 1041408  }
  0x17   :  { %675 = vmatpush3.bf16.msra.mxu0 %v717_v14  ;;  %709 = vmatpush3.bf16.msra.mxu1 %v717_v14 }
  0x18   :  { %676 = vmatprep.subr.bf16.mxu0 %v718_v19  ;;  %702 = vmatprep.subr.bf16.mxu1 %v718_v19 }
  0x1b   :  { %677 = vmatpush3.bf16.msra.mxu0 %v718_v19  ;;  %710 = vmatpush3.bf16.msra.mxu1 %v718_v19 }
  0x1c   :  { %678 = vmatprep.subr.bf16.mxu0 %v719_v30  ;;  %703 = vmatprep.subr.bf16.mxu1 %v719_v30 }
  0x1f   :  { %679 = vmatpush3.bf16.msra.mxu0 %v719_v30  ;;  %711 = vmatpush3.bf16.msra.mxu1 %v719_v30 }
  0x22   :  { %681 = vmatmul.mubr.bf16.vlgmr.msra.gmra.mrb[0].mxu0 %v553_v50  ;;  %689 = vmatmul.mubr.bf16.vlgmr.msra.gmra.mrb[0].mxu1 %v557_v53 }
  0x23   :  { %684 = vmatprep.mubr.bf16.mxu0 %v554_v54  ;;  %692 = vmatprep.mubr.bf16.mxu1 %v558_v55 }
  0x2a   :  { %685 = vmatmul.mubr.bf16.gmra.mrb[4].mxu0 %v555_v62  ;;  %693 = vmatmul.mubr.bf16.gmra.mrb[4].mxu1 %v559_v63 }
  0xf5   :  { %v682_v1 = vpop.f32.mrb[0].mxu0  ;;  %v690_v2 = vpop.f32.mrb[0].mxu1 }
  0xf6   :  { %v264_v3 = vpop.f32.mrb[1].mxu0  ;;  %v823_v4 = vadd.f32 %v690_v2, %v568_v0  ;;  %v296_v5 = vpop.f32.mrb[1].mxu1  ;;  %v387_v9 = vadd.f32 %v682_v1, %v568_v0 }
  0xf7   :  { %v385_v6 = vadd.f32 %v568_v0, %v264_v3  ;;  %v683_v7 = vpop.f32.mrb[2].mxu0  ;;  %v691_v8 = vpop.f32.mrb[2].mxu1  ;;  %v393_v12 = vadd.f32 %v568_v0, %v296_v5 }
  0xf8   :  { %v388_v10 = vadd.f32 %v683_v7, %v568_v0  ;;  %v267_v11 = vpop.f32.mrb[3].mxu0  ;;  %v825_v13 = vadd.f32 %v691_v8, %v568_v0  ;;  %v299_v14 = vpop.f32.mrb[3].mxu1  ;;  %v424_v24 = vmul.f32 %v387_v9, %v387_v9  ;;  %v432_v5 = vmul.f32 %v823_v4, %v823_v4 }
  0xf9   :  { %v386_v15 = vadd.f32 %v568_v0, %v267_v11  ;;  %v394_v16 = vadd.f32 %v568_v0, %v299_v14  ;;  %v422_v19 = vmul.f32 %v385_v6, %v385_v6  ;;  %v430_v62 = vmul.f32 %v393_v12, %v393_v12 }
  0xfa   :  { %v609_v17 = vpack.c.bf16 %v388_v10, %v387_v9  ;;  %v629_v18 = vpack.c.bf16 %v825_v13, %v823_v4  ;;  %v425_v31 = vmul.f32 %v388_v10, %v388_v10  ;;  %v433_v8 = vmul.f32 %v825_v13, %v825_v13 }
  0xfb   :  { %v401_v20 = vadd.f32 %v386_v15, %v385_v6  ;;  %v423_v21 = vmul.f32 %v386_v15, %v386_v15  ;;  %v604_v22 = vpack.c.bf16 %v386_v15, %v385_v6  ;;  %v624_v23 = vpack.c.bf16 %v394_v16, %v393_v12 }
  0xfc   :  { %641 = vst [vmem:[%s865_s3 + $0x8] sm:$0xff] %v609_v17   ;;  %645 = vst [vmem:[%s865_s3 + $0x28] sm:$0xff] %v629_v18   ;;  %v431_v3 = vmul.f32 %v394_v16, %v394_v16 }
  0xfd   :  { %v402_v25 = vadd.f32 %v401_v20, %v387_v9  ;;  %v438_v26 = vadd.f32 %v423_v21, %v422_v19  ;;  %605 = vst [vmem:[%s865_s3] sm:$0xff] %v604_v22   ;;  %v686_v27 = vpop.f32.mrb[4].mxu0  ;;  %v694_v28 = vpop.f32.mrb[4].mxu1  ;;  %644 = vst [vmem:[%s865_s3 + $0x20] sm:$0xff] %v624_v23  }
  0xfe   :  { %v280_v29 = vpop.f32.mrb[5].mxu0  ;;  %v312_v30 = vpop.f32.mrb[5].mxu1  ;;  %v391_v37 = vadd.f32 %v686_v27, %v568_v0  ;;  %v399_v40 = vadd.f32 %v694_v28, %v568_v0 }
  0xff   :  { %v439_v32 = vadd.f32 %v438_v26, %v424_v24  ;;  %v389_v33 = vadd.f32 %v568_v0, %v280_v29  ;;  %v403_v34 = vadd.f32 %v402_v25, %v388_v10  ;;  %v687_v35 = vpop.f32.mrb[6].mxu0  ;;  %v695_v36 = vpop.f32.mrb[6].mxu1  ;;  %v397_v48 = vadd.f32 %v568_v0, %v312_v30 }
 0x100   :  { %v392_v38 = vadd.f32 %v687_v35, %v568_v0  ;;  %v283_v39 = vpop.f32.mrb[7].mxu0  ;;  %v400_v41 = vadd.f32 %v695_v36, %v568_v0  ;;  %v315_v42 = vpop.f32.mrb[7].mxu1  ;;  %v428_v55 = vmul.f32 %v391_v37, %v391_v37  ;;  %v436_v19 = vmul.f32 %v399_v40, %v399_v40 }
 0x101   :  { %v404_v43 = vadd.f32 %v403_v34, %v389_v33  ;;  %v426_v44 = vmul.f32 %v389_v33, %v389_v33  ;;  %v440_v45 = vadd.f32 %v439_v32, %v425_v31  ;;  %v390_v46 = vadd.f32 %v568_v0, %v283_v39 }
 0x102   :  { %v619_v47 = vpack.c.bf16 %v392_v38, %v391_v37  ;;  %v639_v53 = vpack.c.bf16 %v400_v41, %v399_v40  ;;  %v398_v54 = vadd.f32 %v568_v0, %v315_v42  ;;  %v429_v59 = vmul.f32 %v392_v38, %v392_v38 }
 0x103   :  { %v441_v49 = vadd.f32 %v440_v45, %v426_v44  ;;  %v405_v50 = vadd.f32 %v404_v43, %v390_v46  ;;  %v427_v51 = vmul.f32 %v390_v46, %v390_v46  ;;  %v614_v52 = vpack.c.bf16 %v390_v46, %v389_v33 }
 0x104   :  { %643 = vst [vmem:[%s865_s3 + $0x18] sm:$0xff] %v619_v47   ;;  %647 = vst [vmem:[%s865_s3 + $0x38] sm:$0xff] %v639_v53   ;;  %v634_v58 = vpack.c.bf16 %v398_v54, %v397_v48  ;;  %v434_v11 = vmul.f32 %v397_v48, %v397_v48  ;;  %v435_v18 = vmul.f32 %v398_v54, %v398_v54 }
 0x105   :  { %v406_v56 = vadd.f32 %v405_v50, %v391_v37  ;;  %v442_v57 = vadd.f32 %v441_v49, %v427_v51  ;;  %642 = vst [vmem:[%s865_s3 + $0x10] sm:$0xff] %v614_v52   ;;  %v437_v21 = vmul.f32 %v400_v41, %v400_v41 }
 0x106   :  { %646 = vst [vmem:[%s865_s3 + $0x30] sm:$0xff] %v634_v58  }
 0x107   :  { %v443_v60 = vadd.f32 %v442_v57, %v428_v55  ;;  %v407_v61 = vadd.f32 %v406_v56, %v392_v38 }
 0x109   :  { %v408_v63 = vadd.f32 %v407_v61, %v393_v12  ;;  %v444_v0 = vadd.f32 %v443_v60, %v429_v59 }
 0x10b   :  { %v445_v1 = vadd.f32 %v444_v0, %v430_v62  ;;  %v409_v2 = vadd.f32 %v408_v63, %v394_v16 }
 0x10d   :  { %v410_v6 = vadd.f32 %v409_v2, %v823_v4  ;;  %v446_v7 = vadd.f32 %v445_v1, %v431_v3 }
 0x10f   :  { %v447_v9 = vadd.f32 %v446_v7, %v432_v5  ;;  %v411_v10 = vadd.f32 %v410_v6, %v825_v13 }
 0x111   :  { %v412_v14 = vadd.f32 %v411_v10, %v397_v48  ;;  %v448_v15 = vadd.f32 %v447_v9, %v433_v8 }
 0x113   :  { %v449_v12 = vadd.f32 %v448_v15, %v434_v11  ;;  %v413_v17 = vadd.f32 %v412_v14, %v398_v54 }
 0x115   :  { %v414_v16 = vadd.f32 %v413_v17, %v399_v40  ;;  %v450_v20 = vadd.f32 %v449_v12, %v435_v18 }
 0x117   :  { %v415_v22 = vadd.f32 %v414_v16, %v400_v41  ;;  %v451_v23 = vadd.f32 %v450_v20, %v436_v19 }
 0x119   :  { %v416_v4 = vrot.slane %v415_v22, 4  ;;  %v452_v24 = vadd.f32 %v451_v23, %v437_v21 }
 0x11b   :  { %v417_v25 = vadd.f32 %v416_v4, %v415_v22  ;;  %v453_v26 = vrot.slane %v452_v24, 4 }
 0x11d   :  { %v418_v27 = vrot.slane %v417_v25, 2  ;;  %v454_v28 = vadd.f32 %v453_v26, %v452_v24 }
 0x11f   :  { %v419_v29 = vadd.f32 %v418_v27, %v417_v25  ;;  %v455_v13 = vrot.slane %v454_v28, 2 }
 0x121   :  { %v420_v30 = vrot.slane %v419_v29, 1  ;;  %v456_v31 = vadd.f32 %v455_v13, %v454_v28 }
 0x123   :  { %v457_v32 = vrot.slane %v456_v31, 1  ;;  %v421_v33 = vadd.f32 %v420_v30, %v419_v29 }
 0x125   :  { %v458_v34 = vadd.f32 %v457_v32, %v456_v31 }
 0x127   :  { %v460_v35 = vsel %vm459_vm0, %v421_v33, %v458_v34 }
 0x128   :  { %v462_v36 = vsel %vm461_vm1, %v460_v35, 0.0 }
 0x129   :  { %463 = vst [vmem:[%s866_s4] sm:$0xff] %v462_v36 }

// kernel: _lambda_.12
= control target key start
LH: loop header
LB: loop body
LE: loop exit
PB: predicated region body
PF: predicated region fallthrough
CT: control target
= control target key end

     0   :  { %vm291_vm4 = vcmask 1040384   ;;  %vm293_vm5 = vcmask 1041408   ;;  %s521_s1 = inlined_call_operand.vmem [shape: bf16[1,256,128], index: 1, kind: input, shape index: {}]   ;;  %s522_s0 = inlined_call_operand.vmem [shape: bf16[1,32,256], index: 0, kind: input, shape index: {}]   ;;  %s523_s2 = inlined_call_operand.vmem [shape: f32[1,128], index: 2, kind: input, shape index: {}]   ;;  %s524_s3 = inlined_call_operand.vmem [shape: bf16[1,32,128], index: 3, kind: output, shape index: {0}]   ;;  %s525_s4 = inlined_call_operand.vmem [shape: f32[1,1,8,128], index: 4, kind: output, shape index: {1}]  }
   0x1   :  { %v408_v0 = vld [vmem:[%s521_s1 + $0x40] sm:$0xff]   ;;  %v410_v2 = vld [vmem:[%s521_s1 + $0x48] sm:$0xff]   ;;  %v412_v4 = vld [vmem:[%s521_s1 + $0x50] sm:$0xff]  }
   0x2   :  { %v409_v1 = vld [vmem:[%s521_s1] sm:$0xff]   ;;  %364 = vmatprep.subr.bf16.mxu0 %v408_v0  ;;  %392 = vmatprep.subr.bf16.mxu1 %v408_v0  ;;  %v411_v3 = vld [vmem:[%s521_s1 + $0x8] sm:$0xff]   ;;  %v413_v5 = vld [vmem:[%s521_s1 + $0x10] sm:$0xff]  }
   0x3   :  { %365 = vmatpush3.bf16.msra.mxu0 %v409_v1  ;;  %400 = vmatpush3.bf16.msra.mxu1 %v409_v1  ;;  %v414_v6 = vld [vmem:[%s521_s1 + $0x58] sm:$0xff]   ;;  %v416_v8 = vld [vmem:[%s521_s1 + $0x60] sm:$0xff]   ;;  %v418_v10 = vld [vmem:[%s521_s1 + $0x68] sm:$0xff]  }
   0x4   :  { %366 = vmatprep.subr.bf16.mxu0 %v410_v2  ;;  %393 = vmatprep.subr.bf16.mxu1 %v410_v2  ;;  %v415_v7 = vld [vmem:[%s521_s1 + $0x18] sm:$0xff]   ;;  %v417_v9 = vld [vmem:[%s521_s1 + $0x20] sm:$0xff]   ;;  %v27_v12 = vld [vmem:[%s522_s0 + $0x8] sm:$0xff] }
   0x5   :  { %v26_v11 = vld [vmem:[%s522_s0] sm:$0xff]  ;;  %v28_v13 = vld [vmem:[%s522_s0 + $0x10] sm:$0xff]  ;;  %vm31_vm1 = vcmp.ge.bf16.partialorder %v27_v12, 0  ;;  %v35_v15 = vmul.bf16 1045249613, %v27_v12  ;;  %v29_v16 = vld [vmem:[%s522_s0 + $0x18] sm:$0xff] }
   0x6   :  { %vm30_vm0 = vcmp.ge.bf16.partialorder %v26_v11, 0  ;;  %v34_v14 = vmul.bf16 1045249613, %v26_v11  ;;  %vm32_vm2 = vcmp.ge.bf16.partialorder %v28_v13, 0  ;;  %v36_v17 = vmul.bf16 1045249613, %v28_v13 }
   0x7   :  { %367 = vmatpush3.bf16.msra.mxu0 %v411_v3  ;;  %401 = vmatpush3.bf16.msra.mxu1 %v411_v3  ;;  %v419_v18 = vld [vmem:[%s521_s1 + $0x28] sm:$0xff]   ;;  %v39_v20 = vsel %vm31_vm1, %v27_v12, %v35_v15  ;;  %vm33_vm3 = vcmp.ge.bf16.partialorder %v29_v16, 0  ;;  %v37_v21 = vmul.bf16 1045249613, %v29_v16  ;;  %v420_v22 = vld [vmem:[%s521_s1 + $0x70] sm:$0xff]   ;;  %v422_v28 = vld [vmem:[%s521_s1 + $0x78] sm:$0xff]  }
   0x8   :  { %368 = vmatprep.subr.bf16.mxu0 %v412_v4  ;;  %394 = vmatprep.subr.bf16.mxu1 %v412_v4  ;;  %v38_v19 = vsel %vm30_vm0, %v26_v11, %v34_v14  ;;  %v40_v24 = vsel %vm32_vm2, %v28_v13, %v36_v17  ;;  %v421_v27 = vld [vmem:[%s521_s1 + $0x30] sm:$0xff]   ;;  %v423_v29 = vld [vmem:[%s521_s1 + $0x38] sm:$0xff]   ;;  %v344_v35 = vld [vmem:[%s523_s2] ss:$0 sm:$0xff] }
   0x9   :  { %v325_v23 = vcombine.high %v38_v19, %v39_v20  ;;  %v41_v25 = vsel %vm33_vm3, %v29_v16, %v37_v21  ;;  %v324_v30 = vcombine.low %v38_v19, %v39_v20 }
   0xa   :  { %v327_v26 = vcombine.high %v40_v24, %v41_v25  ;;  %v326_v31 = vcombine.low %v40_v24, %v41_v25 }
   0xb   :  { %369 = vmatpush3.bf16.msra.mxu0 %v413_v5  ;;  %402 = vmatpush3.bf16.msra.mxu1 %v413_v5 }
   0xc   :  { %370 = vmatprep.subr.bf16.mxu0 %v414_v6  ;;  %395 = vmatprep.subr.bf16.mxu1 %v414_v6 }
   0xd   :  { %226 = vmatprep.mubr.bf16.mxu0 %v325_v23  ;;  %234 = vmatprep.mubr.bf16.mxu1 %v327_v26 }
   0xf   :  { %371 = vmatpush3.bf16.msra.mxu0 %v415_v7  ;;  %403 = vmatpush3.bf16.msra.mxu1 %v415_v7 }
  0x10   :  { %372 = vmatprep.subr.bf16.mxu0 %v416_v8  ;;  %396 = vmatprep.subr.bf16.mxu1 %v416_v8 }
  0x13   :  { %373 = vmatpush3.bf16.msra.mxu0 %v417_v9  ;;  %404 = vmatpush3.bf16.msra.mxu1 %v417_v9 }
  0x14   :  { %374 = vmatprep.subr.bf16.mxu0 %v418_v10  ;;  %397 = vmatprep.subr.bf16.mxu1 %v418_v10 }
  0x17   :  { %375 = vmatpush3.bf16.msra.mxu0 %v419_v18  ;;  %405 = vmatpush3.bf16.msra.mxu1 %v419_v18 }
  0x18   :  { %376 = vmatprep.subr.bf16.mxu0 %v420_v22  ;;  %398 = vmatprep.subr.bf16.mxu1 %v420_v22 }
  0x1b   :  { %377 = vmatpush3.bf16.msra.mxu0 %v421_v27  ;;  %406 = vmatpush3.bf16.msra.mxu1 %v421_v27 }
  0x1c   :  { %378 = vmatprep.subr.bf16.mxu0 %v422_v28  ;;  %399 = vmatprep.subr.bf16.mxu1 %v422_v28 }
  0x1f   :  { %379 = vmatpush3.bf16.msra.mxu0 %v423_v29  ;;  %407 = vmatpush3.bf16.msra.mxu1 %v423_v29 }
  0x22   :  { %227 = vmatmul.mubr.bf16.vlgmr.msra.gmra.mrb[0].mxu0 %v324_v30  ;;  %235 = vmatmul.mubr.bf16.vlgmr.msra.gmra.mrb[0].mxu1 %v326_v31 }
  0xf5   :  { %v380_v32 = vpop.f32.mrb[0].mxu0  ;;  %v386_v33 = vpop.f32.mrb[0].mxu1 }
  0xf6   :  { %v381_v34 = vpop.f32.mrb[1].mxu0  ;;  %v387_v36 = vpop.f32.mrb[1].mxu1 }
  0xf7   :  { %v382_v37 = vadd.f32 %v381_v34, %v380_v32  ;;  %v383_v38 = vpop.f32.mrb[2].mxu0  ;;  %v388_v39 = vadd.f32 %v387_v36, %v386_v33  ;;  %v389_v40 = vpop.f32.mrb[2].mxu1 }
  0xf8   :  { %v384_v41 = vpop.f32.mrb[3].mxu0  ;;  %v390_v42 = vpop.f32.mrb[3].mxu1 }
  0xf9   :  { %v265_v43 = vadd.f32 %v382_v37, %v344_v35  ;;  %v267_v44 = vadd.f32 %v388_v39, %v344_v35  ;;  %v385_v45 = vadd.f32 %v384_v41, %v383_v38  ;;  %v391_v46 = vadd.f32 %v390_v42, %v389_v40 }
  0xfb   :  { %v266_v47 = vadd.f32 %v385_v45, %v344_v35  ;;  %v268_v48 = vadd.f32 %v391_v46, %v344_v35  ;;  %v278_v49 = vmul.f32 %v265_v43, %v265_v43  ;;  %v280_v50 = vmul.f32 %v267_v44, %v267_v44 }
  0xfd   :  { %v269_v51 = vadd.f32 %v266_v47, %v265_v43  ;;  %v279_v52 = vmul.f32 %v266_v47, %v266_v47  ;;  %v356_v53 = vpack.c.bf16 %v266_v47, %v265_v43  ;;  %v361_v54 = vpack.c.bf16 %v268_v48, %v267_v44 }
  0xfe   :  { %v281_v58 = vmul.f32 %v268_v48, %v268_v48 }
  0xff   :  { %v282_v55 = vadd.f32 %v279_v52, %v278_v49  ;;  %357 = vst [vmem:[%s524_s3] sm:$0xff] %v356_v53   ;;  %v270_v56 = vadd.f32 %v269_v51, %v267_v44  ;;  %363 = vst [vmem:[%s524_s3 + $0x8] sm:$0xff] %v361_v54  }
 0x101   :  { %v271_v57 = vadd.f32 %v270_v56, %v268_v48  ;;  %v283_v59 = vadd.f32 %v282_v55, %v280_v50 }
 0x103   :  { %v272_v60 = vrot.slane %v271_v57, 4  ;;  %v284_v61 = vadd.f32 %v283_v59, %v281_v58 }
 0x105   :  { %v273_v62 = vadd.f32 %v272_v60, %v271_v57  ;;  %v285_v63 = vrot.slane %v284_v61, 4 }
 0x107   :  { %v274_v0 = vrot.slane %v273_v62, 2  ;;  %v286_v1 = vadd.f32 %v285_v63, %v284_v61 }
 0x109   :  { %v275_v2 = vadd.f32 %v274_v0, %v273_v62  ;;  %v287_v3 = vrot.slane %v286_v1, 2 }
 0x10b   :  { %v276_v4 = vrot.slane %v275_v2, 1  ;;  %v288_v5 = vadd.f32 %v287_v3, %v286_v1 }
 0x10d   :  { %v289_v6 = vrot.slane %v288_v5, 1  ;;  %v277_v7 = vadd.f32 %v276_v4, %v275_v2 }
 0x10f   :  { %v290_v8 = vadd.f32 %v289_v6, %v288_v5 }
 0x111   :  { %v292_v9 = vsel %vm291_vm4, %v277_v7, %v290_v8 }
 0x112   :  { %v294_v10 = vsel %vm293_vm5, %v292_v9, 0.0 }
 0x113   :  { %295 = vst [vmem:[%s525_s4] sm:$0xff] %v294_v10 }

// kernel: _lambda_.13
= control target key start
LH: loop header
LB: loop body
LE: loop exit
PB: predicated region body
PF: predicated region fallthrough
CT: control target
= control target key end

     0   :  { %vm409_vm2 = vcmask 1040384   ;;  %vm411_vm3 = vcmask 1041408   ;;  %s673_s1 = inlined_call_operand.vmem [shape: bf16[1,512,128], index: 1, kind: input, shape index: {}]   ;;  %s674_s0 = inlined_call_operand.vmem [shape: bf16[1,8,512], index: 0, kind: input, shape index: {}]   ;;  %s675_s2 = inlined_call_operand.vmem [shape: f32[1,128], index: 2, kind: input, shape index: {}]   ;;  %s676_s3 = inlined_call_operand.vmem [shape: bf16[1,8,128], index: 3, kind: output, shape index: {0}]   ;;  %s677_s4 = inlined_call_operand.vmem [shape: f32[1,1,8,128], index: 4, kind: output, shape index: {1}]  }
   0x1   :  { %v505_v0 = vld [vmem:[%s673_s1 + $0x40] sm:$0xff]   ;;  %v509_v4 = vld [vmem:[%s673_s1 + $0x48] sm:$0xff]   ;;  %v513_v8 = vld [vmem:[%s673_s1 + $0x50] sm:$0xff]  }
   0x2   :  { %v506_v1 = vld [vmem:[%s673_s1 + $0xc0] sm:$0xff]   ;;  %461 = vmatprep.subr.bf16.mxu0 %v505_v0  ;;  %v510_v5 = vld [vmem:[%s673_s1 + $0xc8] sm:$0xff]   ;;  %v514_v9 = vld [vmem:[%s673_s1 + $0xd0] sm:$0xff]  }
   0x3   :  { %v507_v2 = vld [vmem:[%s673_s1] sm:$0xff]   ;;  %483 = vmatprep.subr.bf16.mxu1 %v506_v1  ;;  %v511_v6 = vld [vmem:[%s673_s1 + $0x8] sm:$0xff]   ;;  %v515_v10 = vld [vmem:[%s673_s1 + $0x10] sm:$0xff]  }
   0x4   :  { %v508_v3 = vld [vmem:[%s673_s1 + $0x80] sm:$0xff]   ;;  %462 = vmatpush3.bf16.msra.mxu0 %v507_v2  ;;  %v512_v7 = vld [vmem:[%s673_s1 + $0x88] sm:$0xff]   ;;  %v516_v11 = vld [vmem:[%s673_s1 + $0x90] sm:$0xff]  }
   0x5   :  { %484 = vmatpush3.bf16.msra.mxu1 %v508_v3  ;;  %463 = vmatprep.subr.bf16.mxu0 %v509_v4  ;;  %v517_v12 = vld [vmem:[%s673_s1 + $0x58] sm:$0xff]   ;;  %v521_v16 = vld [vmem:[%s673_s1 + $0x60] sm:$0xff]   ;;  %v525_v20 = vld [vmem:[%s673_s1 + $0x68] sm:$0xff]  }
   0x6   :  { %485 = vmatprep.subr.bf16.mxu1 %v510_v5  ;;  %v518_v13 = vld [vmem:[%s673_s1 + $0xd8] sm:$0xff]   ;;  %v522_v17 = vld [vmem:[%s673_s1 + $0xe0] sm:$0xff]   ;;  %v526_v21 = vld [vmem:[%s673_s1 + $0xe8] sm:$0xff]  }
   0x7   :  { %v519_v14 = vld [vmem:[%s673_s1 + $0x18] sm:$0xff]   ;;  %v523_v18 = vld [vmem:[%s673_s1 + $0x20] sm:$0xff]   ;;  %v527_v22 = vld [vmem:[%s673_s1 + $0x28] sm:$0xff]  }
   0x8   :  { %464 = vmatpush3.bf16.msra.mxu0 %v511_v6  ;;  %v520_v15 = vld [vmem:[%s673_s1 + $0x98] sm:$0xff]   ;;  %v524_v19 = vld [vmem:[%s673_s1 + $0xa0] sm:$0xff]   ;;  %v528_v23 = vld [vmem:[%s673_s1 + $0xa8] sm:$0xff]  }
   0x9   :  { %486 = vmatpush3.bf16.msra.mxu1 %v512_v7  ;;  %465 = vmatprep.subr.bf16.mxu0 %v513_v8  ;;  %v529_v24 = vld [vmem:[%s673_s1 + $0x70] sm:$0xff]   ;;  %v533_v28 = vld [vmem:[%s673_s1 + $0x78] sm:$0xff]   ;;  %v23_v32 = vld [vmem:[%s674_s0] sm:$0xff] }
   0xa   :  { %487 = vmatprep.subr.bf16.mxu1 %v514_v9  ;;  %v530_v25 = vld [vmem:[%s673_s1 + $0xf0] sm:$0xff]   ;;  %v534_v29 = vld [vmem:[%s673_s1 + $0xf8] sm:$0xff]   ;;  %v24_v33 = vld [vmem:[%s674_s0 + $0x8] sm:$0xff]  ;;  %vm25_vm0 = vcmp.ge.bf16.partialorder %v23_v32, 0  ;;  %v27_v34 = vmul.bf16 1045249613, %v23_v32 }
   0xb   :  { %v531_v26 = vld [vmem:[%s673_s1 + $0x30] sm:$0xff]   ;;  %v535_v30 = vld [vmem:[%s673_s1 + $0x38] sm:$0xff]   ;;  %vm26_vm1 = vcmp.ge.bf16.partialorder %v24_v33, 0  ;;  %v28_v35 = vmul.bf16 1045249613, %v24_v33 }
   0xc   :  { %466 = vmatpush3.bf16.msra.mxu0 %v515_v10  ;;  %v532_v27 = vld [vmem:[%s673_s1 + $0xb0] sm:$0xff]   ;;  %v536_v31 = vld [vmem:[%s673_s1 + $0xb8] sm:$0xff]   ;;  %v29_v36 = vsel %vm25_vm0, %v23_v32, %v27_v34  ;;  %v460_v50 = vld [vmem:[%s675_s2] ss:$0 sm:$0xff] }
   0xd   :  { %488 = vmatpush3.bf16.msra.mxu1 %v516_v11  ;;  %467 = vmatprep.subr.bf16.mxu0 %v517_v12  ;;  %v30_v37 = vsel %vm26_vm1, %v24_v33, %v28_v35  ;;  %v424_v38 = vcombine.low %v29_v36, %v29_v36  ;;  %v425_v39 = vcombine.high %v29_v36, %v29_v36 }
   0xe   :  { %489 = vmatprep.subr.bf16.mxu1 %v518_v13  ;;  %v426_v40 = vcombine.low %v30_v37, %v30_v37  ;;  %v427_v41 = vcombine.high %v30_v37, %v30_v37 }
   0xf   :  { %334 = vmatprep.mubr.bf16.mxu0 %v425_v39 }
  0x10   :  { %468 = vmatpush3.bf16.msra.mxu0 %v519_v14  ;;  %374 = vmatprep.mubr.bf16.mxu1 %v427_v41 }
  0x11   :  { %490 = vmatpush3.bf16.msra.mxu1 %v520_v15  ;;  %469 = vmatprep.subr.bf16.mxu0 %v521_v16 }
  0x12   :  { %491 = vmatprep.subr.bf16.mxu1 %v522_v17 }
  0x14   :  { %470 = vmatpush3.bf16.msra.mxu0 %v523_v18 }
  0x15   :  { %492 = vmatpush3.bf16.msra.mxu1 %v524_v19  ;;  %471 = vmatprep.subr.bf16.mxu0 %v525_v20 }
  0x16   :  { %493 = vmatprep.subr.bf16.mxu1 %v526_v21 }
  0x18   :  { %472 = vmatpush3.bf16.msra.mxu0 %v527_v22 }
  0x19   :  { %494 = vmatpush3.bf16.msra.mxu1 %v528_v23  ;;  %473 = vmatprep.subr.bf16.mxu0 %v529_v24 }
  0x1a   :  { %495 = vmatprep.subr.bf16.mxu1 %v530_v25 }
  0x1c   :  { %474 = vmatpush3.bf16.msra.mxu0 %v531_v26 }
  0x1d   :  { %496 = vmatpush3.bf16.msra.mxu1 %v532_v27  ;;  %475 = vmatprep.subr.bf16.mxu0 %v533_v28 }
  0x1e   :  { %497 = vmatprep.subr.bf16.mxu1 %v534_v29 }
  0x20   :  { %476 = vmatpush3.bf16.msra.mxu0 %v535_v30 }
  0x21   :  { %498 = vmatpush3.bf16.msra.mxu1 %v536_v31 }
  0x23   :  { %335 = vmatmul.mubr.bf16.vlgmr.msra.gmra.mrb[0].mxu0 %v424_v38 }
  0x24   :  { %375 = vmatmul.mubr.bf16.vlgmr.msra.gmra.mrb[0].mxu1 %v426_v40 }
  0xf6   :  { %v477_v42 = vpop.f32.mrb[0].mxu0 }
  0xf7   :  { %v499_v43 = vpop.f32.mrb[0].mxu1  ;;  %v478_v44 = vpop.f32.mrb[1].mxu0 }
  0xf8   :  { %v500_v45 = vpop.f32.mrb[1].mxu1  ;;  %v479_v46 = vadd.f32 %v478_v44, %v477_v42  ;;  %v480_v48 = vpop.f32.mrb[2].mxu0 }
  0xf9   :  { %v501_v47 = vadd.f32 %v500_v45, %v499_v43  ;;  %v502_v49 = vpop.f32.mrb[2].mxu1  ;;  %v481_v51 = vpop.f32.mrb[3].mxu0 }
  0xfa   :  { %v503_v52 = vpop.f32.mrb[3].mxu1 }
  0xfb   :  { %v377_v53 = vadd.f32 %v501_v47, %v479_v46 }
  0xfd   :  { %v395_v54 = vadd.f32 %v460_v50, %v377_v53 }
  0xff   :  { %v396_v55 = vrot.slane %v395_v54, 4  ;;  %v402_v56 = vmul.f32 %v395_v54, %v395_v54  ;;  %v414_v57 = vpack.c.bf16 %v395_v54, %v395_v54 }
 0x101   :  { %v397_v58 = vadd.f32 %v396_v55, %v395_v54  ;;  %v403_v59 = vrot.slane %v402_v56, 4  ;;  %415 = vst [vmem:[%s676_s3] sm:$0xf] %v414_v57 }
 0x103   :  { %v398_v60 = vrot.slane %v397_v58, 2  ;;  %v404_v61 = vadd.f32 %v403_v59, %v402_v56 }
 0x105   :  { %v399_v62 = vadd.f32 %v398_v60, %v397_v58  ;;  %v405_v63 = vrot.slane %v404_v61, 2 }
 0x107   :  { %v400_v0 = vrot.slane %v399_v62, 1  ;;  %v406_v1 = vadd.f32 %v405_v63, %v404_v61 }
 0x109   :  { %v407_v2 = vrot.slane %v406_v1, 1  ;;  %v401_v3 = vadd.f32 %v400_v0, %v399_v62 }
 0x10b   :  { %v408_v4 = vadd.f32 %v407_v2, %v406_v1 }
 0x10d   :  { %v410_v5 = vsel %vm409_vm2, %v401_v3, %v408_v4 }
 0x10e   :  { %v412_v6 = vsel %vm411_vm3, %v410_v5, 0.0 }
 0x10f   :  { %413 = vst [vmem:[%s677_s4] sm:$0xff] %v412_v6 }

// kernel: _lambda_.14
= control target key start
LH: loop header
LB: loop body
LE: loop exit
PB: predicated region body
PF: predicated region fallthrough
CT: control target
= control target key end

     0   :  { %s1291_s0 = inlined_call_operand.vmem [shape: bf16[1,8,1024], index: 0, kind: input, shape index: {}]   ;;  %s1292_s1 = inlined_call_operand.vmem [shape: bf16[1,1024,128], index: 1, kind: input, shape index: {}]   ;;  %s1293_s2 = inlined_call_operand.vmem [shape: f32[1,128], index: 2, kind: input, shape index: {}]   ;;  %s1294_s3 = inlined_call_operand.vmem [shape: bf16[1,8,128], index: 3, kind: output, shape index: {0}]   ;;  %s1295_s4 = inlined_call_operand.hbm [shape: f32[1,1,8,128], index: 4, kind: output, shape index: {1}]  }
   0x1   :  { %v955_v0 = vld [vmem:[%s1292_s1 + $0x40] sm:$0xff]   ;;  %v959_v4 = vld [vmem:[%s1292_s1 + $0x48] sm:$0xff]   ;;  %v963_v8 = vld [vmem:[%s1292_s1 + $0x50] sm:$0xff]  }
   0x2   :  { %v956_v1 = vld [vmem:[%s1292_s1 + $0xc0] sm:$0xff]   ;;  %866 = vmatprep.subr.bf16.mxu0 %v955_v0  ;;  %v960_v5 = vld [vmem:[%s1292_s1 + $0xc8] sm:$0xff]   ;;  %v964_v9 = vld [vmem:[%s1292_s1 + $0xd0] sm:$0xff]  }
   0x3   :  { %v957_v2 = vld [vmem:[%s1292_s1] sm:$0xff]   ;;  %888 = vmatprep.subr.bf16.mxu1 %v956_v1  ;;  %v961_v6 = vld [vmem:[%s1292_s1 + $0x8] sm:$0xff]   ;;  %v965_v10 = vld [vmem:[%s1292_s1 + $0x10] sm:$0xff]  }
   0x4   :  { %v958_v3 = vld [vmem:[%s1292_s1 + $0x80] sm:$0xff]   ;;  %867 = vmatpush3.bf16.msra.mxu0 %v957_v2  ;;  %v962_v7 = vld [vmem:[%s1292_s1 + $0x88] sm:$0xff]   ;;  %v966_v11 = vld [vmem:[%s1292_s1 + $0x90] sm:$0xff]  }
   0x5   :  { %889 = vmatpush3.bf16.msra.mxu1 %v958_v3  ;;  %868 = vmatprep.subr.bf16.mxu0 %v959_v4  ;;  %v967_v12 = vld [vmem:[%s1292_s1 + $0x58] sm:$0xff]   ;;  %v971_v16 = vld [vmem:[%s1292_s1 + $0x60] sm:$0xff]   ;;  %v975_v20 = vld [vmem:[%s1292_s1 + $0x68] sm:$0xff]  }
   0x6   :  { %890 = vmatprep.subr.bf16.mxu1 %v960_v5  ;;  %v968_v13 = vld [vmem:[%s1292_s1 + $0xd8] sm:$0xff]   ;;  %v972_v17 = vld [vmem:[%s1292_s1 + $0xe0] sm:$0xff]   ;;  %v976_v21 = vld [vmem:[%s1292_s1 + $0xe8] sm:$0xff]  }
   0x7   :  { %v969_v14 = vld [vmem:[%s1292_s1 + $0x18] sm:$0xff]   ;;  %v973_v18 = vld [vmem:[%s1292_s1 + $0x20] sm:$0xff]   ;;  %v977_v22 = vld [vmem:[%s1292_s1 + $0x28] sm:$0xff]  }
   0x8   :  { %869 = vmatpush3.bf16.msra.mxu0 %v961_v6  ;;  %v970_v15 = vld [vmem:[%s1292_s1 + $0x98] sm:$0xff]   ;;  %v974_v19 = vld [vmem:[%s1292_s1 + $0xa0] sm:$0xff]   ;;  %v978_v23 = vld [vmem:[%s1292_s1 + $0xa8] sm:$0xff]  }
   0x9   :  { %891 = vmatpush3.bf16.msra.mxu1 %v962_v7  ;;  %870 = vmatprep.subr.bf16.mxu0 %v963_v8  ;;  %v979_v24 = vld [vmem:[%s1292_s1 + $0x70] sm:$0xff]   ;;  %v983_v28 = vld [vmem:[%s1292_s1 + $0x78] sm:$0xff]   ;;  %v24_v32 = vld [vmem:[%s1291_s0] sm:$0xff] }
   0xa   :  { %892 = vmatprep.subr.bf16.mxu1 %v964_v9  ;;  %v980_v25 = vld [vmem:[%s1292_s1 + $0xf0] sm:$0xff]   ;;  %v984_v29 = vld [vmem:[%s1292_s1 + $0xf8] sm:$0xff]   ;;  %v25_v33 = vld [vmem:[%s1291_s0 + $0x8] sm:$0xff]  ;;  %vm28_vm0 = vcmp.ge.bf16.partialorder %v24_v32, 0  ;;  %v32_v34 = vmul.bf16 1045249613, %v24_v32 }
   0xb   :  { %v981_v26 = vld [vmem:[%s1292_s1 + $0x30] sm:$0xff]   ;;  %v985_v30 = vld [vmem:[%s1292_s1 + $0x38] sm:$0xff]   ;;  %vm29_vm1 = vcmp.ge.bf16.partialorder %v25_v33, 0  ;;  %v33_v35 = vmul.bf16 1045249613, %v25_v33  ;;  %v987_v36 = vld [vmem:[%s1292_s1 + $0x140] sm:$0xff]  }
   0xc   :  { %871 = vmatpush3.bf16.msra.mxu0 %v965_v10  ;;  %v982_v27 = vld [vmem:[%s1292_s1 + $0xb0] sm:$0xff]   ;;  %v986_v31 = vld [vmem:[%s1292_s1 + $0xb8] sm:$0xff]   ;;  %v36_v37 = vsel %vm28_vm0, %v24_v32, %v32_v34  ;;  %v988_v39 = vld [vmem:[%s1292_s1 + $0x1c0] sm:$0xff]  }
   0xd   :  { %893 = vmatpush3.bf16.msra.mxu1 %v966_v11  ;;  %872 = vmatprep.subr.bf16.mxu0 %v967_v12  ;;  %v37_v38 = vsel %vm29_vm1, %v25_v33, %v33_v35  ;;  %v793_v40 = vcombine.low %v36_v37, %v36_v37  ;;  %v794_v41 = vcombine.high %v36_v37, %v36_v37  ;;  %v989_v44 = vld [vmem:[%s1292_s1 + $0x100] sm:$0xff]   ;;  %v991_v46 = vld [vmem:[%s1292_s1 + $0x148] sm:$0xff]   ;;  %v995_v50 = vld [vmem:[%s1292_s1 + $0x150] sm:$0xff]  }
   0xe   :  { %894 = vmatprep.subr.bf16.mxu1 %v968_v13  ;;  %v795_v42 = vcombine.low %v37_v38, %v37_v38  ;;  %v796_v43 = vcombine.high %v37_v38, %v37_v38  ;;  %v990_v45 = vld [vmem:[%s1292_s1 + $0x180] sm:$0xff]   ;;  %v992_v47 = vld [vmem:[%s1292_s1 + $0x1c8] sm:$0xff]   ;;  %v996_v51 = vld [vmem:[%s1292_s1 + $0x1d0] sm:$0xff]  }
   0xf   :  { %613 = vmatprep.mubr.bf16.mxu0 %v794_v41  ;;  %v993_v48 = vld [vmem:[%s1292_s1 + $0x108] sm:$0xff]   ;;  %v997_v52 = vld [vmem:[%s1292_s1 + $0x110] sm:$0xff]   ;;  %v999_v54 = vld [vmem:[%s1292_s1 + $0x158] sm:$0xff]  }
  0x10   :  { %873 = vmatpush3.bf16.msra.mxu0 %v969_v14  ;;  %653 = vmatprep.mubr.bf16.mxu1 %v796_v43  ;;  %v994_v49 = vld [vmem:[%s1292_s1 + $0x188] sm:$0xff]   ;;  %v998_v53 = vld [vmem:[%s1292_s1 + $0x190] sm:$0xff]   ;;  %v1000_v55 = vld [vmem:[%s1292_s1 + $0x1d8] sm:$0xff]  }
  0x11   :  { %895 = vmatpush3.bf16.msra.mxu1 %v970_v15  ;;  %874 = vmatprep.subr.bf16.mxu0 %v971_v16  ;;  %v1001_v56 = vld [vmem:[%s1292_s1 + $0x118] sm:$0xff]   ;;  %v1003_v58 = vld [vmem:[%s1292_s1 + $0x160] sm:$0xff]   ;;  %v1007_v62 = vld [vmem:[%s1292_s1 + $0x168] sm:$0xff]  }
  0x12   :  { %896 = vmatprep.subr.bf16.mxu1 %v972_v17  ;;  %v1002_v57 = vld [vmem:[%s1292_s1 + $0x198] sm:$0xff]   ;;  %v1004_v59 = vld [vmem:[%s1292_s1 + $0x1e0] sm:$0xff]   ;;  %v1008_v63 = vld [vmem:[%s1292_s1 + $0x1e8] sm:$0xff]  }
  0x13   :  { %v1005_v60 = vld [vmem:[%s1292_s1 + $0x120] sm:$0xff]   ;;  %v1009_v0 = vld [vmem:[%s1292_s1 + $0x128] sm:$0xff]   ;;  %v1011_v2 = vld [vmem:[%s1292_s1 + $0x170] sm:$0xff]  }
  0x14   :  { %875 = vmatpush3.bf16.msra.mxu0 %v973_v18  ;;  %v1006_v61 = vld [vmem:[%s1292_s1 + $0x1a0] sm:$0xff]   ;;  %v1010_v1 = vld [vmem:[%s1292_s1 + $0x1a8] sm:$0xff]   ;;  %v1012_v3 = vld [vmem:[%s1292_s1 + $0x1f0] sm:$0xff]  }
  0x15   :  { %897 = vmatpush3.bf16.msra.mxu1 %v974_v19  ;;  %876 = vmatprep.subr.bf16.mxu0 %v975_v20  ;;  %v1013_v4 = vld [vmem:[%s1292_s1 + $0x130] sm:$0xff]   ;;  %v1015_v6 = vld [vmem:[%s1292_s1 + $0x178] sm:$0xff]  }
  0x16   :  { %898 = vmatprep.subr.bf16.mxu1 %v976_v21  ;;  %v1014_v5 = vld [vmem:[%s1292_s1 + $0x1b0] sm:$0xff]   ;;  %v1016_v7 = vld [vmem:[%s1292_s1 + $0x1f8] sm:$0xff]  }
  0x17   :  { %v1017_v8 = vld [vmem:[%s1292_s1 + $0x138] sm:$0xff]   ;;  %v26_v10 = vld [vmem:[%s1291_s0 + $0x10] sm:$0xff] }
  0x18   :  { %877 = vmatpush3.bf16.msra.mxu0 %v977_v22  ;;  %v1018_v9 = vld [vmem:[%s1292_s1 + $0x1b8] sm:$0xff]   ;;  %vm30_vm2 = vcmp.ge.bf16.partialorder %v26_v10, 0  ;;  %v34_v11 = vmul.bf16 1045249613, %v26_v10 }
  0x19   :  { %899 = vmatpush3.bf16.msra.mxu1 %v978_v23  ;;  %878 = vmatprep.subr.bf16.mxu0 %v979_v24  ;;  %v27_v12 = vld [vmem:[%s1291_s0 + $0x18] sm:$0xff] }
  0x1a   :  { %900 = vmatprep.subr.bf16.mxu1 %v980_v25 }
  0x1c   :  { %879 = vmatpush3.bf16.msra.mxu0 %v981_v26 }
  0x1d   :  { %901 = vmatpush3.bf16.msra.mxu1 %v982_v27  ;;  %880 = vmatprep.subr.bf16.mxu0 %v983_v28 }
  0x1e   :  { %902 = vmatprep.subr.bf16.mxu1 %v984_v29 }
  0x20   :  { %881 = vmatpush3.bf16.msra.mxu0 %v985_v30 }
  0x21   :  { %903 = vmatpush3.bf16.msra.mxu1 %v986_v31  ;;  %910 = vmatprep.subr.bf16.mxu0 %v987_v36 }
  0x22   :  { %932 = vmatprep.subr.bf16.mxu1 %v988_v39 }
  0x23   :  { %614 = vmatmul.mubr.bf16.vlgmr.msra.gmra.mrb[0].mxu0 %v793_v40 }
  0x24   :  { %654 = vmatmul.mubr.bf16.vlgmr.msra.gmra.mrb[0].mxu1 %v795_v42  ;;  %911 = vmatpush3.bf16.msra.mxu0 %v989_v44 }
  0x25   :  { %933 = vmatpush3.bf16.msra.mxu1 %v990_v45  ;;  %912 = vmatprep.subr.bf16.mxu0 %v991_v46 }
  0x26   :  { %934 = vmatprep.subr.bf16.mxu1 %v992_v47 }
  0x28   :  { %913 = vmatpush3.bf16.msra.mxu0 %v993_v48 }
  0x29   :  { %935 = vmatpush3.bf16.msra.mxu1 %v994_v49  ;;  %914 = vmatprep.subr.bf16.mxu0 %v995_v50 }
  0x2a   :  { %936 = vmatprep.subr.bf16.mxu1 %v996_v51 }
  0x2c   :  { %915 = vmatpush3.bf16.msra.mxu0 %v997_v52 }
  0x2d   :  { %937 = vmatpush3.bf16.msra.mxu1 %v998_v53  ;;  %916 = vmatprep.subr.bf16.mxu0 %v999_v54 }
  0x2e   :  { %938 = vmatprep.subr.bf16.mxu1 %v1000_v55 }
  0x30   :  { %917 = vmatpush3.bf16.msra.mxu0 %v1001_v56 }
  0x31   :  { %939 = vmatpush3.bf16.msra.mxu1 %v1002_v57  ;;  %918 = vmatprep.subr.bf16.mxu0 %v1003_v58 }
  0x32   :  { %940 = vmatprep.subr.bf16.mxu1 %v1004_v59 }
  0x34   :  { %919 = vmatpush3.bf16.msra.mxu0 %v1005_v60 }
  0x35   :  { %941 = vmatpush3.bf16.msra.mxu1 %v1006_v61  ;;  %920 = vmatprep.subr.bf16.mxu0 %v1007_v62 }
  0x36   :  { %942 = vmatprep.subr.bf16.mxu1 %v1008_v63 }
  0x38   :  { %921 = vmatpush3.bf16.msra.mxu0 %v1009_v0 }
  0x39   :  { %943 = vmatpush3.bf16.msra.mxu1 %v1010_v1  ;;  %922 = vmatprep.subr.bf16.mxu0 %v1011_v2 }
  0x3a   :  { %944 = vmatprep.subr.bf16.mxu1 %v1012_v3 }
  0x3c   :  { %923 = vmatpush3.bf16.msra.mxu0 %v1013_v4 }
  0x3d   :  { %945 = vmatpush3.bf16.msra.mxu1 %v1014_v5  ;;  %924 = vmatprep.subr.bf16.mxu0 %v1015_v6 }
  0x3e   :  { %946 = vmatprep.subr.bf16.mxu1 %v1016_v7 }
  0x3f   :  { %10 = vsyncpa [#allocation4], 0  ;;  %vm31_vm3 = vcmp.ge.bf16.partialorder %v27_v12, 0  ;;  %v35_v13 = vmul.bf16 1045249613, %v27_v12  ;;  %v38_v14 = vsel %vm30_vm2, %v26_v10, %v34_v11  ;;  %vm768_vm4 = vcmask 1040384  }
  0x40   :  { %925 = vmatpush3.bf16.msra.mxu0 %v1017_v8  ;;  %v797_v15 = vcombine.low %v38_v14, %v38_v14  ;;  %v798_v16 = vcombine.high %v38_v14, %v38_v14  ;;  %v865_v42 = vld [vmem:[%s1293_s2] ss:$0 sm:$0xff]  ;;  %s1043_s2 = smov [#allocation3]   ;;  %vm770_vm5 = vcmask 1041408  }
  0x41   :  { %947 = vmatpush3.bf16.msra.mxu1 %v1018_v9  ;;  %v39_v17 = vsel %vm31_vm3, %v27_v12, %v35_v13  ;;  %s783_s23 = sshll.u32 %s1043_s2, 4  ;;  %s784_s23 = int_to_ptr.vmem [resolvable:$true] %s783_s23 }
  0x42   :  { %v799_v18 = vcombine.low %v39_v17, %v39_v17  ;;  %v800_v19 = vcombine.high %v39_v17, %v39_v17  ;;  %693 = vmatprep.mubr.bf16.mxu0 %v798_v16  ;;  %p1024_p1 = scmp.lt.s32.totalorder %s784_s23, %s784_s23 }
  0x43   :  { %694 = vmatmul.mubr.bf16.vlgmr.msra.gmra.mrb[4].mxu0 %v797_v15 }
  0x44   :  { %733 = vmatprep.mubr.bf16.mxu1 %v800_v19 }
  0x45   :  { %734 = vmatmul.mubr.bf16.vlgmr.msra.gmra.mrb[4].mxu1 %v799_v18 }
  0xf6   :  { %v882_v20 = vpop.f32.mrb[0].mxu0 }
  0xf7   :  { %v904_v21 = vpop.f32.mrb[0].mxu1  ;;  %v883_v22 = vpop.f32.mrb[1].mxu0 }
  0xf8   :  { %v905_v23 = vpop.f32.mrb[1].mxu1  ;;  %v884_v24 = vadd.f32 %v883_v22, %v882_v20  ;;  %v885_v26 = vpop.f32.mrb[2].mxu0 }
  0xf9   :  { %v906_v25 = vadd.f32 %v905_v23, %v904_v21  ;;  %v907_v27 = vpop.f32.mrb[2].mxu1  ;;  %v886_v28 = vpop.f32.mrb[3].mxu0 }
  0xfa   :  { %v908_v29 = vpop.f32.mrb[3].mxu1 }
  0xfb   :  { %v656_v30 = vadd.f32 %v906_v25, %v884_v24 }
 0x116   :  { %v926_v31 = vpop.f32.mrb[4].mxu0 }
 0x117   :  { %v927_v33 = vpop.f32.mrb[5].mxu0 }
 0x118   :  { %v948_v32 = vpop.f32.mrb[4].mxu1  ;;  %v928_v34 = vadd.f32 %v927_v33, %v926_v31  ;;  %v929_v36 = vpop.f32.mrb[6].mxu0 }
 0x119   :  { %v949_v35 = vpop.f32.mrb[5].mxu1  ;;  %v930_v39 = vpop.f32.mrb[7].mxu0 }
 0x11a   :  { %v950_v37 = vadd.f32 %v949_v35, %v948_v32  ;;  %v951_v38 = vpop.f32.mrb[6].mxu1  ;;  %v696_v40 = vadd.f32 %v928_v34, %v656_v30 }
 0x11b   :  { %v952_v41 = vpop.f32.mrb[7].mxu1 }
 0x11c   :  { %v736_v43 = vadd.f32 %v950_v37, %v696_v40 }
 0x11e   :  { %v754_v44 = vadd.f32 %v865_v42, %v736_v43 }
 0x120   :  { %v755_v45 = vrot.slane %v754_v44, 4  ;;  %v761_v46 = vmul.f32 %v754_v44, %v754_v44  ;;  %v773_v47 = vpack.c.bf16 %v754_v44, %v754_v44 }
 0x122   :  { %774 = vst [vmem:[%s1294_s3] sm:$0xf] %v773_v47  ;;  %v756_v48 = vadd.f32 %v755_v45, %v754_v44  ;;  %v762_v49 = vrot.slane %v761_v46, 4  ;;  %s1019_s3 = scalar_lea.vmem %s784_s23, 128 }
 0x123   :  { %p1020_p0 = scmp.ne.s32.totalorder %s784_s23, %s1019_s3  ;;  %p1025_p2 = scmp.lt.s32.totalorder %s1019_s3, %s1019_s3 }
 0x124   :  { %v757_v50 = vrot.slane %v756_v48, 2  ;;  %v763_v51 = vadd.f32 %v762_v49, %v761_v46 }
 0x125   :  { %p1026_p3 = por %p1025_p2, %p1024_p1 }
 0x126   :  { %v758_v52 = vadd.f32 %v757_v50, %v756_v48  ;;  %v764_v53 = vrot.slane %v763_v51, 2 }
 0x127   :  { %p1027_p4 = pnand %p1026_p3, %p1020_p0 }
 0x128   :  { %v759_v54 = vrot.slane %v758_v52, 1  ;;  %v765_v55 = vadd.f32 %v764_v53, %v763_v51 }
 0x12a   :  { %v766_v56 = vrot.slane %v765_v55, 1  ;;  %v760_v57 = vadd.f32 %v759_v54, %v758_v52 }
 0x12c   :  { %v767_v58 = vadd.f32 %v766_v56, %v765_v55 }
 0x12e   :  { %v769_v59 = vsel %vm768_vm4, %v760_v57, %v767_v58 }
 0x12f   :  { %v771_v60 = vsel %vm770_vm5, %v769_v59, 0.0 }
 0x130   :  { %772 = vst [vmem:[#allocation3] sm:$0xff] %v771_v60 }
 0x131   :  { %1030 = shalt.err (!%p1027_p4)
}
 0x132   :  { %s1031_s26 = scalar_lea.hbm %s1295_s4, 128 }
 0x133   :  { %p1032_p5 = scmp.ne.s32.totalorder %s1295_s4, %s1031_s26  ;;  %p1035_p6 = scmp.lt.u32.totalorder %s1031_s26, %s1295_s4 }
 0x135   :  { %p1037_p7 = pnand %p1035_p6, %p1032_p5 }
 0x137   :  { %1040 = shalt.err (!%p1037_p7)
}
 0x138   :  { %786 = dma.vmem_to_hbm [thread:$0]  %s784_s23, 128, %s1295_s4, [#allocation4]  }
 0x139   :  { %1041 = dma.done.wait [#allocation4], 128  }
 0x13a   :  { %1042 = vsyncadd [#allocation4], 4294967168 }
 0x13b   :  { %792 = vsyncpa [#allocation4], 1 }

// kernel: _lambda_.15
= control target key start
LH: loop header
LB: loop body
LE: loop exit
PB: predicated region body
PF: predicated region fallthrough
CT: control target
= control target key end

     0   :  { %s906_s15 = smov 0   ;;  %s908_s16 = smov 0   ;;  %s975_s0 = inlined_call_operand.vmem [shape: bf16[4,8,256], index: 0, kind: input, shape index: {}]   ;;  %s976_s1 = inlined_call_operand.vmem [shape: bf16[4,256,128], index: 1, kind: input, shape index: {}]   ;;  %s977_s2 = inlined_call_operand.vmem [shape: f32[1,128], index: 2, kind: input, shape index: {}]   ;;  %s978_s3 = inlined_call_operand.vmem [shape: bf16[4,8,128], index: 3, kind: output, shape index: {0}]   ;;  %s979_s4 = inlined_call_operand.vmem [shape: f32[4,1,8,128], index: 4, kind: output, shape index: {1}]  }
   0x1   :  { %s910_s17 = smov 0  }
   0x2 LB: > { %s41_s18 = sadd.s32 1, %s874_s16  ;;  %p763_p0 = scmp.ge.s32.totalorder %s878_s17, 1  ;;  %s878_s17 = sphi %s910_s17, %s15_s17   ;;  %s874_s16 = sphi %s908_s16, %s981_s16   ;;  %s870_s15 = sphi %s906_s15, %s980_s15  }
   0x3   : > { %p43_p1 = scmp.ge.s32.totalorder %s41_s18, 4  ;;  %p242_p2 = scmp.lt.s32.totalorder %s878_s17, 5 }
   0x5   : > { %s983_s18 = smov (%p43_p1, %s41_s18), 0  ;;  %p243_p3 = pnand %p763_p0, %p242_p2 }
   0x6   : > { %p307_p4 = scmp.lt.s32.totalorder (!%p243_p3), %s870_s15, 3  ;;  %v880_v12 = vmov (!%p243_p3), 0   ;;  %v788_v23 = vld [vmem:[%s977_s2] ss:$0 sm:$0xff] (!%p243_p3)  ;;  %vm567_vm0 = vcmask (!%p243_p3), 1040384   ;;  %vm569_vm1 = vcmask (!%p243_p3), 1041408  }
   0x7   : > { %246 = sbr.rel (%p243_p3) target bundleno = 284 (0x11c), region = 32 }
   0xe   : > { %s985_s15 = smov (!%p307_p4, %s870_s15), 3 }
   0xf   : > { %s792_s19 = sshll.u32 %s985_s15, 7  ;;  %s791_s23 = sshll.u32 %s985_s15, 3 }
  0x10   : > { %s930_s22 = scalar_lea.vmem %s976_s1, %s792_s19  ;;  %s318_s26 = scalar_lea.vmem %s975_s0, %s791_s23 }
  0x11   : > { %v840_v0 = vld [vmem:[%s930_s22 + $0x40] sm:$0xff]   ;;  %v842_v2 = vld [vmem:[%s930_s22 + $0x48] sm:$0xff]   ;;  %v844_v4 = vld [vmem:[%s930_s22 + $0x50] sm:$0xff]   ;;  %s768_s29 = sshll.u32 %s985_s15, 2  ;;  %s355_s9 = scalar_lea.vmem %s979_s4, %s791_s23 }
  0x12   : > { %v841_v1 = vld [vmem:[%s930_s22] sm:$0xff]   ;;  %793 = vmatprep.subr.bf16.mxu0 %v840_v0  ;;  %v843_v3 = vld [vmem:[%s930_s22 + $0x8] sm:$0xff]   ;;  %v845_v5 = vld [vmem:[%s930_s22 + $0x10] sm:$0xff]   ;;  %s345_s6 = scalar_lea.vmem %s978_s3, %s768_s29 }
  0x13   : > { %794 = vmatpush3.bf16.msra.mxu0 %v841_v1  ;;  %v846_v6 = vld [vmem:[%s930_s22 + $0x58] sm:$0xff]   ;;  %v848_v8 = vld [vmem:[%s930_s22 + $0x60] sm:$0xff]   ;;  %v850_v10 = vld [vmem:[%s930_s22 + $0x68] sm:$0xff]  }
  0x14   : > { %795 = vmatprep.subr.bf16.mxu0 %v842_v2  ;;  %v847_v7 = vld [vmem:[%s930_s22 + $0x18] sm:$0xff]   ;;  %v849_v9 = vld [vmem:[%s930_s22 + $0x20] sm:$0xff]   ;;  %v851_v14 = vld [vmem:[%s930_s22 + $0x28] sm:$0xff]  }
  0x15   : > { %v362_v11 = vld [vmem:[%s318_s26] sm:$0xff]  ;;  %v852_v16 = vld [vmem:[%s930_s22 + $0x70] sm:$0xff]   ;;  %v854_v18 = vld [vmem:[%s930_s22 + $0x78] sm:$0xff]  }
  0x16   : > { %v363_v13 = vmax.bf16 %v880_v12, %v362_v11  ;;  %v853_v17 = vld [vmem:[%s930_s22 + $0x30] sm:$0xff]   ;;  %v855_v19 = vld [vmem:[%s930_s22 + $0x38] sm:$0xff]  }
  0x17   : > { %796 = vmatpush3.bf16.msra.mxu0 %v843_v3 }
  0x18   : > { %797 = vmatprep.subr.bf16.mxu0 %v844_v4  ;;  %v771_v15 = vcombine.high %v363_v13, %v363_v13  ;;  %v770_v20 = vcombine.low %v363_v13, %v363_v13 }
  0x1a   : > { %532 = vmatprep.mubr.bf16.mxu0 %v771_v15 }
  0x1b   : > { %798 = vmatpush3.bf16.msra.mxu0 %v845_v5 }
  0x1c   : > { %799 = vmatprep.subr.bf16.mxu0 %v846_v6 }
  0x1f   : > { %800 = vmatpush3.bf16.msra.mxu0 %v847_v7 }
  0x20   : > { %801 = vmatprep.subr.bf16.mxu0 %v848_v8 }
  0x23   : > { %802 = vmatpush3.bf16.msra.mxu0 %v849_v9 }
  0x24   : > { %803 = vmatprep.subr.bf16.mxu0 %v850_v10 }
  0x27   : > { %804 = vmatpush3.bf16.msra.mxu0 %v851_v14 }
  0x28   : > { %805 = vmatprep.subr.bf16.mxu0 %v852_v16 }
  0x2b   : > { %806 = vmatpush3.bf16.msra.mxu0 %v853_v17 }
  0x2c   : > { %807 = vmatprep.subr.bf16.mxu0 %v854_v18 }
  0x2f   : > { %808 = vmatpush3.bf16.msra.mxu0 %v855_v19 }
  0x32   : > { %533 = vmatmul.mubr.bf16.vlgmr.msra.gmra.mrb[0].mxu0 %v770_v20 }
 0x105   : > { %v809_v21 = vpop.f32.mrb[0].mxu0 }
 0x106   : > { %v810_v22 = vpop.f32.mrb[1].mxu0 }
 0x107   : > { %v811_v24 = vadd.f32 %v810_v22, %v809_v21  ;;  %v812_v25 = vpop.f32.mrb[2].mxu0 }
 0x108   : > { %v813_v26 = vpop.f32.mrb[3].mxu0 }
 0x109   : > { %v553_v27 = vadd.f32 %v811_v24, %v788_v23 }
 0x10b   : > { %v554_v28 = vrot.slane %v553_v27, 4  ;;  %v560_v29 = vmul.f32 %v553_v27, %v553_v27  ;;  %v572_v30 = vpack.c.bf16 %v553_v27, %v553_v27 }
 0x10d   : > { %v555_v31 = vadd.f32 %v554_v28, %v553_v27  ;;  %v561_v32 = vrot.slane %v560_v29, 4  ;;  %573 = vst [vmem:[%s345_s6] sm:$0xf] %v572_v30 }
 0x10f   : > { %v556_v33 = vrot.slane %v555_v31, 2  ;;  %v562_v34 = vadd.f32 %v561_v32, %v560_v29 }
 0x111   : > { %v557_v35 = vadd.f32 %v556_v33, %v555_v31  ;;  %v563_v36 = vrot.slane %v562_v34, 2 }
 0x113   : > { %v558_v37 = vrot.slane %v557_v35, 1  ;;  %v564_v38 = vadd.f32 %v563_v36, %v562_v34 }
 0x115   : > { %v565_v39 = vrot.slane %v564_v38, 1  ;;  %v559_v40 = vadd.f32 %v558_v37, %v557_v35 }
 0x117   : > { %v566_v41 = vadd.f32 %v565_v39, %v564_v38 }
 0x119   : > { %v568_v42 = vsel %vm567_vm0, %v559_v40, %v566_v41 }
 0x11a   : > { %v570_v43 = vsel %vm569_vm1, %v568_v42, 0.0 }
 0x11b   : > { %571 = vst [vmem:[%s355_s9] sm:$0xff] %v570_v43 }
 0x11c PF: > { %s15_s17 = sadd.s32 1, %s878_s17   ;;  %s980_s15 = smov %s874_s16 }
 0x11d   : > { %p12_p5 = scmp.ge.s32.totalorder %s15_s17, 6   ;;  %s981_s16 = smov %s983_s18 }
 0x11f   :  { %14 = sbr.rel (!%p12_p5) target bundleno = 2 (0x2), region = 88 }

// kernel: _lambda_.16
= control target key start
LH: loop header
LB: loop body
LE: loop exit
PB: predicated region body
PF: predicated region fallthrough
CT: control target
= control target key end

     0   :  { %s1139_s15 = smov 0   ;;  %s1141_s16 = smov 0   ;;  %s1221_s0 = inlined_call_operand.vmem [shape: bf16[4,8,512], index: 0, kind: input, shape index: {}]   ;;  %s1222_s1 = inlined_call_operand.vmem [shape: bf16[4,512,128], index: 1, kind: input, shape index: {}]   ;;  %s1223_s2 = inlined_call_operand.vmem [shape: f32[1,128], index: 2, kind: input, shape index: {}]   ;;  %s1224_s3 = inlined_call_operand.vmem [shape: bf16[4,8,128], index: 3, kind: output, shape index: {0}]   ;;  %s1225_s4 = inlined_call_operand.vmem [shape: f32[4,1,8,128], index: 4, kind: output, shape index: {1}]  }
   0x1   :  { %s1143_s17 = smov 0  }
   0x2 LB: > { %s41_s18 = sadd.s32 1, %s1107_s16  ;;  %p940_p0 = scmp.ge.s32.totalorder %s1111_s17, 1  ;;  %s1111_s17 = sphi %s1143_s17, %s15_s17   ;;  %s1107_s16 = sphi %s1141_s16, %s1227_s16   ;;  %s1103_s15 = sphi %s1139_s15, %s1226_s15  }
   0x3   : > { %p43_p1 = scmp.ge.s32.totalorder %s41_s18, 4  ;;  %p242_p2 = scmp.lt.s32.totalorder %s1111_s17, 5 }
   0x5   : > { %s1229_s18 = smov (%p43_p1, %s41_s18), 0  ;;  %p243_p3 = pnand %p940_p0, %p242_p2 }
   0x6   : > { %p307_p4 = scmp.lt.s32.totalorder (!%p243_p3), %s1103_s15, 3  ;;  %v1113_v34 = vmov (!%p243_p3), 0   ;;  %v983_v49 = vld [vmem:[%s1223_s2] ss:$0 sm:$0xff] (!%p243_p3)  ;;  %vm744_vm0 = vcmask (!%p243_p3), 1040384   ;;  %vm746_vm1 = vcmask (!%p243_p3), 1041408  }
   0x7   : > { %246 = sbr.rel (%p243_p3) target bundleno = 288 (0x120), region = 32 }
   0xe   : > { %s1231_s15 = smov (!%p307_p4, %s1103_s15), 3 }
   0xf   : > { %s987_s19 = sshll.u32 %s1231_s15, 8  ;;  %s986_s23 = sshll.u32 %s1231_s15, 4 }
  0x10   : > { %s1163_s22 = scalar_lea.vmem %s1222_s1, %s987_s19  ;;  %s318_s26 = scalar_lea.vmem %s1221_s0, %s986_s23 }
  0x11   : > { %v1057_v0 = vld [vmem:[%s1163_s22 + $0x40] sm:$0xff]   ;;  %v1061_v4 = vld [vmem:[%s1163_s22 + $0x48] sm:$0xff]   ;;  %v1065_v8 = vld [vmem:[%s1163_s22 + $0x50] sm:$0xff]   ;;  %s945_s29 = sshll.u32 %s1231_s15, 2  ;;  %s946_s7 = sshll.u32 %s1231_s15, 3 }
  0x12   : > { %v1058_v1 = vld [vmem:[%s1163_s22 + $0xc0] sm:$0xff]   ;;  %988 = vmatprep.subr.bf16.mxu0 %v1057_v0  ;;  %v1062_v5 = vld [vmem:[%s1163_s22 + $0xc8] sm:$0xff]   ;;  %v1066_v9 = vld [vmem:[%s1163_s22 + $0xd0] sm:$0xff]   ;;  %s345_s6 = scalar_lea.vmem %s1224_s3, %s945_s29  ;;  %s355_s10 = scalar_lea.vmem %s1225_s4, %s946_s7 }
  0x13   : > { %v1059_v2 = vld [vmem:[%s1163_s22] sm:$0xff]   ;;  %1010 = vmatprep.subr.bf16.mxu1 %v1058_v1  ;;  %v1063_v6 = vld [vmem:[%s1163_s22 + $0x8] sm:$0xff]   ;;  %v1067_v10 = vld [vmem:[%s1163_s22 + $0x10] sm:$0xff]  }
  0x14   : > { %v1060_v3 = vld [vmem:[%s1163_s22 + $0x80] sm:$0xff]   ;;  %989 = vmatpush3.bf16.msra.mxu0 %v1059_v2  ;;  %v1064_v7 = vld [vmem:[%s1163_s22 + $0x88] sm:$0xff]   ;;  %v1068_v11 = vld [vmem:[%s1163_s22 + $0x90] sm:$0xff]  }
  0x15   : > { %1011 = vmatpush3.bf16.msra.mxu1 %v1060_v3  ;;  %990 = vmatprep.subr.bf16.mxu0 %v1061_v4  ;;  %v1069_v12 = vld [vmem:[%s1163_s22 + $0x58] sm:$0xff]   ;;  %v1073_v16 = vld [vmem:[%s1163_s22 + $0x60] sm:$0xff]   ;;  %v1077_v20 = vld [vmem:[%s1163_s22 + $0x68] sm:$0xff]  }
  0x16   : > { %1012 = vmatprep.subr.bf16.mxu1 %v1062_v5  ;;  %v1070_v13 = vld [vmem:[%s1163_s22 + $0xd8] sm:$0xff]   ;;  %v1074_v17 = vld [vmem:[%s1163_s22 + $0xe0] sm:$0xff]   ;;  %v1078_v21 = vld [vmem:[%s1163_s22 + $0xe8] sm:$0xff]  }
  0x17   : > { %v1071_v14 = vld [vmem:[%s1163_s22 + $0x18] sm:$0xff]   ;;  %v1075_v18 = vld [vmem:[%s1163_s22 + $0x20] sm:$0xff]   ;;  %v1079_v22 = vld [vmem:[%s1163_s22 + $0x28] sm:$0xff]  }
  0x18   : > { %991 = vmatpush3.bf16.msra.mxu0 %v1063_v6  ;;  %v1072_v15 = vld [vmem:[%s1163_s22 + $0x98] sm:$0xff]   ;;  %v1076_v19 = vld [vmem:[%s1163_s22 + $0xa0] sm:$0xff]   ;;  %v1080_v23 = vld [vmem:[%s1163_s22 + $0xa8] sm:$0xff]  }
  0x19   : > { %1013 = vmatpush3.bf16.msra.mxu1 %v1064_v7  ;;  %992 = vmatprep.subr.bf16.mxu0 %v1065_v8  ;;  %v1081_v24 = vld [vmem:[%s1163_s22 + $0x70] sm:$0xff]   ;;  %v1085_v28 = vld [vmem:[%s1163_s22 + $0x78] sm:$0xff]   ;;  %v362_v32 = vld [vmem:[%s318_s26] sm:$0xff] }
  0x1a   : > { %1014 = vmatprep.subr.bf16.mxu1 %v1066_v9  ;;  %v1082_v25 = vld [vmem:[%s1163_s22 + $0xf0] sm:$0xff]   ;;  %v1086_v29 = vld [vmem:[%s1163_s22 + $0xf8] sm:$0xff]   ;;  %v363_v33 = vld [vmem:[%s318_s26 + $0x8] sm:$0xff]  ;;  %v364_v35 = vmax.bf16 %v1113_v34, %v362_v32 }
  0x1b   : > { %v1083_v26 = vld [vmem:[%s1163_s22 + $0x30] sm:$0xff]   ;;  %v1087_v30 = vld [vmem:[%s1163_s22 + $0x38] sm:$0xff]   ;;  %v365_v36 = vmax.bf16 %v1113_v34, %v363_v33 }
  0x1c   : > { %993 = vmatpush3.bf16.msra.mxu0 %v1067_v10  ;;  %v1084_v27 = vld [vmem:[%s1163_s22 + $0xb0] sm:$0xff]   ;;  %v1088_v31 = vld [vmem:[%s1163_s22 + $0xb8] sm:$0xff]   ;;  %v948_v37 = vcombine.high %v364_v35, %v364_v35  ;;  %v947_v39 = vcombine.low %v364_v35, %v364_v35 }
  0x1d   : > { %1015 = vmatpush3.bf16.msra.mxu1 %v1068_v11  ;;  %994 = vmatprep.subr.bf16.mxu0 %v1069_v12  ;;  %v950_v38 = vcombine.high %v365_v36, %v365_v36  ;;  %v949_v40 = vcombine.low %v365_v36, %v365_v36 }
  0x1e   : > { %1016 = vmatprep.subr.bf16.mxu1 %v1070_v13  ;;  %669 = vmatprep.mubr.bf16.mxu0 %v948_v37 }
  0x1f   : > { %709 = vmatprep.mubr.bf16.mxu1 %v950_v38 }
  0x20   : > { %995 = vmatpush3.bf16.msra.mxu0 %v1071_v14 }
  0x21   : > { %1017 = vmatpush3.bf16.msra.mxu1 %v1072_v15  ;;  %996 = vmatprep.subr.bf16.mxu0 %v1073_v16 }
  0x22   : > { %1018 = vmatprep.subr.bf16.mxu1 %v1074_v17 }
  0x24   : > { %997 = vmatpush3.bf16.msra.mxu0 %v1075_v18 }
  0x25   : > { %1019 = vmatpush3.bf16.msra.mxu1 %v1076_v19  ;;  %998 = vmatprep.subr.bf16.mxu0 %v1077_v20 }
  0x26   : > { %1020 = vmatprep.subr.bf16.mxu1 %v1078_v21 }
  0x28   : > { %999 = vmatpush3.bf16.msra.mxu0 %v1079_v22 }
  0x29   : > { %1021 = vmatpush3.bf16.msra.mxu1 %v1080_v23  ;;  %1000 = vmatprep.subr.bf16.mxu0 %v1081_v24 }
  0x2a   : > { %1022 = vmatprep.subr.bf16.mxu1 %v1082_v25 }
  0x2c   : > { %1001 = vmatpush3.bf16.msra.mxu0 %v1083_v26 }
  0x2d   : > { %1023 = vmatpush3.bf16.msra.mxu1 %v1084_v27  ;;  %1002 = vmatprep.subr.bf16.mxu0 %v1085_v28 }
  0x2e   : > { %1024 = vmatprep.subr.bf16.mxu1 %v1086_v29 }
  0x30   : > { %1003 = vmatpush3.bf16.msra.mxu0 %v1087_v30 }
  0x31   : > { %1025 = vmatpush3.bf16.msra.mxu1 %v1088_v31 }
  0x33   : > { %670 = vmatmul.mubr.bf16.vlgmr.msra.gmra.mrb[0].mxu0 %v947_v39 }
  0x34   : > { %710 = vmatmul.mubr.bf16.vlgmr.msra.gmra.mrb[0].mxu1 %v949_v40 }
 0x106   : > { %v1004_v41 = vpop.f32.mrb[0].mxu0 }
 0x107   : > { %v1026_v42 = vpop.f32.mrb[0].mxu1  ;;  %v1005_v43 = vpop.f32.mrb[1].mxu0 }
 0x108   : > { %v1027_v44 = vpop.f32.mrb[1].mxu1  ;;  %v1006_v45 = vadd.f32 %v1005_v43, %v1004_v41  ;;  %v1007_v47 = vpop.f32.mrb[2].mxu0 }
 0x109   : > { %v1028_v46 = vadd.f32 %v1027_v44, %v1026_v42  ;;  %v1029_v48 = vpop.f32.mrb[2].mxu1  ;;  %v1008_v50 = vpop.f32.mrb[3].mxu0 }
 0x10a   : > { %v1030_v51 = vpop.f32.mrb[3].mxu1 }
 0x10b   : > { %v712_v52 = vadd.f32 %v1028_v46, %v1006_v45 }
 0x10d   : > { %v730_v53 = vadd.f32 %v983_v49, %v712_v52 }
 0x10f   : > { %v731_v54 = vrot.slane %v730_v53, 4  ;;  %v737_v55 = vmul.f32 %v730_v53, %v730_v53  ;;  %v749_v56 = vpack.c.bf16 %v730_v53, %v730_v53 }
 0x111   : > { %v732_v57 = vadd.f32 %v731_v54, %v730_v53  ;;  %v738_v58 = vrot.slane %v737_v55, 4  ;;  %750 = vst [vmem:[%s345_s6] sm:$0xf] %v749_v56 }
 0x113   : > { %v733_v59 = vrot.slane %v732_v57, 2  ;;  %v739_v60 = vadd.f32 %v738_v58, %v737_v55 }
 0x115   : > { %v734_v61 = vadd.f32 %v733_v59, %v732_v57  ;;  %v740_v62 = vrot.slane %v739_v60, 2 }
 0x117   : > { %v735_v63 = vrot.slane %v734_v61, 1  ;;  %v741_v0 = vadd.f32 %v740_v62, %v739_v60 }
 0x119   : > { %v742_v1 = vrot.slane %v741_v0, 1  ;;  %v736_v2 = vadd.f32 %v735_v63, %v734_v61 }
 0x11b   : > { %v743_v3 = vadd.f32 %v742_v1, %v741_v0 }
 0x11d   : > { %v745_v4 = vsel %vm744_vm0, %v736_v2, %v743_v3 }
 0x11e   : > { %v747_v5 = vsel %vm746_vm1, %v745_v4, 0.0 }
 0x11f   : > { %748 = vst [vmem:[%s355_s10] sm:$0xff] %v747_v5 }
 0x120 PF: > { %s15_s17 = sadd.s32 1, %s1111_s17   ;;  %s1226_s15 = smov %s1107_s16 }
 0x121   : > { %p12_p5 = scmp.ge.s32.totalorder %s15_s17, 6   ;;  %s1227_s16 = smov %s1229_s18 }
 0x123   :  { %14 = sbr.rel (!%p12_p5) target bundleno = 2 (0x2), region = 88 }

// kernel: _lambda_.17
= control target key start
LH: loop header
LB: loop body
LE: loop exit
PB: predicated region body
PF: predicated region fallthrough
CT: control target
= control target key end

     0   :  { %s1043_s15 = smov 0   ;;  %s1045_s16 = smov 0   ;;  %s1109_s0 = inlined_call_operand.vmem [shape: bf16[4,32,256], index: 0, kind: input, shape index: {}]   ;;  %s1110_s1 = inlined_call_operand.vmem [shape: bf16[4,256,128], index: 1, kind: input, shape index: {}]   ;;  %s1111_s2 = inlined_call_operand.vmem [shape: f32[1,128], index: 2, kind: input, shape index: {}]   ;;  %s1112_s3 = inlined_call_operand.vmem [shape: bf16[4,32,128], index: 3, kind: output, shape index: {0}]   ;;  %s1113_s4 = inlined_call_operand.vmem [shape: f32[4,1,8,128], index: 4, kind: output, shape index: {1}]  }
   0x1   :  { %s1047_s17 = smov 0  }
   0x2 LB: > { %s41_s18 = sadd.s32 1, %s1011_s16  ;;  %p855_p0 = scmp.ge.s32.totalorder %s1015_s17, 1  ;;  %s1015_s17 = sphi %s1047_s17, %s15_s17   ;;  %s1011_s16 = sphi %s1045_s16, %s1115_s16   ;;  %s1007_s15 = sphi %s1043_s15, %s1114_s15  }
   0x3   : > { %p43_p1 = scmp.ge.s32.totalorder %s41_s18, 4  ;;  %p244_p2 = scmp.lt.s32.totalorder %s1015_s17, 5 }
   0x5   : > { %s1117_s18 = smov (%p43_p1, %s41_s18), 0  ;;  %p245_p3 = pnand %p855_p0, %p244_p2 }
   0x6   : > { %p313_p4 = scmp.lt.s32.totalorder (!%p245_p3), %s1007_s15, 3  ;;  %v1017_v14 = vmov (!%p245_p3), 0   ;;  %v883_v32 = vld [vmem:[%s1111_s2] ss:$0 sm:$0xff] (!%p245_p3)  ;;  %vm632_vm0 = vcmask (!%p245_p3), 1040384   ;;  %vm634_vm1 = vcmask (!%p245_p3), 1041408  }
   0x7   : > { %248 = sbr.rel (%p245_p3) target bundleno = 292 (0x124), region = 32 }
   0xe   : > { %s1119_s15 = smov (!%p313_p4, %s1007_s15), 3 }
   0xf   : > { %s891_s19 = sshll.u32 %s1119_s15, 7  ;;  %s890_s23 = sshll.u32 %s1119_s15, 5 }
  0x10   : > { %s1067_s22 = scalar_lea.vmem %s1110_s1, %s891_s19  ;;  %s324_s26 = scalar_lea.vmem %s1109_s0, %s890_s23 }
  0x11   : > { %v977_v0 = vld [vmem:[%s1067_s22 + $0x40] sm:$0xff]   ;;  %v979_v2 = vld [vmem:[%s1067_s22 + $0x48] sm:$0xff]   ;;  %v981_v4 = vld [vmem:[%s1067_s22 + $0x50] sm:$0xff]   ;;  %s892_s29 = sshll.u32 %s1119_s15, 4  ;;  %s862_s7 = sshll.u32 %s1119_s15, 3 }
  0x12   : > { %v978_v1 = vld [vmem:[%s1067_s22] sm:$0xff]   ;;  %908 = vmatprep.subr.bf16.mxu0 %v977_v0  ;;  %936 = vmatprep.subr.bf16.mxu1 %v977_v0  ;;  %v980_v3 = vld [vmem:[%s1067_s22 + $0x8] sm:$0xff]   ;;  %v982_v5 = vld [vmem:[%s1067_s22 + $0x10] sm:$0xff]   ;;  %s354_s6 = scalar_lea.vmem %s1112_s3, %s892_s29  ;;  %s365_s10 = scalar_lea.vmem %s1113_s4, %s862_s7 }
  0x13   : > { %909 = vmatpush3.bf16.msra.mxu0 %v978_v1  ;;  %944 = vmatpush3.bf16.msra.mxu1 %v978_v1  ;;  %v983_v6 = vld [vmem:[%s1067_s22 + $0x58] sm:$0xff]   ;;  %v985_v8 = vld [vmem:[%s1067_s22 + $0x60] sm:$0xff]   ;;  %v987_v10 = vld [vmem:[%s1067_s22 + $0x68] sm:$0xff]  }
  0x14   : > { %910 = vmatprep.subr.bf16.mxu0 %v979_v2  ;;  %937 = vmatprep.subr.bf16.mxu1 %v979_v2  ;;  %v984_v7 = vld [vmem:[%s1067_s22 + $0x18] sm:$0xff]   ;;  %v986_v9 = vld [vmem:[%s1067_s22 + $0x20] sm:$0xff]   ;;  %v376_v12 = vld [vmem:[%s324_s26 + $0x8] sm:$0xff] }
  0x15   : > { %v375_v11 = vld [vmem:[%s324_s26] sm:$0xff]  ;;  %v377_v13 = vld [vmem:[%s324_s26 + $0x10] sm:$0xff]  ;;  %v380_v16 = vmax.bf16 %v1017_v14, %v376_v12  ;;  %v378_v17 = vld [vmem:[%s324_s26 + $0x18] sm:$0xff] }
  0x16   : > { %v379_v15 = vmax.bf16 %v1017_v14, %v375_v11  ;;  %v381_v18 = vmax.bf16 %v1017_v14, %v377_v13  ;;  %v382_v19 = vmax.bf16 %v1017_v14, %v378_v17  ;;  %v988_v20 = vld [vmem:[%s1067_s22 + $0x28] sm:$0xff]   ;;  %v989_v22 = vld [vmem:[%s1067_s22 + $0x70] sm:$0xff]   ;;  %v991_v25 = vld [vmem:[%s1067_s22 + $0x78] sm:$0xff]  }
  0x17   : > { %911 = vmatpush3.bf16.msra.mxu0 %v980_v3  ;;  %945 = vmatpush3.bf16.msra.mxu1 %v980_v3  ;;  %v990_v24 = vld [vmem:[%s1067_s22 + $0x30] sm:$0xff]   ;;  %v992_v26 = vld [vmem:[%s1067_s22 + $0x38] sm:$0xff]  }
  0x18   : > { %912 = vmatprep.subr.bf16.mxu0 %v981_v4  ;;  %938 = vmatprep.subr.bf16.mxu1 %v981_v4  ;;  %v864_v21 = vcombine.high %v379_v15, %v380_v16  ;;  %v866_v23 = vcombine.high %v381_v18, %v382_v19  ;;  %v863_v27 = vcombine.low %v379_v15, %v380_v16 }
  0x19   : > { %v865_v28 = vcombine.low %v381_v18, %v382_v19 }
  0x1a   : > { %567 = vmatprep.mubr.bf16.mxu0 %v864_v21  ;;  %575 = vmatprep.mubr.bf16.mxu1 %v866_v23 }
  0x1b   : > { %913 = vmatpush3.bf16.msra.mxu0 %v982_v5  ;;  %946 = vmatpush3.bf16.msra.mxu1 %v982_v5 }
  0x1c   : > { %914 = vmatprep.subr.bf16.mxu0 %v983_v6  ;;  %939 = vmatprep.subr.bf16.mxu1 %v983_v6 }
  0x1f   : > { %915 = vmatpush3.bf16.msra.mxu0 %v984_v7  ;;  %947 = vmatpush3.bf16.msra.mxu1 %v984_v7 }
  0x20   : > { %916 = vmatprep.subr.bf16.mxu0 %v985_v8  ;;  %940 = vmatprep.subr.bf16.mxu1 %v985_v8 }
  0x23   : > { %917 = vmatpush3.bf16.msra.mxu0 %v986_v9  ;;  %948 = vmatpush3.bf16.msra.mxu1 %v986_v9 }
  0x24   : > { %918 = vmatprep.subr.bf16.mxu0 %v987_v10  ;;  %941 = vmatprep.subr.bf16.mxu1 %v987_v10 }
  0x27   : > { %919 = vmatpush3.bf16.msra.mxu0 %v988_v20  ;;  %949 = vmatpush3.bf16.msra.mxu1 %v988_v20 }
  0x28   : > { %920 = vmatprep.subr.bf16.mxu0 %v989_v22  ;;  %942 = vmatprep.subr.bf16.mxu1 %v989_v22 }
  0x2b   : > { %921 = vmatpush3.bf16.msra.mxu0 %v990_v24  ;;  %950 = vmatpush3.bf16.msra.mxu1 %v990_v24 }
  0x2c   : > { %922 = vmatprep.subr.bf16.mxu0 %v991_v25  ;;  %943 = vmatprep.subr.bf16.mxu1 %v991_v25 }
  0x2f   : > { %923 = vmatpush3.bf16.msra.mxu0 %v992_v26  ;;  %951 = vmatpush3.bf16.msra.mxu1 %v992_v26 }
  0x32   : > { %568 = vmatmul.mubr.bf16.vlgmr.msra.gmra.mrb[0].mxu0 %v863_v27  ;;  %576 = vmatmul.mubr.bf16.vlgmr.msra.gmra.mrb[0].mxu1 %v865_v28 }
 0x105   : > { %v924_v29 = vpop.f32.mrb[0].mxu0  ;;  %v930_v30 = vpop.f32.mrb[0].mxu1 }
 0x106   : > { %v925_v31 = vpop.f32.mrb[1].mxu0  ;;  %v931_v33 = vpop.f32.mrb[1].mxu1 }
 0x107   : > { %v926_v34 = vadd.f32 %v925_v31, %v924_v29  ;;  %v927_v35 = vpop.f32.mrb[2].mxu0  ;;  %v932_v36 = vadd.f32 %v931_v33, %v930_v30  ;;  %v933_v37 = vpop.f32.mrb[2].mxu1 }
 0x108   : > { %v928_v38 = vpop.f32.mrb[3].mxu0  ;;  %v934_v39 = vpop.f32.mrb[3].mxu1 }
 0x109   : > { %v606_v40 = vadd.f32 %v926_v34, %v883_v32  ;;  %v608_v41 = vadd.f32 %v932_v36, %v883_v32  ;;  %v929_v42 = vadd.f32 %v928_v38, %v927_v35  ;;  %v935_v43 = vadd.f32 %v934_v39, %v933_v37 }
 0x10b   : > { %v607_v44 = vadd.f32 %v929_v42, %v883_v32  ;;  %v609_v45 = vadd.f32 %v935_v43, %v883_v32  ;;  %v619_v46 = vmul.f32 %v606_v40, %v606_v40  ;;  %v621_v47 = vmul.f32 %v608_v41, %v608_v41 }
 0x10d   : > { %v610_v48 = vadd.f32 %v607_v44, %v606_v40  ;;  %v620_v49 = vmul.f32 %v607_v44, %v607_v44  ;;  %v900_v50 = vpack.c.bf16 %v607_v44, %v606_v40  ;;  %v905_v51 = vpack.c.bf16 %v609_v45, %v608_v41 }
 0x10e   : > { %v622_v55 = vmul.f32 %v609_v45, %v609_v45 }
 0x10f   : > { %v623_v52 = vadd.f32 %v620_v49, %v619_v46  ;;  %901 = vst [vmem:[%s354_s6] sm:$0xff] %v900_v50   ;;  %v611_v53 = vadd.f32 %v610_v48, %v608_v41  ;;  %907 = vst [vmem:[%s354_s6 + $0x8] sm:$0xff] %v905_v51  }
 0x111   : > { %v612_v54 = vadd.f32 %v611_v53, %v609_v45  ;;  %v624_v56 = vadd.f32 %v623_v52, %v621_v47 }
 0x113   : > { %v613_v57 = vrot.slane %v612_v54, 4  ;;  %v625_v58 = vadd.f32 %v624_v56, %v622_v55 }
 0x115   : > { %v614_v59 = vadd.f32 %v613_v57, %v612_v54  ;;  %v626_v60 = vrot.slane %v625_v58, 4 }
 0x117   : > { %v615_v61 = vrot.slane %v614_v59, 2  ;;  %v627_v62 = vadd.f32 %v626_v60, %v625_v58 }
 0x119   : > { %v616_v63 = vadd.f32 %v615_v61, %v614_v59  ;;  %v628_v0 = vrot.slane %v627_v62, 2 }
 0x11b   : > { %v617_v1 = vrot.slane %v616_v63, 1  ;;  %v629_v2 = vadd.f32 %v628_v0, %v627_v62 }
 0x11d   : > { %v630_v3 = vrot.slane %v629_v2, 1  ;;  %v618_v4 = vadd.f32 %v617_v1, %v616_v63 }
 0x11f   : > { %v631_v5 = vadd.f32 %v630_v3, %v629_v2 }
 0x121   : > { %v633_v6 = vsel %vm632_vm0, %v618_v4, %v631_v5 }
 0x122   : > { %v635_v7 = vsel %vm634_vm1, %v633_v6, 0.0 }
 0x123   : > { %636 = vst [vmem:[%s365_s10] sm:$0xff] %v635_v7 }
 0x124 PF: > { %s15_s17 = sadd.s32 1, %s1015_s17   ;;  %s1114_s15 = smov %s1011_s16 }
 0x125   : > { %p12_p5 = scmp.ge.s32.totalorder %s15_s17, 6   ;;  %s1115_s16 = smov %s1117_s18 }
 0x127   :  { %14 = sbr.rel (!%p12_p5) target bundleno = 2 (0x2), region = 88 }

// kernel: _lambda_.18
= control target key start
LH: loop header
LB: loop body
LE: loop exit
PB: predicated region body
PF: predicated region fallthrough
CT: control target
= control target key end

     0   :  { %s1304_s15 = smov 0   ;;  %s1306_s16 = smov 0   ;;  %s1421_s0 = inlined_call_operand.vmem [shape: bf16[4,128,128], index: 0, kind: input, shape index: {}]   ;;  %s1422_s1 = inlined_call_operand.vmem [shape: bf16[4,128,128], index: 1, kind: input, shape index: {}]   ;;  %s1423_s2 = inlined_call_operand.vmem [shape: f32[1,128], index: 2, kind: input, shape index: {}]   ;;  %s1424_s3 = inlined_call_operand.vmem [shape: bf16[4,128,128], index: 3, kind: output, shape index: {0}]   ;;  %s1425_s4 = inlined_call_operand.vmem [shape: f32[4,1,8,128], index: 4, kind: output, shape index: {1}]  }
   0x1   :  { %s1308_s17 = smov 0  }
   0x2 LB: > { %s41_s18 = sadd.s32 1, %s1272_s16  ;;  %p1048_p0 = scmp.ge.s32.totalorder %s1276_s17, 1  ;;  %s1276_s17 = sphi %s1308_s17, %s15_s17   ;;  %s1272_s16 = sphi %s1306_s16, %s1427_s16   ;;  %s1268_s15 = sphi %s1304_s15, %s1426_s15  }
   0x3   : > { %p43_p1 = scmp.ge.s32.totalorder %s41_s18, 4  ;;  %p241_p2 = scmp.lt.s32.totalorder %s1276_s17, 5 }
   0x5   : > { %s1429_s18 = smov (%p43_p1, %s41_s18), 0  ;;  %p242_p3 = pnand %p1048_p0, %p241_p2 }
   0x6   : > { %p307_p4 = scmp.lt.s32.totalorder (!%p242_p3), %s1268_s15, 3  ;;  %v1278_v6 = vmov (!%p242_p3), 0   ;;  %v1072_v49 = vld [vmem:[%s1423_s2] ss:$0 sm:$0xff] (!%p242_p3)  ;;  %vm768_vm0 = vcmask (!%p242_p3), 1040384   ;;  %vm770_vm1 = vcmask (!%p242_p3), 1041408  }
   0x7   : > { %245 = sbr.rel (%p242_p3) target bundleno = 314 (0x13a), region = 32 }
   0xe   : > { %s1431_s15 = smov (!%p307_p4, %s1268_s15), 3 }
   0xf   : > { %s1325_s19 = sshll.u32 %s1431_s15, 6  ;;  %s1055_s5 = sshll.u32 %s1431_s15, 3 }
  0x10   : > { %s1331_s22 = scalar_lea.vmem %s1422_s1, %s1325_s19  ;;  %s1340_s25 = scalar_lea.vmem %s1421_s0, %s1325_s19 }
  0x11   : > { %v1246_v0 = vld [vmem:[%s1331_s22] sm:$0xff]   ;;  %v1247_v1 = vld [vmem:[%s1331_s22 + $0x8] sm:$0xff]   ;;  %v1248_v2 = vld [vmem:[%s1331_s22 + $0x10] sm:$0xff]   ;;  %s1390_s30 = scalar_lea.vmem %s1424_s3, %s1325_s19  ;;  %s357_s8 = scalar_lea.vmem %s1425_s4, %s1055_s5 }
  0x12   : > { %1173 = vmatprep.subr.bf16.mxu0 %v1246_v0  ;;  %1205 = vmatprep.subr.bf16.mxu1 %v1246_v0  ;;  %v1249_v3 = vld [vmem:[%s1331_s22 + $0x18] sm:$0xff]   ;;  %v379_v4 = vld [vmem:[%s1340_s25] sm:$0xf]  ;;  %v380_v5 = vld [vmem:[%s1340_s25 + $0x4] sm:$0xf] }
  0x13   : > { %1174 = vmatpush3.bf16.msra.mxu0 %v1246_v0  ;;  %1213 = vmatpush3.bf16.msra.mxu1 %v1246_v0  ;;  %v395_v7 = vmax.bf16 %v1278_v6, %v379_v4  ;;  %v396_v8 = vmax.bf16 %v1278_v6, %v380_v5  ;;  %v387_v9 = vld [vmem:[%s1340_s25 + $0x20] sm:$0xf]  ;;  %v388_v11 = vld [vmem:[%s1340_s25 + $0x24] sm:$0xf]  ;;  %v1251_v16 = vld [vmem:[%s1331_s22 + $0x28] sm:$0xff]  }
  0x14   : > { %1175 = vmatprep.subr.bf16.mxu0 %v1247_v1  ;;  %1206 = vmatprep.subr.bf16.mxu1 %v1247_v1  ;;  %v1250_v12 = vld [vmem:[%s1331_s22 + $0x20] sm:$0xff]   ;;  %v403_v13 = vmax.bf16 %v1278_v6, %v387_v9  ;;  %v404_v14 = vmax.bf16 %v1278_v6, %v388_v11  ;;  %v1252_v17 = vld [vmem:[%s1331_s22 + $0x30] sm:$0xff]   ;;  %v1253_v18 = vld [vmem:[%s1331_s22 + $0x38] sm:$0xff]  }
  0x15   : > { %v1056_v10 = vcombine.low %v395_v7, %v396_v8  ;;  %v381_v19 = vld [vmem:[%s1340_s25 + $0x8] sm:$0xf]  ;;  %v382_v20 = vld [vmem:[%s1340_s25 + $0xc] sm:$0xf]  ;;  %v383_v21 = vld [vmem:[%s1340_s25 + $0x10] sm:$0xf] }
  0x16   : > { %v1060_v15 = vcombine.low %v403_v13, %v404_v14  ;;  %v389_v22 = vld [vmem:[%s1340_s25 + $0x28] sm:$0xf]  ;;  %v390_v23 = vld [vmem:[%s1340_s25 + $0x2c] sm:$0xf]  ;;  %v384_v24 = vld [vmem:[%s1340_s25 + $0x14] sm:$0xf]  ;;  %v397_v27 = vmax.bf16 %v1278_v6, %v381_v19  ;;  %v398_v28 = vmax.bf16 %v1278_v6, %v382_v20  ;;  %v399_v29 = vmax.bf16 %v1278_v6, %v383_v21 }
  0x17   : > { %1176 = vmatpush3.bf16.msra.mxu0 %v1247_v1  ;;  %1214 = vmatpush3.bf16.msra.mxu1 %v1247_v1  ;;  %v391_v25 = vld [vmem:[%s1340_s25 + $0x30] sm:$0xf]  ;;  %v392_v26 = vld [vmem:[%s1340_s25 + $0x34] sm:$0xf]  ;;  %v405_v30 = vmax.bf16 %v1278_v6, %v389_v22  ;;  %v406_v31 = vmax.bf16 %v1278_v6, %v390_v23  ;;  %v400_v32 = vmax.bf16 %v1278_v6, %v384_v24  ;;  %v385_v36 = vld [vmem:[%s1340_s25 + $0x18] sm:$0xf] }
  0x18   : > { %1177 = vmatprep.subr.bf16.mxu0 %v1248_v2  ;;  %1207 = vmatprep.subr.bf16.mxu1 %v1248_v2  ;;  %v407_v33 = vmax.bf16 %v1278_v6, %v391_v25  ;;  %v408_v34 = vmax.bf16 %v1278_v6, %v392_v26  ;;  %v1057_v35 = vcombine.low %v397_v27, %v398_v28  ;;  %v386_v39 = vld [vmem:[%s1340_s25 + $0x1c] sm:$0xf]  ;;  %v393_v41 = vld [vmem:[%s1340_s25 + $0x38] sm:$0xf] }
  0x19   : > { %1189 = vmatprep.mubr.bf16.mxu0 %v1056_v10  ;;  %1197 = vmatprep.mubr.bf16.mxu1 %v1060_v15  ;;  %v1061_v37 = vcombine.low %v405_v30, %v406_v31  ;;  %v1058_v38 = vcombine.low %v399_v29, %v400_v32  ;;  %v394_v42 = vld [vmem:[%s1340_s25 + $0x3c] sm:$0xf]  ;;  %v401_v43 = vmax.bf16 %v1278_v6, %v385_v36 }
  0x1a   : > { %v1062_v40 = vcombine.low %v407_v33, %v408_v34  ;;  %v402_v44 = vmax.bf16 %v1278_v6, %v386_v39  ;;  %v409_v45 = vmax.bf16 %v1278_v6, %v393_v41  ;;  %v410_v46 = vmax.bf16 %v1278_v6, %v394_v42 }
  0x1b   : > { %1178 = vmatpush3.bf16.msra.mxu0 %v1248_v2  ;;  %1215 = vmatpush3.bf16.msra.mxu1 %v1248_v2 }
  0x1c   : > { %1179 = vmatprep.subr.bf16.mxu0 %v1249_v3  ;;  %1208 = vmatprep.subr.bf16.mxu1 %v1249_v3  ;;  %v1059_v47 = vcombine.low %v401_v43, %v402_v44  ;;  %v1063_v48 = vcombine.low %v409_v45, %v410_v46 }
  0x1f   : > { %1180 = vmatpush3.bf16.msra.mxu0 %v1249_v3  ;;  %1216 = vmatpush3.bf16.msra.mxu1 %v1249_v3 }
  0x20   : > { %1181 = vmatprep.subr.bf16.mxu0 %v1250_v12  ;;  %1209 = vmatprep.subr.bf16.mxu1 %v1250_v12 }
  0x23   : > { %1182 = vmatpush3.bf16.msra.mxu0 %v1250_v12  ;;  %1217 = vmatpush3.bf16.msra.mxu1 %v1250_v12 }
  0x24   : > { %1183 = vmatprep.subr.bf16.mxu0 %v1251_v16  ;;  %1210 = vmatprep.subr.bf16.mxu1 %v1251_v16 }
  0x27   : > { %1184 = vmatpush3.bf16.msra.mxu0 %v1251_v16  ;;  %1218 = vmatpush3.bf16.msra.mxu1 %v1251_v16 }
  0x28   : > { %1185 = vmatprep.subr.bf16.mxu0 %v1252_v17  ;;  %1211 = vmatprep.subr.bf16.mxu1 %v1252_v17 }
  0x2b   : > { %1186 = vmatpush3.bf16.msra.mxu0 %v1252_v17  ;;  %1219 = vmatpush3.bf16.msra.mxu1 %v1252_v17 }
  0x2c   : > { %1187 = vmatprep.subr.bf16.mxu0 %v1253_v18  ;;  %1212 = vmatprep.subr.bf16.mxu1 %v1253_v18 }
  0x2f   : > { %1188 = vmatpush3.bf16.msra.mxu0 %v1253_v18  ;;  %1220 = vmatpush3.bf16.msra.mxu1 %v1253_v18 }
  0x32   : > { %1190 = vmatmul.mubr.bf16.vlgmr.msra.gmra.mrb[0].mxu0 %v1057_v35  ;;  %1198 = vmatmul.mubr.bf16.vlgmr.msra.gmra.mrb[0].mxu1 %v1061_v37 }
  0x33   : > { %1193 = vmatprep.mubr.bf16.mxu0 %v1058_v38  ;;  %1201 = vmatprep.mubr.bf16.mxu1 %v1062_v40 }
  0x3a   : > { %1194 = vmatmul.mubr.bf16.gmra.mrb[4].mxu0 %v1059_v47  ;;  %1202 = vmatmul.mubr.bf16.gmra.mrb[4].mxu1 %v1063_v48 }
 0x105   : > { %v1191_v50 = vpop.f32.mrb[0].mxu0  ;;  %v1199_v51 = vpop.f32.mrb[0].mxu1 }
 0x106   : > { %v573_v52 = vpop.f32.mrb[1].mxu0  ;;  %v1382_v53 = vadd.f32 %v1199_v51, %v1072_v49  ;;  %v605_v54 = vpop.f32.mrb[1].mxu1  ;;  %v696_v58 = vadd.f32 %v1191_v50, %v1072_v49 }
 0x107   : > { %v694_v55 = vadd.f32 %v1072_v49, %v573_v52  ;;  %v1192_v56 = vpop.f32.mrb[2].mxu0  ;;  %v1200_v57 = vpop.f32.mrb[2].mxu1  ;;  %v702_v61 = vadd.f32 %v1072_v49, %v605_v54 }
 0x108   : > { %v697_v59 = vadd.f32 %v1192_v56, %v1072_v49  ;;  %v576_v60 = vpop.f32.mrb[3].mxu0  ;;  %v1384_v62 = vadd.f32 %v1200_v57, %v1072_v49  ;;  %v608_v63 = vpop.f32.mrb[3].mxu1  ;;  %v733_v9 = vmul.f32 %v696_v58, %v696_v58 }
 0x109   : > { %v695_v0 = vadd.f32 %v1072_v49, %v576_v60  ;;  %v703_v1 = vadd.f32 %v1072_v49, %v608_v63  ;;  %v731_v4 = vmul.f32 %v694_v55, %v694_v55  ;;  %v739_v47 = vmul.f32 %v702_v61, %v702_v61 }
 0x10a   : > { %v1118_v2 = vpack.c.bf16 %v697_v59, %v696_v58  ;;  %v1138_v3 = vpack.c.bf16 %v1384_v62, %v1382_v53  ;;  %v734_v16 = vmul.f32 %v697_v59, %v697_v59  ;;  %v742_v57 = vmul.f32 %v1384_v62, %v1384_v62 }
 0x10b   : > { %v710_v5 = vadd.f32 %v695_v0, %v694_v55  ;;  %v732_v6 = vmul.f32 %v695_v0, %v695_v0  ;;  %v1113_v7 = vpack.c.bf16 %v695_v0, %v694_v55  ;;  %v1133_v8 = vpack.c.bf16 %v703_v1, %v702_v61 }
 0x10c   : > { %1150 = vst [vmem:[%s1390_s30 + $0x8] sm:$0xff] %v1118_v2   ;;  %1154 = vst [vmem:[%s1390_s30 + $0x28] sm:$0xff] %v1138_v3   ;;  %v740_v54 = vmul.f32 %v703_v1, %v703_v1  ;;  %v741_v55 = vmul.f32 %v1382_v53, %v1382_v53 }
 0x10d   : > { %v711_v10 = vadd.f32 %v710_v5, %v696_v58  ;;  %v747_v11 = vadd.f32 %v732_v6, %v731_v4  ;;  %1114 = vst [vmem:[%s1390_s30] sm:$0xff] %v1113_v7   ;;  %v1195_v12 = vpop.f32.mrb[4].mxu0  ;;  %v1203_v13 = vpop.f32.mrb[4].mxu1  ;;  %1153 = vst [vmem:[%s1390_s30 + $0x20] sm:$0xff] %v1133_v8  }
 0x10e   : > { %v589_v14 = vpop.f32.mrb[5].mxu0  ;;  %v621_v15 = vpop.f32.mrb[5].mxu1  ;;  %v700_v22 = vadd.f32 %v1195_v12, %v1072_v49  ;;  %v708_v25 = vadd.f32 %v1203_v13, %v1072_v49 }
 0x10f   : > { %v748_v17 = vadd.f32 %v747_v11, %v733_v9  ;;  %v698_v18 = vadd.f32 %v1072_v49, %v589_v14  ;;  %v712_v19 = vadd.f32 %v711_v10, %v697_v59  ;;  %v1196_v20 = vpop.f32.mrb[6].mxu0  ;;  %v1204_v21 = vpop.f32.mrb[6].mxu1  ;;  %v706_v33 = vadd.f32 %v1072_v49, %v621_v15 }
 0x110   : > { %v701_v23 = vadd.f32 %v1196_v20, %v1072_v49  ;;  %v592_v24 = vpop.f32.mrb[7].mxu0  ;;  %v709_v26 = vadd.f32 %v1204_v21, %v1072_v49  ;;  %v624_v27 = vpop.f32.mrb[7].mxu1  ;;  %v737_v40 = vmul.f32 %v700_v22, %v700_v22  ;;  %v745_v4 = vmul.f32 %v708_v25, %v708_v25 }
 0x111   : > { %v713_v28 = vadd.f32 %v712_v19, %v698_v18  ;;  %v735_v29 = vmul.f32 %v698_v18, %v698_v18  ;;  %v749_v30 = vadd.f32 %v748_v17, %v734_v16  ;;  %v699_v31 = vadd.f32 %v1072_v49, %v592_v24 }
 0x112   : > { %v1128_v32 = vpack.c.bf16 %v701_v23, %v700_v22  ;;  %v1148_v38 = vpack.c.bf16 %v709_v26, %v708_v25  ;;  %v707_v39 = vadd.f32 %v1072_v49, %v624_v27  ;;  %v738_v44 = vmul.f32 %v701_v23, %v701_v23 }
 0x113   : > { %v750_v34 = vadd.f32 %v749_v30, %v735_v29  ;;  %v714_v35 = vadd.f32 %v713_v28, %v699_v31  ;;  %v736_v36 = vmul.f32 %v699_v31, %v699_v31  ;;  %v1123_v37 = vpack.c.bf16 %v699_v31, %v698_v18 }
 0x114   : > { %1152 = vst [vmem:[%s1390_s30 + $0x18] sm:$0xff] %v1128_v32   ;;  %1156 = vst [vmem:[%s1390_s30 + $0x38] sm:$0xff] %v1148_v38   ;;  %v1143_v43 = vpack.c.bf16 %v707_v39, %v706_v33  ;;  %v743_v60 = vmul.f32 %v706_v33, %v706_v33  ;;  %v744_v3 = vmul.f32 %v707_v39, %v707_v39 }
 0x115   : > { %v715_v41 = vadd.f32 %v714_v35, %v700_v22  ;;  %v751_v42 = vadd.f32 %v750_v34, %v736_v36  ;;  %1151 = vst [vmem:[%s1390_s30 + $0x10] sm:$0xff] %v1123_v37   ;;  %v746_v6 = vmul.f32 %v709_v26, %v709_v26 }
 0x116   : > { %1155 = vst [vmem:[%s1390_s30 + $0x30] sm:$0xff] %v1143_v43  }
 0x117   : > { %v752_v45 = vadd.f32 %v751_v42, %v737_v40  ;;  %v716_v46 = vadd.f32 %v715_v41, %v701_v23 }
 0x119   : > { %v717_v48 = vadd.f32 %v716_v46, %v702_v61  ;;  %v753_v50 = vadd.f32 %v752_v45, %v738_v44 }
 0x11b   : > { %v754_v51 = vadd.f32 %v753_v50, %v739_v47  ;;  %v718_v52 = vadd.f32 %v717_v48, %v703_v1 }
 0x11d   : > { %v719_v49 = vadd.f32 %v718_v52, %v1382_v53  ;;  %v755_v56 = vadd.f32 %v754_v51, %v740_v54 }
 0x11f   : > { %v756_v58 = vadd.f32 %v755_v56, %v741_v55  ;;  %v720_v59 = vadd.f32 %v719_v49, %v1384_v62 }
 0x121   : > { %v721_v63 = vadd.f32 %v720_v59, %v706_v33  ;;  %v757_v0 = vadd.f32 %v756_v58, %v742_v57 }
 0x123   : > { %v758_v61 = vadd.f32 %v757_v0, %v743_v60  ;;  %v722_v2 = vadd.f32 %v721_v63, %v707_v39 }
 0x125   : > { %v723_v1 = vadd.f32 %v722_v2, %v708_v25  ;;  %v759_v5 = vadd.f32 %v758_v61, %v744_v3 }
 0x127   : > { %v724_v7 = vadd.f32 %v723_v1, %v709_v26  ;;  %v760_v53 = vadd.f32 %v759_v5, %v745_v4 }
 0x129   : > { %v725_v8 = vrot.slane %v724_v7, 4  ;;  %v761_v9 = vadd.f32 %v760_v53, %v746_v6 }
 0x12b   : > { %v726_v10 = vadd.f32 %v725_v8, %v724_v7  ;;  %v762_v11 = vrot.slane %v761_v9, 4 }
 0x12d   : > { %v727_v12 = vrot.slane %v726_v10, 2  ;;  %v763_v13 = vadd.f32 %v762_v11, %v761_v9 }
 0x12f   : > { %v728_v62 = vadd.f32 %v727_v12, %v726_v10  ;;  %v764_v14 = vrot.slane %v763_v13, 2 }
 0x131   : > { %v729_v15 = vrot.slane %v728_v62, 1  ;;  %v765_v16 = vadd.f32 %v764_v14, %v763_v13 }
 0x133   : > { %v766_v17 = vrot.slane %v765_v16, 1  ;;  %v730_v18 = vadd.f32 %v729_v15, %v728_v62 }
 0x135   : > { %v767_v19 = vadd.f32 %v766_v17, %v765_v16 }
 0x137   : > { %v769_v20 = vsel %vm768_vm0, %v730_v18, %v767_v19 }
 0x138   : > { %v771_v21 = vsel %vm770_vm1, %v769_v20, 0.0 }
 0x139   : > { %772 = vst [vmem:[%s357_s8] sm:$0xff] %v771_v21 }
 0x13a PF: > { %s15_s17 = sadd.s32 1, %s1276_s17   ;;  %s1426_s15 = smov %s1272_s16 }
 0x13b   : > { %p12_p5 = scmp.ge.s32.totalorder %s15_s17, 6   ;;  %s1427_s16 = smov %s1429_s18 }
 0x13d   :  { %14 = sbr.rel (!%p12_p5) target bundleno = 2 (0x2), region = 88 }

// kernel: _lambda_.19
= control target key start
LH: loop header
LB: loop body
LE: loop exit
PB: predicated region body
PF: predicated region fallthrough
CT: control target
= control target key end

     0   :  { %10 = vsyncpa [#allocation4], 0  ;;  %s2101_s0 = inlined_call_operand.vmem [shape: bf16[4,512,128], index: 0, kind: input, shape index: {}]   ;;  %s2102_s1 = inlined_call_operand.vmem [shape: bf16[4,128,128], index: 1, kind: input, shape index: {}]   ;;  %s2103_s2 = inlined_call_operand.vmem [shape: f32[1,128], index: 2, kind: input, shape index: {}]   ;;  %s2104_s3 = inlined_call_operand.vmem [shape: f32[4,512,128], index: 3, kind: output, shape index: {0}]   ;;  %s2105_s4 = inlined_call_operand.hbm [shape: f32[4,2,8,128], index: 4, kind: output, shape index: {1}]  }
   0x1   :  { %12 = vsyncpa [#allocation4 + $0x1], 0  ;;  %s1712_s15 = smov 0   ;;  %s1714_s16 = smov 0  }
   0x2   :  { %s1716_s17 = smov 0   ;;  %s1718_s18 = smov 0  }
   0x3   :  { %s1720_s19 = smov 0   ;;  %s1722_s20 = smov 0  }
   0x4   :  { %s1724_s21 = smov 0   ;;  %s1726_s22 = smov 0  }
   0x5 LB: > { %s1311_s23 = sadd.s32 4294967295, %s1683_s22   ;;  %s1312_s24 = sadd.s32 4294967294, %s1683_s22   ;;  %s1683_s22 = sphi %s1726_s22, %s18_s22   ;;  %s1679_s21 = sphi %s1724_s21, %s2114_s21   ;;  %s1675_s20 = sphi %s1722_s20, %s2113_s20   ;;  %s1671_s19 = sphi %s1720_s19, %s2112_s19   ;;  %s1667_s18 = sphi %s1718_s18, %s2111_s18   ;;  %s1663_s17 = sphi %s1716_s17, %s2110_s17   ;;  %s1659_s16 = sphi %s1714_s16, %s2109_s16   ;;  %s1655_s15 = sphi %s1712_s15, %s2108_s15  }
   0x6   : > { %s40_s25 = sadd.s32 1, %s1675_s20  ;;  %s44_s26 = sadd.s32 1, %s1679_s21 }
   0x7   : > { %p42_p0 = scmp.ge.s32.totalorder %s40_s25, 2  ;;  %p181_p1 = scmp.ne.s32.totalorder %s1663_s17, %s1659_s16 }
   0x8   : > { %p182_p2 = scmp.eq.s32.totalorder %s1311_s23, 7  ;;  %p187_p5 = scmp.ne.s32.totalorder %s1659_s16, %s1655_s15 }
   0x9   : > { %s2116_s25 = smov (%p42_p0, %s40_s25), 0  ;;  %s2118_s26 = smov (!%p42_p0, %s44_s26), %s1679_s21 }
   0xa   : > { %s165_s27 = ssub.s32 %s1675_s20, %s2116_s25  ;;  %p1763_p3 = por %p182_p2, %p181_p1 }
   0xb   : > { %p46_p4 = scmp.ge.s32.totalorder %s2118_s26, 4  ;;  %p188_p6 = scmp.eq.s32.totalorder %s1312_s24, 7 }
   0xc   : > { %p1316_p7 = scmp.ge.s32.totalorder %s1683_s22, 1  ;;  %p244_p9 = scmp.lt.s32.totalorder %s1683_s22, 9 }
   0xd   : > { %s2120_s26 = smov (%p46_p4, %s2118_s26), 0  ;;  %p1772_p8 = por %p188_p6, %p187_p5 }
   0xe   : > { %s164_s30 = ssub.s32 %s1679_s21, %s2120_s26  ;;  %s171_s5 = sadd.s32 1, %s1663_s17 }
   0xf   : > { %s166_s6 = sor.u32 %s165_s27, %s164_s30  ;;  %p245_p10 = pnand %p1316_p7, %p244_p9 }
  0x10   : > { %p169_p11 = scmp.eq.s32.totalorder %s166_s6, 0  ;;  %s1318_s8 = sshll.u32 (!%p245_p10), %s1667_s18, 5  ;;  %v1685_v6 = vmov (!%p245_p10), 0   ;;  %vm1044_vm0 = vcmask (!%p245_p10), 1040384   ;;  %vm1046_vm1 = vcmask (!%p245_p10), 1041408  }
  0x11   : > { %248 = sbr.rel (%p245_p10) target bundleno = 373 (0x175), region = 32  ;;  %p305_p12 = scmp.lt.s32.totalorder (!%p245_p10), %s1671_s19, 3 }
  0x12   : > { %s1781_s7 = scalar_select %p169_p11, %s1663_s17, %s171_s5  }
  0x13   : > { %p307_p13 = scmp.lt.s32.totalorder (!%p245_p10), %s1318_s8, 63  ;;  %s301_s12 = sand.u32 (!%p245_p10), 1, %s1659_s16  }
  0x14   : > { %s1317_s13 = sshll.u32 (!%p245_p10), %s301_s12, 3 }
  0x15   : > { %s303_s27 = scalar_lea.vmem (!%p245_p10), [#allocation3], %s1317_s13 }
  0x18   : > { %s306_s9 = scalar_select %p305_p12, %s1671_s19, 3 }
  0x19   : > { %s2122_s8 = smov (!%p307_p13, %s1318_s8), 63 }
  0x1a   : > { %s1319_s10 = sshll.u32 %s306_s9, 6  ;;  %s1686_s9 = smov [#allocation3]  }
  0x1b   : > { %s1786_s11 = sadd.s32 %s1319_s10, %s2122_s8  ;;  %s1791_s14 = scalar_lea.vmem %s2102_s1, %s1319_s10 }
  0x1c   : > { %v1517_v0 = vld [vmem:[%s1791_s14] sm:$0xff]   ;;  %s1320_s23 = sshll.u32 %s1786_s11, 2  ;;  %v1518_v1 = vld [vmem:[%s1791_s14 + $0x8] sm:$0xff]   ;;  %v1519_v2 = vld [vmem:[%s1791_s14 + $0x10] sm:$0xff]   ;;  %s1325_s8 = sshll.u32 %s1786_s11, 3 }
  0x1d   : > { %1381 = vmatprep.subr.bf16.mxu0 %v1517_v0  ;;  %1429 = vmatprep.subr.bf16.mxu1 %v1517_v0  ;;  %s1799_s30 = scalar_lea.vmem %s2101_s0, %s1320_s23  ;;  %v1520_v5 = vld [vmem:[%s1791_s14 + $0x18] sm:$0xff]   ;;  %v1521_v10 = vld [vmem:[%s1791_s14 + $0x20] sm:$0xff]   ;;  %v1522_v15 = vld [vmem:[%s1791_s14 + $0x28] sm:$0xff]   ;;  %s1905_s11 = scalar_lea.vmem %s2104_s3, %s1325_s8 }
  0x1e   : > { %1382 = vmatpush3.bf16.msra.mxu0 %v1517_v0  ;;  %1437 = vmatpush3.bf16.msra.mxu1 %v1517_v0  ;;  %v383_v3 = vld [vmem:[%s1799_s30] sm:$0xf]  ;;  %v384_v4 = vld [vmem:[%s1799_s30 + $0x4] sm:$0xf]  ;;  %v1523_v17 = vld [vmem:[%s1791_s14 + $0x30] sm:$0xff]   ;;  %s1593_s10 = sshll.u32 %s1686_s9, 4  ;;  %s1594_s10 = int_to_ptr.vmem [resolvable:$false] %s1593_s10 }
  0x1f   : > { %1383 = vmatprep.subr.bf16.mxu0 %v1518_v1  ;;  %1430 = vmatprep.subr.bf16.mxu1 %v1518_v1  ;;  %v415_v7 = vmax.bf16 %v1685_v6, %v383_v3  ;;  %v416_v8 = vmax.bf16 %v1685_v6, %v384_v4  ;;  %v399_v11 = vld [vmem:[%s1799_s30 + $0x40] sm:$0xf]  ;;  %v400_v12 = vld [vmem:[%s1799_s30 + $0x44] sm:$0xf]  ;;  %v1524_v18 = vld [vmem:[%s1791_s14 + $0x38] sm:$0xff]   ;;  %s1352_s14 = sshll.u32 %s1671_s19, 1 }
  0x20   : > { %v431_v13 = vmax.bf16 %v1685_v6, %v399_v11  ;;  %v432_v14 = vmax.bf16 %v1685_v6, %v400_v12  ;;  %v385_v19 = vld [vmem:[%s1799_s30 + $0x8] sm:$0xf]  ;;  %v386_v20 = vld [vmem:[%s1799_s30 + $0xc] sm:$0xf]  ;;  %v387_v21 = vld [vmem:[%s1799_s30 + $0x10] sm:$0xf]  ;;  %s1142_s23 = sadd.s32 %s1667_s18, %s1352_s14 }
  0x21   : > { %v1326_v9 = vcombine.low %v415_v7, %v416_v8  ;;  %v401_v22 = vld [vmem:[%s1799_s30 + $0x48] sm:$0xf]  ;;  %v402_v23 = vld [vmem:[%s1799_s30 + $0x4c] sm:$0xf]  ;;  %v388_v24 = vld [vmem:[%s1799_s30 + $0x14] sm:$0xf]  ;;  %v417_v27 = vmax.bf16 %v1685_v6, %v385_v19  ;;  %v418_v28 = vmax.bf16 %v1685_v6, %v386_v20  ;;  %v419_v29 = vmax.bf16 %v1685_v6, %v387_v21 }
  0x22   : > { %1384 = vmatpush3.bf16.msra.mxu0 %v1518_v1  ;;  %1438 = vmatpush3.bf16.msra.mxu1 %v1518_v1  ;;  %v1334_v16 = vcombine.low %v431_v13, %v432_v14  ;;  %v403_v25 = vld [vmem:[%s1799_s30 + $0x50] sm:$0xf]  ;;  %v404_v26 = vld [vmem:[%s1799_s30 + $0x54] sm:$0xf]  ;;  %v433_v30 = vmax.bf16 %v1685_v6, %v401_v22  ;;  %v434_v31 = vmax.bf16 %v1685_v6, %v402_v23  ;;  %v389_v36 = vld [vmem:[%s1799_s30 + $0x18] sm:$0xf] }
  0x23   : > { %1385 = vmatprep.subr.bf16.mxu0 %v1519_v2  ;;  %1431 = vmatprep.subr.bf16.mxu1 %v1519_v2  ;;  %v420_v32 = vmax.bf16 %v1685_v6, %v388_v24  ;;  %v435_v33 = vmax.bf16 %v1685_v6, %v403_v25  ;;  %v436_v34 = vmax.bf16 %v1685_v6, %v404_v26  ;;  %v390_v37 = vld [vmem:[%s1799_s30 + $0x1c] sm:$0xf]  ;;  %v391_v40 = vld [vmem:[%s1799_s30 + $0x20] sm:$0xf]  ;;  %v405_v42 = vld [vmem:[%s1799_s30 + $0x58] sm:$0xf] }
  0x24   : > { %1397 = vmatprep.mubr.bf16.mxu0 %v1326_v9  ;;  %1413 = vmatprep.mubr.bf16.mxu1 %v1334_v16  ;;  %v1327_v35 = vcombine.low %v417_v27, %v418_v28  ;;  %v1335_v38 = vcombine.low %v433_v30, %v434_v31  ;;  %v406_v43 = vld [vmem:[%s1799_s30 + $0x5c] sm:$0xf]  ;;  %v392_v44 = vld [vmem:[%s1799_s30 + $0x24] sm:$0xf]  ;;  %v407_v45 = vld [vmem:[%s1799_s30 + $0x60] sm:$0xf]  ;;  %v421_v47 = vmax.bf16 %v1685_v6, %v389_v36 }
  0x25   : > { %v1328_v39 = vcombine.low %v419_v29, %v420_v32  ;;  %v1336_v41 = vcombine.low %v435_v33, %v436_v34  ;;  %v408_v46 = vld [vmem:[%s1799_s30 + $0x64] sm:$0xf]  ;;  %v422_v48 = vmax.bf16 %v1685_v6, %v390_v37  ;;  %v423_v49 = vmax.bf16 %v1685_v6, %v391_v40  ;;  %v393_v56 = vld [vmem:[%s1799_s30 + $0x28] sm:$0xf]  ;;  %v394_v57 = vld [vmem:[%s1799_s30 + $0x2c] sm:$0xf] }
  0x26   : > { %1386 = vmatpush3.bf16.msra.mxu0 %v1519_v2  ;;  %1439 = vmatpush3.bf16.msra.mxu1 %v1519_v2  ;;  %v437_v50 = vmax.bf16 %v1685_v6, %v405_v42  ;;  %v438_v51 = vmax.bf16 %v1685_v6, %v406_v43  ;;  %v424_v52 = vmax.bf16 %v1685_v6, %v392_v44  ;;  %v395_v60 = vld [vmem:[%s1799_s30 + $0x30] sm:$0xf]  ;;  %v409_v62 = vld [vmem:[%s1799_s30 + $0x68] sm:$0xf]  ;;  %v410_v63 = vld [vmem:[%s1799_s30 + $0x6c] sm:$0xf] }
  0x27   : > { %1387 = vmatprep.subr.bf16.mxu0 %v1520_v5  ;;  %1432 = vmatprep.subr.bf16.mxu1 %v1520_v5  ;;  %v439_v53 = vmax.bf16 %v1685_v6, %v407_v45  ;;  %v440_v54 = vmax.bf16 %v1685_v6, %v408_v46  ;;  %v1329_v55 = vcombine.low %v421_v47, %v422_v48  ;;  %v396_v0 = vld [vmem:[%s1799_s30 + $0x34] sm:$0xf]  ;;  %v411_v1 = vld [vmem:[%s1799_s30 + $0x70] sm:$0xf]  ;;  %v397_v13 = vld [vmem:[%s1799_s30 + $0x38] sm:$0xf] }
  0x28   : > { %v1337_v58 = vcombine.low %v437_v50, %v438_v51  ;;  %v1330_v59 = vcombine.low %v423_v49, %v424_v52  ;;  %v412_v2 = vld [vmem:[%s1799_s30 + $0x74] sm:$0xf]  ;;  %v425_v3 = vmax.bf16 %v1685_v6, %v393_v56  ;;  %v426_v4 = vmax.bf16 %v1685_v6, %v394_v57  ;;  %v398_v16 = vld [vmem:[%s1799_s30 + $0x3c] sm:$0xf]  ;;  %v1874_v26 = vld [vmem:[%s2103_s2] ss:$0 sm:$0xff] }
  0x29   : > { %v1338_v61 = vcombine.low %v439_v53, %v440_v54  ;;  %v441_v7 = vmax.bf16 %v1685_v6, %v409_v62  ;;  %v442_v8 = vmax.bf16 %v1685_v6, %v410_v63  ;;  %v428_v9 = vmax.bf16 %v1685_v6, %v396_v0  ;;  %v414_v19 = vld [vmem:[%s1799_s30 + $0x7c] sm:$0xf]  ;;  %s1353_s24 = sshll.u32 %s1142_s23, 7  ;;  %s1126_s18 = scalar_lea.sflag [#allocation4], %s301_s12 }
  0x2a   : > { %1388 = vmatpush3.bf16.msra.mxu0 %v1520_v5  ;;  %1440 = vmatpush3.bf16.msra.mxu1 %v1520_v5  ;;  %v427_v5 = vmax.bf16 %v1685_v6, %v395_v60  ;;  %v444_v11 = vmax.bf16 %v1685_v6, %v412_v2  ;;  %v1331_v12 = vcombine.low %v425_v3, %v426_v4  ;;  %s2048_s8 = scalar_lea.hbm %s2105_s4, %s1353_s24 }
  0x2b   : > { %1389 = vmatprep.subr.bf16.mxu0 %v1521_v10  ;;  %1433 = vmatprep.subr.bf16.mxu1 %v1521_v10  ;;  %v1339_v14 = vcombine.low %v441_v7, %v442_v8  ;;  %v429_v20 = vmax.bf16 %v1685_v6, %v397_v13  ;;  %v430_v21 = vmax.bf16 %v1685_v6, %v398_v16 }
  0x2c   : > { %v446_v23 = vmax.bf16 %v1685_v6, %v414_v19 }
  0x2d   : > { %v1333_v24 = vcombine.low %v429_v20, %v430_v21 }
  0x2e   : > { %1390 = vmatpush3.bf16.msra.mxu0 %v1521_v10  ;;  %1441 = vmatpush3.bf16.msra.mxu1 %v1521_v10  ;;  %v443_v10 = vmax.bf16 %v1685_v6, %v411_v1 }
  0x2f   : > { %1391 = vmatprep.subr.bf16.mxu0 %v1522_v15  ;;  %1434 = vmatprep.subr.bf16.mxu1 %v1522_v15 }
  0x32   : > { %1392 = vmatpush3.bf16.msra.mxu0 %v1522_v15  ;;  %1442 = vmatpush3.bf16.msra.mxu1 %v1522_v15  ;;  %v1332_v15 = vcombine.low %v427_v5, %v428_v9 }
  0x33   : > { %1393 = vmatprep.subr.bf16.mxu0 %v1523_v17  ;;  %1435 = vmatprep.subr.bf16.mxu1 %v1523_v17 }
  0x36   : > { %1394 = vmatpush3.bf16.msra.mxu0 %v1523_v17  ;;  %1443 = vmatpush3.bf16.msra.mxu1 %v1523_v17  ;;  %v1340_v17 = vcombine.low %v443_v10, %v444_v11 }
  0x37   : > { %1395 = vmatprep.subr.bf16.mxu0 %v1524_v18  ;;  %1436 = vmatprep.subr.bf16.mxu1 %v1524_v18 }
  0x3a   : > { %1396 = vmatpush3.bf16.msra.mxu0 %v1524_v18  ;;  %1444 = vmatpush3.bf16.msra.mxu1 %v1524_v18  ;;  %v413_v18 = vld [vmem:[%s1799_s30 + $0x78] sm:$0xf]  ;;  %s1146_s30 = sshll.u32 %s303_s27, 4  ;;  %s2050_s30 = int_to_ptr.vmem [resolvable:$true] %s1146_s30 }
  0x3b   : > { %v445_v22 = vmax.bf16 %v1685_v6, %v413_v18  ;;  %s1589_s19 = scalar_lea.vmem %s2050_s30, 128  ;;  %p1596_p4 = scmp.lt.s32.totalorder %s2050_s30, %s1594_s10 }
  0x3c   : > { %p1590_p0 = scmp.ne.s32.totalorder %s2050_s30, %s1589_s19 }
  0x3d   : > { %1398 = vmatmul.mubr.bf16.vlgmr.msra.gmra.mrb[0].mxu0 %v1327_v35  ;;  %1414 = vmatmul.mubr.bf16.vlgmr.msra.gmra.mrb[0].mxu1 %v1335_v38  ;;  %v1341_v25 = vcombine.low %v445_v22, %v446_v23 }
  0x3e   : > { %1401 = vmatprep.mubr.bf16.mxu0 %v1328_v39  ;;  %1417 = vmatprep.mubr.bf16.mxu1 %v1336_v41  ;;  %p1591_p1 = pnand %p1590_p0, %p1763_p3 }
  0x40   : > { %p1592_p2 = pneg %p1591_p1 }
  0x45   : > { %1402 = vmatmul.mubr.bf16.gmra.mrb[4].mxu0 %v1329_v55  ;;  %1418 = vmatmul.mubr.bf16.gmra.mrb[4].mxu1 %v1337_v58 }
  0x46   : > { %1405 = vmatprep.mubr.bf16.mxu0 %v1330_v59  ;;  %1421 = vmatprep.mubr.bf16.mxu1 %v1338_v61 }
  0x4d   : > { %1406 = vmatmul.mubr.bf16.gmra.mrb[8].mxu0 %v1331_v12  ;;  %1422 = vmatmul.mubr.bf16.gmra.mrb[8].mxu1 %v1339_v14 }
  0x4e   : > { %1409 = vmatprep.mubr.bf16.mxu0 %v1332_v15  ;;  %1425 = vmatprep.mubr.bf16.mxu1 %v1340_v17 }
  0x55   : > { %1410 = vmatmul.mubr.bf16.gmra.mrb[12].mxu0 %v1333_v24  ;;  %1426 = vmatmul.mubr.bf16.gmra.mrb[12].mxu1 %v1341_v25 }
 0x110   : > { %v1399_v27 = vpop.f32.mrb[0].mxu0  ;;  %v1415_v28 = vpop.f32.mrb[0].mxu1 }
 0x111   : > { %v908_v29 = vadd.f32 %v1399_v27, %v1874_v26  ;;  %v673_v30 = vpop.f32.mrb[1].mxu0  ;;  %v737_v31 = vpop.f32.mrb[1].mxu1  ;;  %v1880_v36 = vadd.f32 %v1415_v28, %v1874_v26 }
 0x112   : > { %v906_v32 = vadd.f32 %v1874_v26, %v673_v30  ;;  %v1400_v6 = vpop.f32.mrb[2].mxu0  ;;  %v1416_v33 = vpop.f32.mrb[2].mxu1  ;;  %v1884_v39 = vadd.f32 %v1874_v26, %v737_v31 }
 0x113   : > { %1525 = vtanh.f32 %v908_v29  ;;  %v909_v34 = vadd.f32 %v1400_v6, %v1874_v26  ;;  %v676_v35 = vpop.f32.mrb[3].mxu0  ;;  %v740_v37 = vpop.f32.mrb[3].mxu1  ;;  %v1887_v41 = vadd.f32 %v1416_v33, %v1874_v26  ;;  %v977_v45 = vmul.f32 %v908_v29, %v908_v29 }
 0x114   : > { %1527 = vtanh.f32 %v906_v32  ;;  %v907_v38 = vadd.f32 %v1874_v26, %v676_v35  ;;  %v975_v40 = vmul.f32 %v906_v32, %v906_v32  ;;  %v1890_v44 = vadd.f32 %v1874_v26, %v740_v37 }
 0x115   : > { %1529 = vtanh.f32 %v909_v34  ;;  %v978_v50 = vmul.f32 %v909_v34, %v909_v34 }
 0x116   : > { %v938_v42 = vadd.f32 %v907_v38, %v906_v32  ;;  %v976_v43 = vmul.f32 %v907_v38, %v907_v38  ;;  %1531 = vtanh.f32 %v907_v38 }
 0x117   : > { %1533 = vtanh.f32 %v1880_v36 }
 0x118   : > { %v939_v46 = vadd.f32 %v938_v42, %v908_v29  ;;  %v1007_v47 = vadd.f32 %v976_v43, %v975_v40  ;;  %v1403_v48 = vpop.f32.mrb[4].mxu0  ;;  %1535 = vtanh.f32 %v1884_v39  ;;  %v1419_v49 = vpop.f32.mrb[4].mxu1 }
 0x119   : > { %v912_v51 = vadd.f32 %v1403_v48, %v1874_v26  ;;  %v689_v52 = vpop.f32.mrb[5].mxu0  ;;  %1537 = vtanh.f32 %v1887_v41  ;;  %v1898_v53 = vadd.f32 %v1419_v49, %v1874_v26  ;;  %v753_v54 = vpop.f32.mrb[5].mxu1 }
 0x11a   : > { %v1008_v55 = vadd.f32 %v1007_v47, %v977_v45  ;;  %v910_v56 = vadd.f32 %v1874_v26, %v689_v52  ;;  %v940_v57 = vadd.f32 %v939_v46, %v909_v34  ;;  %v1404_v58 = vpop.f32.mrb[6].mxu0  ;;  %1539 = vtanh.f32 %v1890_v44  ;;  %v1420_v59 = vpop.f32.mrb[6].mxu1 }
 0x11b   : > { %1541 = vtanh.f32 %v912_v51  ;;  %v913_v60 = vadd.f32 %v1404_v58, %v1874_v26  ;;  %v692_v61 = vpop.f32.mrb[7].mxu0  ;;  %v756_v62 = vpop.f32.mrb[7].mxu1  ;;  %v1910_v4 = vadd.f32 %v1874_v26, %v753_v54  ;;  %v1915_v8 = vadd.f32 %v1420_v59, %v1874_v26 }
 0x11c   : > { %v941_v63 = vadd.f32 %v940_v57, %v910_v56  ;;  %v979_v0 = vmul.f32 %v910_v56, %v910_v56  ;;  %v1009_v1 = vadd.f32 %v1008_v55, %v978_v50  ;;  %1543 = vtanh.f32 %v910_v56 }
 0x11d   : > { %v1526_v2 = vpop.eup %1525  ;;  %1545 = vtanh.f32 %v913_v60  ;;  %v911_v3 = vadd.f32 %v1874_v26, %v692_v61  ;;  %v1918_v9 = vadd.f32 %v1874_v26, %v756_v62  ;;  %v981_v14 = vmul.f32 %v912_v51, %v912_v51 }
 0x11e   : > { %v1528_v5 = vpop.eup %1527  ;;  %1083 = vst [vmem:[%s1905_s11 + $0x10] sm:$0xff] %v1526_v2  ;;  %v1010_v7 = vadd.f32 %v1009_v1, %v979_v0  ;;  %1547 = vtanh.f32 %v1898_v53  ;;  %v982_v24 = vmul.f32 %v913_v60, %v913_v60 }
 0x11f   : > { %v1530_v10 = vpop.eup %1529  ;;  %1081 = vst [vmem:[%s1905_s11] sm:$0xff] %v1528_v5  ;;  %v942_v11 = vadd.f32 %v941_v63, %v911_v3  ;;  %v980_v12 = vmul.f32 %v911_v3, %v911_v3  ;;  %1549 = vtanh.f32 %v911_v3 }
 0x120   : > { %v1532_v13 = vpop.eup %1531  ;;  %1084 = vst [vmem:[%s1905_s11 + $0x18] sm:$0xff] %v1530_v10  ;;  %v1407_v15 = vpop.f32.mrb[8].mxu0  ;;  %1551 = vtanh.f32 %v1910_v4 }
 0x121   : > { %v1423_v16 = vpop.f32.mrb[8].mxu1  ;;  %v1534_v17 = vpop.eup %1533  ;;  %1082 = vst [vmem:[%s1905_s11 + $0x8] sm:$0xff] %v1532_v13  ;;  %v943_v18 = vadd.f32 %v942_v11, %v912_v51  ;;  %v1011_v19 = vadd.f32 %v1010_v7, %v980_v12  ;;  %v916_v20 = vadd.f32 %v1407_v15, %v1874_v26  ;;  %1553 = vtanh.f32 %v1915_v8 }
 0x122   : > { %v705_v21 = vpop.f32.mrb[9].mxu0  ;;  %v769_v22 = vpop.f32.mrb[9].mxu1  ;;  %1099 = vst [vmem:[%s1905_s11 + $0x90] sm:$0xff] %v1534_v17  ;;  %1555 = vtanh.f32 %v1918_v9  ;;  %v1930_v28 = vadd.f32 %v1423_v16, %v1874_v26 }
 0x123   : > { %v1536_v23 = vpop.eup %1535  ;;  %v914_v25 = vadd.f32 %v1874_v26, %v705_v21  ;;  %v1408_v27 = vpop.f32.mrb[10].mxu0  ;;  %v1012_v31 = vadd.f32 %v1011_v19, %v981_v14  ;;  %1557 = vtanh.f32 %v916_v20  ;;  %v944_v32 = vadd.f32 %v943_v18, %v913_v60 }
 0x124   : > { %v1424_v29 = vpop.f32.mrb[10].mxu1  ;;  %v1538_v30 = vpop.eup %1537  ;;  %1097 = vst [vmem:[%s1905_s11 + $0x80] sm:$0xff] %v1536_v23  ;;  %v1934_v33 = vadd.f32 %v1874_v26, %v769_v22  ;;  %v917_v38 = vadd.f32 %v1408_v27, %v1874_v26  ;;  %v985_v54 = vmul.f32 %v916_v20, %v916_v20 }
 0x125   : > { %v708_v6 = vpop.f32.mrb[11].mxu0  ;;  %v772_v34 = vpop.f32.mrb[11].mxu1  ;;  %v983_v37 = vmul.f32 %v914_v25, %v914_v25  ;;  %1559 = vtanh.f32 %v914_v25  ;;  %1100 = vst [vmem:[%s1905_s11 + $0x98] sm:$0xff] %v1538_v30  ;;  %v945_v43 = vadd.f32 %v944_v32, %v914_v25  ;;  %v1013_v45 = vadd.f32 %v1012_v31, %v982_v24 }
 0x126   : > { %v1540_v35 = vpop.eup %1539  ;;  %v915_v40 = vadd.f32 %v1874_v26, %v708_v6  ;;  %1561 = vtanh.f32 %v1930_v28  ;;  %v1944_v51 = vadd.f32 %v1424_v29, %v1874_v26  ;;  %v1951_v62 = vadd.f32 %v1874_v26, %v772_v34 }
 0x127   : > { %v1542_v42 = vpop.eup %1541  ;;  %1098 = vst [vmem:[%s1905_s11 + $0x88] sm:$0xff] %v1540_v35  ;;  %1563 = vtanh.f32 %v917_v38  ;;  %v1014_v49 = vadd.f32 %v1013_v45, %v983_v37  ;;  %v986_v1 = vmul.f32 %v917_v38, %v917_v38 }
 0x128   : > { %v1544_v46 = vpop.eup %1543  ;;  %1087 = vst [vmem:[%s1905_s11 + $0x30] sm:$0xff] %v1542_v42  ;;  %v984_v47 = vmul.f32 %v915_v40, %v915_v40  ;;  %v946_v50 = vadd.f32 %v945_v43, %v915_v40  ;;  %1565 = vtanh.f32 %v915_v40  ;;  %v1411_v55 = vpop.f32.mrb[12].mxu0  ;;  %v991_v40 = vmul.f32 %v1884_v39, %v1884_v39 }
 0x129   : > { %v1546_v48 = vpop.eup %1545  ;;  %1085 = vst [vmem:[%s1905_s11 + $0x20] sm:$0xff] %v1544_v46  ;;  %1567 = vtanh.f32 %v1934_v33  ;;  %v1427_v56 = vpop.f32.mrb[12].mxu1  ;;  %v920_v60 = vadd.f32 %v1411_v55, %v1874_v26  ;;  %v992_v55 = vmul.f32 %v1890_v44, %v1890_v44 }
 0x12a   : > { %v1548_v52 = vpop.eup %1547  ;;  %1088 = vst [vmem:[%s1905_s11 + $0x38] sm:$0xff] %v1546_v48  ;;  %v947_v58 = vadd.f32 %v946_v50, %v916_v20  ;;  %v1015_v59 = vadd.f32 %v1014_v49, %v984_v47  ;;  %v721_v61 = vpop.f32.mrb[13].mxu0  ;;  %1569 = vtanh.f32 %v1944_v51  ;;  %v1958_v13 = vadd.f32 %v1427_v56, %v1874_v26 }
 0x12b   : > { %v1550_v57 = vpop.eup %1549  ;;  %1103 = vst [vmem:[%s1905_s11 + $0xb0] sm:$0xff] %v1548_v52  ;;  %v785_v63 = vpop.f32.mrb[13].mxu1  ;;  %v918_v2 = vadd.f32 %v1874_v26, %v721_v61  ;;  %1571 = vtanh.f32 %v920_v60  ;;  %v989_v34 = vmul.f32 %v920_v60, %v920_v60 }
 0x12c   : > { %v1552_v0 = vpop.eup %1551  ;;  %1086 = vst [vmem:[%s1905_s11 + $0x28] sm:$0xff] %v1550_v57  ;;  %v1412_v3 = vpop.f32.mrb[14].mxu0  ;;  %v1016_v10 = vadd.f32 %v1015_v59, %v985_v54  ;;  %v948_v11 = vadd.f32 %v947_v58, %v917_v38  ;;  %v1967_v24 = vadd.f32 %v1874_v26, %v785_v63  ;;  %v994_v63 = vmul.f32 %v1887_v41, %v1887_v41 }
 0x12d   : > { %v1428_v5 = vpop.f32.mrb[14].mxu1  ;;  %v1554_v7 = vpop.eup %1553  ;;  %1101 = vst [vmem:[%s1905_s11 + $0xa0] sm:$0xff] %v1552_v0  ;;  %v987_v16 = vmul.f32 %v918_v2, %v918_v2  ;;  %1573 = vtanh.f32 %v918_v2  ;;  %v921_v17 = vadd.f32 %v1412_v3, %v1874_v26 }
 0x12e   : > { %v724_v12 = vpop.f32.mrb[15].mxu0  ;;  %v788_v14 = vpop.f32.mrb[15].mxu1  ;;  %1104 = vst [vmem:[%s1905_s11 + $0xb8] sm:$0xff] %v1554_v7  ;;  %v949_v20 = vadd.f32 %v948_v11, %v918_v2  ;;  %v1017_v21 = vadd.f32 %v1016_v10, %v986_v1  ;;  %1575 = vtanh.f32 %v1951_v62  ;;  %v1971_v30 = vadd.f32 %v1428_v5, %v1874_v26 }
 0x12f   : > { %v1556_v15 = vpop.eup %1555  ;;  %v919_v18 = vadd.f32 %v1874_v26, %v724_v12  ;;  %1577 = vtanh.f32 %v921_v17  ;;  %v1976_v32 = vadd.f32 %v1874_v26, %v788_v14  ;;  %v990_v42 = vmul.f32 %v921_v17, %v921_v17 }
 0x130   : > { %v1558_v19 = vpop.eup %1557  ;;  %1102 = vst [vmem:[%s1905_s11 + $0xa8] sm:$0xff] %v1556_v15  ;;  %v1018_v27 = vadd.f32 %v1017_v21, %v987_v16  ;;  %v995_v1 = vmul.f32 %v1910_v4, %v1910_v4  ;;  %v996_v11 = vmul.f32 %v1918_v9, %v1918_v9  ;;  %v998_v15 = vmul.f32 %v1915_v8, %v1915_v8 }
 0x131   : > { %v1560_v22 = vpop.eup %1559  ;;  %1091 = vst [vmem:[%s1905_s11 + $0x50] sm:$0xff] %v1558_v19  ;;  %v988_v23 = vmul.f32 %v919_v18, %v919_v18  ;;  %v950_v29 = vadd.f32 %v949_v20, %v919_v18  ;;  %1579 = vtanh.f32 %v919_v18  ;;  %v1000_v21 = vmul.f32 %v1951_v62, %v1951_v62 }
 0x132   : > { %v1562_v25 = vpop.eup %1561  ;;  %1089 = vst [vmem:[%s1905_s11 + $0x40] sm:$0xff] %v1560_v22  ;;  %1581 = vtanh.f32 %v1958_v13 }
 0x133   : > { %v1564_v31 = vpop.eup %1563  ;;  %1107 = vst [vmem:[%s1905_s11 + $0xd0] sm:$0xff] %v1562_v25  ;;  %v951_v35 = vadd.f32 %v950_v29, %v920_v60  ;;  %v1019_v37 = vadd.f32 %v1018_v27, %v988_v23  ;;  %1583 = vtanh.f32 %v1967_v24 }
 0x134   : > { %v1566_v6 = vpop.eup %1565  ;;  %1092 = vst [vmem:[%s1905_s11 + $0x58] sm:$0xff] %v1564_v31  ;;  %1585 = vtanh.f32 %v1971_v30 }
 0x135   : > { %v1568_v38 = vpop.eup %1567  ;;  %1090 = vst [vmem:[%s1905_s11 + $0x48] sm:$0xff] %v1566_v6  ;;  %v1020_v26 = vadd.f32 %v1019_v37, %v989_v34  ;;  %v952_v43 = vadd.f32 %v951_v35, %v921_v17  ;;  %1587 = vtanh.f32 %v1976_v32  ;;  %v999_v17 = vmul.f32 %v1934_v33, %v1934_v33 }
 0x136   : > { %1105 = vst [vmem:[%s1905_s11 + $0xc0] sm:$0xff] %v1568_v38  ;;  %v1570_v45 = vpop.eup %1569  ;;  %v1005_v34 = vmul.f32 %v1958_v13, %v1958_v13  ;;  %v1006_v37 = vmul.f32 %v1971_v30, %v1971_v30 }
 0x137   : > { %v1572_v46 = vpop.eup %1571  ;;  %v953_v47 = vadd.f32 %v952_v43, %v1884_v39  ;;  %v1021_v48 = vadd.f32 %v1020_v26, %v990_v42  ;;  %1108 = vst [vmem:[%s1905_s11 + $0xd8] sm:$0xff] %v1570_v45  ;;  %v993_v39 = vmul.f32 %v1880_v36, %v1880_v36 }
 0x138   : > { %v1574_v49 = vpop.eup %1573  ;;  %1095 = vst [vmem:[%s1905_s11 + $0x70] sm:$0xff] %v1572_v46 }
 0x139   : > { %v1576_v50 = vpop.eup %1575  ;;  %1093 = vst [vmem:[%s1905_s11 + $0x60] sm:$0xff] %v1574_v49  ;;  %v1022_v52 = vadd.f32 %v1021_v48, %v991_v40  ;;  %v954_v54 = vadd.f32 %v953_v47, %v1890_v44 }
 0x13a   : > { %v1578_v56 = vpop.eup %1577  ;;  %1106 = vst [vmem:[%s1905_s11 + $0xc8] sm:$0xff] %v1576_v50 }
 0x13b   : > { %v1580_v57 = vpop.eup %1579  ;;  %1096 = vst [vmem:[%s1905_s11 + $0x78] sm:$0xff] %v1578_v56  ;;  %v955_v58 = vadd.f32 %v954_v54, %v1880_v36  ;;  %v1023_v59 = vadd.f32 %v1022_v52, %v992_v55 }
 0x13c   : > { %v1582_v60 = vpop.eup %1581  ;;  %1094 = vst [vmem:[%s1905_s11 + $0x68] sm:$0xff] %v1580_v57 }
 0x13d   : > { %v1584_v61 = vpop.eup %1583  ;;  %v1024_v44 = vadd.f32 %v1023_v59, %v993_v39  ;;  %v956_v0 = vadd.f32 %v955_v58, %v1887_v41  ;;  %1111 = vst [vmem:[%s1905_s11 + $0xf0] sm:$0xff] %v1582_v60  ;;  %v997_v41 = vmul.f32 %v1898_v53, %v1898_v53 }
 0x13e   : > { %v1586_v2 = vpop.eup %1585  ;;  %1109 = vst [vmem:[%s1905_s11 + $0xe0] sm:$0xff] %v1584_v61 }
 0x13f   : > { %v1588_v3 = vpop.eup %1587  ;;  %v957_v36 = vadd.f32 %v956_v0, %v1910_v4  ;;  %v1025_v5 = vadd.f32 %v1024_v44, %v994_v63  ;;  %1112 = vst [vmem:[%s1905_s11 + $0xf8] sm:$0xff] %v1586_v2 }
 0x140   : > { %1110 = vst [vmem:[%s1905_s11 + $0xe8] sm:$0xff] %v1588_v3  ;;  %s1595_s11 = scalar_lea.vmem %s1594_s10, 256 }
 0x141   : > { %v1026_v7 = vadd.f32 %v1025_v5, %v995_v1  ;;  %v958_v10 = vadd.f32 %v957_v36, %v1918_v9  ;;  %p1597_p5 = scmp.lt.s32.totalorder %s1595_s11, %s1589_s19 }
 0x143   : > { %v959_v12 = vadd.f32 %v958_v10, %v1898_v53  ;;  %v1027_v14 = vadd.f32 %v1026_v7, %v996_v11  ;;  %v1001_v53 = vmul.f32 %v1930_v28, %v1930_v28  ;;  %p1598_p6 = por %p1597_p5, %p1596_p4 }
 0x145   : > { %v1028_v16 = vadd.f32 %v1027_v14, %v997_v41  ;;  %v960_v4 = vadd.f32 %v959_v12, %v1915_v8  ;;  %v1002_v8 = vmul.f32 %v1944_v51, %v1944_v51  ;;  %p1599_p7 = pnand %p1598_p6, %p1592_p2 }
 0x147   : > { %v961_v18 = vadd.f32 %v960_v4, %v1934_v33  ;;  %v1029_v19 = vadd.f32 %v1028_v16, %v998_v15  ;;  %v1003_v33 = vmul.f32 %v1967_v24, %v1967_v24 }
 0x149   : > { %v1030_v20 = vadd.f32 %v1029_v19, %v999_v17  ;;  %v962_v9 = vadd.f32 %v961_v18, %v1951_v62 }
 0x14b   : > { %v963_v22 = vadd.f32 %v962_v9, %v1930_v28  ;;  %v1031_v23 = vadd.f32 %v1030_v20, %v1000_v21  ;;  %v1004_v28 = vmul.f32 %v1976_v32, %v1976_v32 }
 0x14d   : > { %v1032_v25 = vadd.f32 %v1031_v23, %v1001_v53  ;;  %v964_v27 = vadd.f32 %v963_v22, %v1944_v51 }
 0x14f   : > { %v965_v29 = vadd.f32 %v964_v27, %v1967_v24  ;;  %v1033_v31 = vadd.f32 %v1032_v25, %v1002_v8 }
 0x151   : > { %v1034_v62 = vadd.f32 %v1033_v31, %v1003_v33  ;;  %v966_v6 = vadd.f32 %v965_v29, %v1976_v32 }
 0x153   : > { %v967_v35 = vadd.f32 %v966_v6, %v1958_v13  ;;  %v1035_v51 = vadd.f32 %v1034_v62, %v1004_v28 }
 0x155   : > { %v968_v24 = vadd.f32 %v967_v35, %v1971_v30  ;;  %v1036_v38 = vadd.f32 %v1035_v51, %v1005_v34 }
 0x157   : > { %v969_v40 = vrot.slane %v968_v24, 4  ;;  %v1037_v42 = vadd.f32 %v1036_v38, %v1006_v37 }
 0x159   : > { %v970_v26 = vadd.f32 %v969_v40, %v968_v24  ;;  %v1038_v43 = vrot.slane %v1037_v42, 4 }
 0x15b   : > { %v971_v45 = vrot.slane %v970_v26, 2  ;;  %v1039_v32 = vadd.f32 %v1038_v43, %v1037_v42 }
 0x15d   : > { %v972_v46 = vadd.f32 %v971_v45, %v970_v26  ;;  %v1040_v47 = vrot.slane %v1039_v32, 2 }
 0x15f   : > { %v973_v13 = vrot.slane %v972_v46, 1  ;;  %v1041_v48 = vadd.f32 %v1040_v47, %v1039_v32 }
 0x161   : > { %v1042_v49 = vrot.slane %v1041_v48, 1  ;;  %v974_v30 = vadd.f32 %v973_v13, %v972_v46 }
 0x163   : > { %v1043_v50 = vadd.f32 %v1042_v49, %v1041_v48 }
 0x165   : > { %v1045_v52 = vsel %vm1044_vm0, %v974_v30, %v1043_v50 }
 0x166   : > { %v1047_v54 = vsel %vm1046_vm1, %v1045_v52, 0.0 }
 0x167   : > { %1048 = vst [vmem:[%s303_s27] sm:$0xff] %v1047_v54 }
 0x168   : > { %1602 = shalt.err (!%p1599_p7)
}
 0x169   : > { %s1603_s12 = scalar_lea.hbm %s2048_s8, 128  ;;  %s1607_s23 = scalar_lea.hbm %s2105_s4, 1024 }
 0x16a   : > { %p1604_p9 = scmp.ne.s32.totalorder %s2048_s8, %s1603_s12  ;;  %p1608_p12 = scmp.lt.u32.totalorder %s2048_s8, %s2105_s4 }
 0x16b   : > { %p1609_p13 = scmp.lt.u32.totalorder %s1607_s23, %s1603_s12  ;;  %p1611_p1 = scmp.lt.u32.totalorder %s1603_s12, %s2048_s8 }
 0x16c   : > { %p1605_p10 = pnand %p1604_p9, %p1763_p3 }
 0x16d   : > { %p1610_p0 = por %p1609_p13, %p1608_p12 }
 0x16e   : > { %p1606_p11 = pneg %p1605_p10 }
 0x16f   : > { %p1612_p2 = por %p1611_p1, %p1610_p0 }
 0x171   : > { %p1613_p4 = pnand %p1612_p2, %p1606_p11 }
 0x173   : > { %1616 = shalt.err (!%p1613_p4)
}
 0x174   : > { %1445 = dma.vmem_to_hbm [thread:$0]  (%p1763_p3), %s2050_s30, 128, %s2048_s8, %s1126_s18  }
 0x175 PF: > { %p1451_p5 = scmp.ge.s32.totalorder %s1683_s22, 2  ;;  %s1173_s5 = sand.u32 1, %s1655_s15  }
 0x176   : > { %s1174_s6 = scalar_lea.sflag [#allocation4], %s1173_s5 }
 0x177   : > { %p1448_p6 = pnand %p1451_p5, %p1772_p8 }
 0x179   : > { %1650 = dma.done.wait (!%p1448_p6), %s1174_s6, 128  }
 0x17a   : > { %1652 = vsyncadd (!%p1448_p6), %s1174_s6, 4294967168  ;;  %s18_s22 = sadd.s32 1, %s1683_s22   ;;  %s2108_s15 = smov %s1659_s16 }
 0x17b   : > { %p15_p7 = scmp.ge.s32.totalorder %s18_s22, 10   ;;  %s2109_s16 = smov %s1663_s17 }
 0x17c   : > { %s2110_s17 = smov %s1781_s7  ;;  %s2111_s18 = smov %s1675_s20 }
 0x17d   : > { %s2112_s19 = smov %s1679_s21  ;;  %s2113_s20 = smov %s2116_s25 }
 0x17e   : > { %s2114_s21 = smov %s2120_s26  ;;  %17 = sbr.rel (!%p15_p7) target bundleno = 5 (0x5), region = 93 }
 0x185   :  { %1179 = vsyncpa [#allocation4], 1 }
 0x186   :  { %1181 = vsyncpa [#allocation4 + $0x1], 1 }

</bundles_post_ra>
